<compile_context>
chip_gen: v6e
topology: v6e:2x2x1
jax: 0.10.0
libtpu: 0.0.40
codegen_flags: <defaults>
</compile_context>

<pallas_src>
import math
import functools

import jax
import jax.numpy as jnp
from jax.experimental import pallas as pl
from jax.experimental.pallas import tpu as pltpu

# ----------------------------- mini config ---------------------------------
CFG = dict(
    dim=64,          # CONFIG['dim'] scaled down
    n_heads=4,       # CONFIG['n_heads'] scaled down
    ff_dim=128,      # CONFIG['ff_dim'] scaled down
    n_layers=2,      # CONFIG['n_layers'] scaled down
    vocab_size=256,  # CONFIG['vocab_size'] scaled down
)
LN_EPS = 1e-5
MASK_NEG = -1e30     # finite "minus infinity": softmax-equivalent, NaN-safe


# ----------------------------- in-kernel helpers ---------------------------
def _layernorm(v, w, b):
    mu = jnp.mean(v, axis=-1, keepdims=True)
    var = jnp.mean((v - mu) * (v - mu), axis=-1, keepdims=True)
    return (v - mu) * jax.lax.rsqrt(var + LN_EPS) * w + b


def _erf(x):
    # Abramowitz & Stegun 7.1.26 polynomial approximation (|err| <= 1.5e-7).
    a1, a2, a3, a4, a5 = 0.254829592, -0.284496736, 1.421413741, -1.453152027, 1.061405429
    p = 0.3275911
    s = jnp.where(x >= 0.0, 1.0, -1.0)
    ax = jnp.abs(x)
    t = 1.0 / (1.0 + p * ax)
    y = 1.0 - (((((a5 * t + a4) * t + a3) * t + a2) * t + a1) * t) * jnp.exp(-ax * ax)
    return s * y


def _gelu_exact(x):
    # torch.nn.functional.gelu default (erf based)
    return 0.5 * x * (1.0 + _erf(x * (1.0 / math.sqrt(2.0))))


# ----------------------------- fused Pallas kernel --------------------------
def hrom_fused_kernel(x_ref, pad_ref, cos_ref, sin_ref, rot_ref,
                      ln1_w_ref, ln1_b_ref,
                      wqkv_ref, bqkv_ref, wo_ref, bo_ref,
                      ln2_w_ref, ln2_b_ref,
                      ff1_w_ref, ff1_b_ref, ff2_w_ref, ff2_b_ref,
                      nf_w_ref, nf_b_ref, head_w_ref, head_b_ref,
                      out_ref, x_vmem,
                      *, n_heads):
    l = pl.program_id(1)
    n_layers = pl.num_programs(1)

    # Load the embedded tokens for this batch tile once; resident across layers.
    @pl.when(l == 0)
    def _():
        x_vmem[...] = x_ref[...]

    x = x_vmem[...]                               # (NT, D) f32, NT = B_TILE * T
    NT, D = x.shape
    T = cos_ref.shape[0]
    BT = NT // T
    H = n_heads
    hd = D // H
    bf16 = jnp.bfloat16

    # ---------------------------- attention --------------------------------
    nx = _layernorm(x, ln1_w_ref[0], ln1_b_ref[0])              # (NT, D)
    qkv = jnp.dot(nx.astype(bf16), wqkv_ref[0],
                  preferred_element_type=jnp.float32) + bqkv_ref[0]   # (NT, 3D)
    q = qkv[:, :D]
    k = qkv[:, D:2 * D]
    v = qkv[:, 2 * D:]

    # rotate_half as a constant block-diagonal +/-1 matrix -> MXU, no lane shuffles.
    q_rh = jnp.dot(q.astype(bf16), rot_ref[...], preferred_element_type=jnp.float32)
    k_rh = jnp.dot(k.astype(bf16), rot_ref[...], preferred_element_type=jnp.float32)

    cos = cos_ref[...][None, :, :]                # (1, T, D) head-tiled tables
    sin = sin_ref[...][None, :, :]
    scale = 1.0 / math.sqrt(hd)
    q3 = (q.reshape(BT, T, D) * cos + q_rh.reshape(BT, T, D) * sin) * scale
    k3 = k.reshape(BT, T, D) * cos + k_rh.reshape(BT, T, D) * sin
    v3 = v.reshape(BT, T, D)

    # Causal + padding mask built in-kernel (finite value -> NaN-free softmax).
    rows = jax.lax.broadcasted_iota(jnp.int32, (T, T), 0)
    cols = jax.lax.broadcasted_iota(jnp.int32, (T, T), 1)
    causal = jnp.where(cols <= rows, 0.0, MASK_NEG).astype(jnp.float32)
    mask = causal[None, :, :] + pad_ref[...]      # (BT, T, T)

    ctx_heads = []
    for h in range(H):                            # static, H small (unrolled)
        sl = slice(h * hd, (h + 1) * hd)
        qh = q3[:, :, sl].astype(bf16)            # (BT, T, hd)
        kh = k3[:, :, sl].astype(bf16)
        vh = v3[:, :, sl].astype(bf16)
        s = jnp.einsum('btd,bsd->bts', qh, kh,
                       preferred_element_type=jnp.float32)       # (BT, T, T)
        s = s + mask
        s = s - jnp.max(s, axis=-1, keepdims=True)
        p = jnp.exp(s)
        p = p * pl.reciprocal(jnp.sum(p, axis=-1, keepdims=True), approx=True)
        ctx_heads.append(jnp.einsum('bts,bsd->btd', p.astype(bf16), vh,
                                    preferred_element_type=jnp.float32))
    ctx = jnp.concatenate(ctx_heads, axis=-1).reshape(NT, D)      # (NT, D)

    attn = jnp.dot(ctx.astype(bf16), wo_ref[0],
                   preferred_element_type=jnp.float32) + bo_ref[0]
    x = x + attn

    # ------------- feed-forward: Linear -> SwiGLU -> Linear -----------------
    nx2 = _layernorm(x, ln2_w_ref[0], ln2_b_ref[0])
    h1 = jnp.dot(nx2.astype(bf16), ff1_w_ref[0],
                 preferred_element_type=jnp.float32) + ff1_b_ref[0]   # (NT, 2FF)
    ffd = h1.shape[1] // 2
    swi = h1[:, :ffd] * _gelu_exact(h1[:, ffd:])                  # a * gelu(gate)
    ffo = jnp.dot(swi.astype(bf16), ff2_w_ref[0],
                  preferred_element_type=jnp.float32) + ff2_b_ref[0]
    x = x + ffo
    x_vmem[...] = x

    # ------------- final LayerNorm + LM head fused into last layer ----------
    @pl.when(l == n_layers - 1)
    def _():
        nx3 = _layernorm(x, nf_w_ref[...], nf_b_ref[...])
        # TODO(synk): at production dims (V=32000) tile this matmul over V with
        # an extra grid axis so head_w need not stay VMEM-resident on v7x.
        logits = jnp.dot(nx3.astype(bf16), head_w_ref[...],
                         preferred_element_type=jnp.float32) + head_b_ref[...]
        out_ref[...] = logits.astype(out_ref.dtype)               # (NT, V) lane-dense


# ----------------------------- wrapper --------------------------------------
def hrom_forward(params, input_ids, attention_mask=None):
    """Full HROM forward: embed -> n_layers x HROMBlock -> LayerNorm -> head."""
    B, T = input_ids.shape
    D, H, L, V, FF = (CFG['dim'], CFG['n_heads'], CFG['n_layers'],
                      CFG['vocab_size'], CFG['ff_dim'])
    hd = D // H

    # 2-way batch tiling keeps a "parallel" grid axis (both v7x TCs); fall back
    # to 1 tile if B is odd.
    b_tiles = 2 if (B >= 2 and B % 2 == 0) else 1
    b_tile = B // b_tiles
    nt = b_tile * T

    # Embedding lookup (glue, plain JAX). dropout == identity (eval mode).
    x = jnp.take(params['embed'], input_ids, axis=0).astype(jnp.float32)  # (B, T, D)
    x_flat = x.reshape(B * T, D)

    # Padding additive mask, O(B*T); causal is built in-kernel. Finite value.
    if attention_mask is None:
        attention_mask = jnp.ones((B, T), jnp.float32)
    pad_add = ((1.0 - attention_mask.astype(jnp.float32)) * MASK_NEG).reshape(B, 1, T)

    # Rotary tables (glue): per-head cos/sin of cat(freqs, freqs), tiled to D lanes.
    inv_freq = 1.0 / (10000.0 ** (jnp.arange(0, hd, 2, dtype=jnp.float32) / hd))
    t = jnp.arange(T, dtype=jnp.float32)
    freqs = t[:, None] * inv_freq[None, :]                    # (T, hd/2)
    pos = jnp.concatenate([freqs, freqs], axis=-1)            # (T, hd)
    cos_full = jnp.tile(jnp.cos(pos), (1, H))                 # (T, D)
    sin_full = jnp.tile(jnp.sin(pos), (1, H))                 # (T, D)

    # rotate_half(t) == t @ R, R block-diagonal +/-1 permutation per head.
    idx = jnp.arange(D)
    head_pos = idx % hd
    src = jnp.where(head_pos < hd // 2, idx + hd // 2, idx - hd // 2)
    sign = jnp.where(head_pos < hd // 2, -1.0, 1.0).astype(jnp.float32)
    r_full = jnp.zeros((D, D), jnp.float32).at[src, idx].set(sign).astype(jnp.bfloat16)

    st = params['stack']
    layer_keys = ('ln1_w', 'ln1_b', 'w_qkv', 'b_qkv', 'w_o', 'b_o',
                  'ln2_w', 'ln2_b', 'ff1_w', 'ff1_b', 'ff2_w', 'ff2_b')
    stacked_args = tuple(st[k] for k in layer_keys)
    args = (x_flat, pad_add, cos_full, sin_full, r_full) + stacked_args + (
        params['norm_w'], params['norm_b'], params['head_w'], params['head_b'])

    def layer_spec(a):      # streams layer l's slice; auto double-buffered
        nd = a.ndim
        return pl.BlockSpec((1,) + a.shape[1:],
                            lambda bt, l, _nd=nd: (l,) + (0,) * (_nd - 1))

    def const_spec(a):      # resident across the whole grid
        nd = a.ndim
        return pl.BlockSpec(a.shape, lambda bt, l, _nd=nd: (0,) * _nd)

    in_specs = [
        pl.BlockSpec((nt, D), lambda bt, l: (bt, 0)),          # x (per batch tile)
        pl.BlockSpec((b_tile, 1, T), lambda bt, l: (bt, 0, 0)),  # pad_add
        const_spec(cos_full), const_spec(sin_full), const_spec(r_full),
    ] + [layer_spec(a) for a in stacked_args] + [
        const_spec(params['norm_w']), const_spec(params['norm_b']),
        const_spec(params['head_w']), const_spec(params['head_b']),
    ]
    out_spec = pl.BlockSpec((nt, V), lambda bt, l: (bt, 0))

    # Advisory cost estimate for the XLA scheduler.
    ntok = B * T
    flops_layer = (2 * ntok * D * (3 * D)        # merged QKV
                   + 2 * 2 * ntok * D * D        # rotate_half matmuls (q, k)
                   + 2 * 2 * B * T * T * D       # scores + ctx (all heads)
                   + 2 * ntok * D * D            # output projection
                   + 2 * ntok * D * (2 * FF)     # ff1
                   + 2 * ntok * FF * D)          # ff2
    flops = L * flops_layer + 2 * ntok * D * V
    transcendentals = L * (B * H * T * T + ntok * FF)
    stream_bytes = sum(int(a.size) * a.dtype.itemsize for a in stacked_args) * b_tiles
    const_bytes = sum(int(a.size) * a.dtype.itemsize
                      for a in (cos_full, sin_full, r_full, params['norm_w'],
                                params['norm_b'], params['head_w'], params['head_b']))
    io_bytes = int(x_flat.size) * 4 + int(pad_add.size) * 4 + ntok * V * 4
    cost = pl.CostEstimate(flops=int(flops), transcendentals=int(transcendentals),
                           bytes_accessed=int(stream_bytes + const_bytes + io_bytes))

    kernel = functools.partial(hrom_fused_kernel, n_heads=H)
    logits_flat = pl.pallas_call(
        kernel,
        out_shape=jax.ShapeDtypeStruct((B * T, V), jnp.float32),
        grid_spec=pltpu.PrefetchScalarGridSpec(
            num_scalar_prefetch=0,
            grid=(b_tiles, L),                 # batch tiles parallel, layers sequential
            in_specs=in_specs,
            out_specs=out_spec,
            scratch_shapes=[pltpu.VMEM((nt, D), jnp.float32)]),
        compiler_params=pltpu.CompilerParams(
            dimension_semantics=("parallel", "arbitrary")),
        cost_estimate=cost,
    )(*args)
    return logits_flat.reshape(B, T, V)


# ----------------------------- parameter init ------------------------------
def _uniform(key, shape, limit, dtype=jnp.bfloat16):
    return jax.random.uniform(key, shape, jnp.float32, -limit, limit).astype(dtype)


def init_params(key):
    D, H, FF, V, L = CFG['dim'], CFG['n_heads'], CFG['ff_dim'], CFG['vocab_size'], CFG['n_layers']
    ks = iter(jax.random.split(key, 8))
    lim_qkv = math.sqrt(6.0 / (D + 3 * D))
    lim_proj = math.sqrt(6.0 / (D + D))
    lim_ff1 = math.sqrt(6.0 / (D + 2 * FF))
    lim_ff2 = math.sqrt(6.0 / (FF + D))
    lim_head = math.sqrt(6.0 / (D + V))

    stack = {
        'ln1_w': jnp.ones((L, 1, D), jnp.float32),
        'ln1_b': jnp.zeros((L, 1, D), jnp.float32),
        'w_qkv': _uniform(next(ks), (L, D, 3 * D), lim_qkv),     # merged QKV, bf16
        'b_qkv': jnp.zeros((L, 1, 3 * D), jnp.float32),
        'w_o': _uniform(next(ks), (L, D, D), lim_proj),          # unsplit proj, bf16
        'b_o': jnp.zeros((L, 1, D), jnp.float32),
        'ln2_w': jnp.ones((L, 1, D), jnp.float32),
        'ln2_b': jnp.zeros((L, 1, D), jnp.float32),
        'ff1_w': _uniform(next(ks), (L, D, 2 * FF), lim_ff1),
        'ff1_b': jnp.zeros((L, 1, 2 * FF), jnp.float32),
        'ff2_w': _uniform(next(ks), (L, FF, D), lim_ff2),
        'ff2_b': jnp.zeros((L, 1, D), jnp.float32),
    }
    params = {
        'embed': 0.02 * jax.random.normal(next(ks), (V, D), jnp.float32),
        'norm_w': jnp.ones((1, D), jnp.float32),
        'norm_b': jnp.zeros((1, D), jnp.float32),
        'head_w': _uniform(next(ks), (D, V), lim_head),
        'head_b': jnp.zeros((1, V), jnp.float32),
        'stack': stack,
    }
    return params


# ----------------------------- main -----------------------------------------
if __name__ == "__main__":
    key = jax.random.PRNGKey(0)
    pkey, dkey = jax.random.split(key)
    params = init_params(pkey)

    B, T = 4, 16
    input_ids = jax.random.randint(dkey, (B, T), 0, CFG['vocab_size'], dtype=jnp.int32)
    attention_mask = jnp.ones((B, T), dtype=jnp.int32)
    attention_mask = attention_mask.at[0, T - 3:].set(0)   # exercise the pad path

    logits = hrom_forward(params, input_ids, attention_mask)
    logits = jax.block_until_ready(logits)

    assert logits.shape == (B, T, CFG['vocab_size'])
    assert bool(jnp.all(jnp.isfinite(logits)))
    print("KERNEL_OK")
</pallas_src>

<mosaic_0001>
module attributes {stable_mosaic.version = 11 : i64} {
  func.func @hrom_fused_kernel(%arg0: i32, %arg1: i32, %arg2: memref<32x64xf32, #tpu.memory_space<vmem>>, %arg3: memref<2x1x16xf32, #tpu.memory_space<vmem>>, %arg4: memref<16x64xf32, #tpu.memory_space<vmem>>, %arg5: memref<16x64xf32, #tpu.memory_space<vmem>>, %arg6: memref<64x64xbf16, #tpu.memory_space<vmem>>, %arg7: memref<1x1x64xf32, #tpu.memory_space<vmem>>, %arg8: memref<1x1x64xf32, #tpu.memory_space<vmem>>, %arg9: memref<1x64x192xbf16, #tpu.memory_space<vmem>>, %arg10: memref<1x1x192xf32, #tpu.memory_space<vmem>>, %arg11: memref<1x64x64xbf16, #tpu.memory_space<vmem>>, %arg12: memref<1x1x64xf32, #tpu.memory_space<vmem>>, %arg13: memref<1x1x64xf32, #tpu.memory_space<vmem>>, %arg14: memref<1x1x64xf32, #tpu.memory_space<vmem>>, %arg15: memref<1x64x256xbf16, #tpu.memory_space<vmem>>, %arg16: memref<1x1x256xf32, #tpu.memory_space<vmem>>, %arg17: memref<1x128x64xbf16, #tpu.memory_space<vmem>>, %arg18: memref<1x1x64xf32, #tpu.memory_space<vmem>>, %arg19: memref<1x64xf32, #tpu.memory_space<vmem>>, %arg20: memref<1x64xf32, #tpu.memory_space<vmem>>, %arg21: memref<64x256xbf16, #tpu.memory_space<vmem>>, %arg22: memref<1x256xf32, #tpu.memory_space<vmem>>, %arg23: memref<32x256xf32, #tpu.memory_space<vmem>>, %arg24: memref<32x64xf32, #tpu.memory_space<vmem>>) attributes {dimension_semantics = [#tpu.dimension_semantics<parallel>, #tpu.dimension_semantics<arbitrary>], iteration_bounds = array<i64: 2, 2>, scalar_prefetch = 0 : i64, scratch_operands = 1 : i64, tpu.core_type = #tpu.core_type<tc>, window_params = [{transform_indices = @transform_0, window_bounds = array<i64: 32, 64>}, {transform_indices = @transform_1, window_bounds = array<i64: 2, 1, 16>}, {pipeline_mode = #tpu.pipeline_mode<synchronous>, transform_indices = @transform_2, window_bounds = array<i64: 16, 64>}, {pipeline_mode = #tpu.pipeline_mode<synchronous>, transform_indices = @transform_3, window_bounds = array<i64: 16, 64>}, {pipeline_mode = #tpu.pipeline_mode<synchronous>, transform_indices = @transform_4, window_bounds = array<i64: 64, 64>}, {transform_indices = @transform_5, window_bounds = array<i64: 1, 1, 64>}, {transform_indices = @transform_6, window_bounds = array<i64: 1, 1, 64>}, {transform_indices = @transform_7, window_bounds = array<i64: 1, 64, 192>}, {transform_indices = @transform_8, window_bounds = array<i64: 1, 1, 192>}, {transform_indices = @transform_9, window_bounds = array<i64: 1, 64, 64>}, {transform_indices = @transform_10, window_bounds = array<i64: 1, 1, 64>}, {transform_indices = @transform_11, window_bounds = array<i64: 1, 1, 64>}, {transform_indices = @transform_12, window_bounds = array<i64: 1, 1, 64>}, {transform_indices = @transform_13, window_bounds = array<i64: 1, 64, 256>}, {transform_indices = @transform_14, window_bounds = array<i64: 1, 1, 256>}, {transform_indices = @transform_15, window_bounds = array<i64: 1, 128, 64>}, {transform_indices = @transform_16, window_bounds = array<i64: 1, 1, 64>}, {pipeline_mode = #tpu.pipeline_mode<synchronous>, transform_indices = @transform_17, window_bounds = array<i64: 1, 64>}, {pipeline_mode = #tpu.pipeline_mode<synchronous>, transform_indices = @transform_18, window_bounds = array<i64: 1, 64>}, {pipeline_mode = #tpu.pipeline_mode<synchronous>, transform_indices = @transform_19, window_bounds = array<i64: 64, 256>}, {pipeline_mode = #tpu.pipeline_mode<synchronous>, transform_indices = @transform_20, window_bounds = array<i64: 1, 256>}, {transform_indices = @transform_21, window_bounds = array<i64: 32, 256>}]} {
    %c0_i32 = arith.constant 0 : i32
    %0 = arith.cmpi eq, %arg1, %c0_i32 : i32
    %1 = arith.extui %0 : i1 to i32
    %c0_i32_0 = arith.constant 0 : i32
    %2 = arith.cmpi ne, %1, %c0_i32_0 : i32
    scf.if %2 {
      %c0_102 = arith.constant 0 : index
      %c0_103 = arith.constant 0 : index
      %265 = vector.load %arg2[%c0_102, %c0_103] : memref<32x64xf32, #tpu.memory_space<vmem>>, vector<32x64xf32>
      %c0_104 = arith.constant 0 : index
      %c0_105 = arith.constant 0 : index
      %266 = vector.load %arg24[%c0_104, %c0_105] : memref<32x64xf32, #tpu.memory_space<vmem>>, vector<32x64xf32>
      tpu.vector_store %arg24[%c0_104, %c0_105], %265 {strides = array<i32>} : memref<32x64xf32, #tpu.memory_space<vmem>>, vector<32x64xf32>,
    } else {
    }
    %c0 = arith.constant 0 : index
    %c0_1 = arith.constant 0 : index
    %3 = vector.load %arg24[%c0, %c0_1] : memref<32x64xf32, #tpu.memory_space<vmem>>, vector<32x64xf32>
    %c0_2 = arith.constant 0 : index
    %c0_3 = arith.constant 0 : index
    %c0_4 = arith.constant 0 : index
    %4 = vector.load %arg7[%c0_2, %c0_3, %c0_4] : memref<1x1x64xf32, #tpu.memory_space<vmem>>, vector<1x1x64xf32>
    %5 = vector.shape_cast %4 : vector<1x1x64xf32> to vector<1x64xf32>
    %c0_5 = arith.constant 0 : index
    %c0_6 = arith.constant 0 : index
    %c0_7 = arith.constant 0 : index
    %6 = vector.load %arg8[%c0_5, %c0_6, %c0_7] : memref<1x1x64xf32, #tpu.memory_space<vmem>>, vector<1x1x64xf32>
    %7 = vector.shape_cast %6 : vector<1x1x64xf32> to vector<1x64xf32>
    %cst = arith.constant dense<0.000000e+00> : vector<32xf32>
    %8 = vector.multi_reduction <add>, %3, %cst [1] : vector<32x64xf32> to vector<32xf32>
    %9 = vector.shape_cast %8 : vector<32xf32> to vector<32x1xf32>
    %cst_8 = arith.constant 6.400000e+01 : f32
    %10 = vector.broadcast %cst_8 : f32 to vector<32x1xf32>
    %11 = arith.divf %9, %10 : vector<32x1xf32>
    %12 = vector.broadcast %11 : vector<32x1xf32> to vector<32x64xf32>
    %13 = arith.subf %3, %12 : vector<32x64xf32>
    %14 = vector.broadcast %11 : vector<32x1xf32> to vector<32x64xf32>
    %15 = arith.subf %3, %14 : vector<32x64xf32>
    %16 = arith.mulf %13, %15 : vector<32x64xf32>
    %cst_9 = arith.constant dense<0.000000e+00> : vector<32xf32>
    %17 = vector.multi_reduction <add>, %16, %cst_9 [1] : vector<32x64xf32> to vector<32xf32>
    %18 = vector.shape_cast %17 : vector<32xf32> to vector<32x1xf32>
    %cst_10 = arith.constant 6.400000e+01 : f32
    %19 = vector.broadcast %cst_10 : f32 to vector<32x1xf32>
    %20 = arith.divf %18, %19 : vector<32x1xf32>
    %21 = vector.broadcast %11 : vector<32x1xf32> to vector<32x64xf32>
    %22 = arith.subf %3, %21 : vector<32x64xf32>
    %cst_11 = arith.constant 9.99999974E-6 : f32
    %23 = vector.broadcast %cst_11 : f32 to vector<32x1xf32>
    %24 = arith.addf %20, %23 : vector<32x1xf32>
    %25 = math.rsqrt %24 : vector<32x1xf32>
    %26 = vector.broadcast %25 : vector<32x1xf32> to vector<32x64xf32>
    %27 = arith.mulf %22, %26 : vector<32x64xf32>
    %28 = vector.broadcast %5 : vector<1x64xf32> to vector<32x64xf32>
    %29 = arith.mulf %27, %28 : vector<32x64xf32>
    %30 = vector.broadcast %7 : vector<1x64xf32> to vector<32x64xf32>
    %31 = arith.addf %29, %30 : vector<32x64xf32>
    %32 = arith.truncf %31 : vector<32x64xf32> to vector<32x64xbf16>
    %c0_12 = arith.constant 0 : index
    %c0_13 = arith.constant 0 : index
    %c0_14 = arith.constant 0 : index
    %33 = vector.load %arg9[%c0_12, %c0_13, %c0_14] : memref<1x64x192xbf16, #tpu.memory_space<vmem>>, vector<1x64x192xbf16>
    %34 = vector.shape_cast %33 : vector<1x64x192xbf16> to vector<64x192xbf16>
    %cst_15 = arith.constant dense<0.000000e+00> : vector<32x192xf32>
    %35 = tpu.matmul %32, %34, %cst_15 {dimension_numbers = #tpu.dot_dimension_numbers<[1], [0], [0], [1], [0, 0, 1, 1], [], []>} : vector<32x64xbf16>, vector<64x192xbf16>, vector<32x192xf32> -> vector<32x192xf32>
    %c0_16 = arith.constant 0 : index
    %c0_17 = arith.constant 0 : index
    %c0_18 = arith.constant 0 : index
    %36 = vector.load %arg10[%c0_16, %c0_17, %c0_18] : memref<1x1x192xf32, #tpu.memory_space<vmem>>, vector<1x1x192xf32>
    %37 = vector.shape_cast %36 : vector<1x1x192xf32> to vector<1x192xf32>
    %38 = vector.broadcast %37 : vector<1x192xf32> to vector<32x192xf32>
    %39 = arith.addf %35, %38 : vector<32x192xf32>
    %40 = vector.extract_strided_slice %39 {offsets = [0, 0], sizes = [32, 64], strides = [1, 1]} : vector<32x192xf32> to vector<32x64xf32>
    %41 = vector.extract_strided_slice %39 {offsets = [0, 64], sizes = [32, 64], strides = [1, 1]} : vector<32x192xf32> to vector<32x64xf32>
    %42 = vector.extract_strided_slice %39 {offsets = [0, 128], sizes = [32, 64], strides = [1, 1]} : vector<32x192xf32> to vector<32x64xf32>
    %43 = arith.truncf %40 : vector<32x64xf32> to vector<32x64xbf16>
    %c0_19 = arith.constant 0 : index
    %c0_20 = arith.constant 0 : index
    %44 = vector.load %arg6[%c0_19, %c0_20] : memref<64x64xbf16, #tpu.memory_space<vmem>>, vector<64x64xbf16>
    %cst_21 = arith.constant dense<0.000000e+00> : vector<32x64xf32>
    %45 = tpu.matmul %43, %44, %cst_21 {dimension_numbers = #tpu.dot_dimension_numbers<[1], [0], [0], [1], [0, 0, 1, 1], [], []>} : vector<32x64xbf16>, vector<64x64xbf16>, vector<32x64xf32> -> vector<32x64xf32>
    %46 = arith.truncf %41 : vector<32x64xf32> to vector<32x64xbf16>
    %c0_22 = arith.constant 0 : index
    %c0_23 = arith.constant 0 : index
    %47 = vector.load %arg6[%c0_22, %c0_23] : memref<64x64xbf16, #tpu.memory_space<vmem>>, vector<64x64xbf16>
    %cst_24 = arith.constant dense<0.000000e+00> : vector<32x64xf32>
    %48 = tpu.matmul %46, %47, %cst_24 {dimension_numbers = #tpu.dot_dimension_numbers<[1], [0], [0], [1], [0, 0, 1, 1], [], []>} : vector<32x64xbf16>, vector<64x64xbf16>, vector<32x64xf32> -> vector<32x64xf32>
    %c0_25 = arith.constant 0 : index
    %c0_26 = arith.constant 0 : index
    %49 = vector.load %arg4[%c0_25, %c0_26] : memref<16x64xf32, #tpu.memory_space<vmem>>, vector<16x64xf32>
    %50 = vector.shape_cast %49 : vector<16x64xf32> to vector<1x16x64xf32>
    %c0_27 = arith.constant 0 : index
    %c0_28 = arith.constant 0 : index
    %51 = vector.load %arg5[%c0_27, %c0_28] : memref<16x64xf32, #tpu.memory_space<vmem>>, vector<16x64xf32>
    %52 = vector.shape_cast %51 : vector<16x64xf32> to vector<1x16x64xf32>
    %53 = vector.shape_cast %40 : vector<32x64xf32> to vector<2x16x64xf32>
    %54 = vector.broadcast %50 : vector<1x16x64xf32> to vector<2x16x64xf32>
    %55 = arith.mulf %53, %54 : vector<2x16x64xf32>
    %56 = vector.shape_cast %45 : vector<32x64xf32> to vector<2x16x64xf32>
    %57 = vector.broadcast %52 : vector<1x16x64xf32> to vector<2x16x64xf32>
    %58 = arith.mulf %56, %57 : vector<2x16x64xf32>
    %59 = arith.addf %55, %58 : vector<2x16x64xf32>
    %cst_29 = arith.constant 2.500000e-01 : f32
    %60 = vector.broadcast %cst_29 : f32 to vector<2x16x64xf32>
    %61 = arith.mulf %59, %60 : vector<2x16x64xf32>
    %62 = vector.shape_cast %41 : vector<32x64xf32> to vector<2x16x64xf32>
    %63 = vector.broadcast %50 : vector<1x16x64xf32> to vector<2x16x64xf32>
    %64 = arith.mulf %62, %63 : vector<2x16x64xf32>
    %65 = vector.shape_cast %48 : vector<32x64xf32> to vector<2x16x64xf32>
    %66 = vector.broadcast %52 : vector<1x16x64xf32> to vector<2x16x64xf32>
    %67 = arith.mulf %65, %66 : vector<2x16x64xf32>
    %68 = arith.addf %64, %67 : vector<2x16x64xf32>
    %69 = vector.shape_cast %42 : vector<32x64xf32> to vector<2x16x64xf32>
    %70 = tpu.iota {dimensions = array<i32: 0>} : vector<16x16xi32>
    %71 = tpu.iota {dimensions = array<i32: 1>} : vector<16x16xi32>
    %72 = arith.cmpi sle, %71, %70 : vector<16x16xi32>
    %cst_30 = arith.constant 0.000000e+00 : f32
    %cst_31 = arith.constant -1.000000e+30 : f32
    %73 = vector.broadcast %cst_30 : f32 to vector<16x16xf32>
    %74 = vector.broadcast %cst_31 : f32 to vector<16x16xf32>
    %75 = arith.select %72, %73, %74 : vector<16x16xi1>, vector<16x16xf32>
    %76 = vector.shape_cast %75 : vector<16x16xf32> to vector<1x16x16xf32>
    %c0_32 = arith.constant 0 : index
    %c0_33 = arith.constant 0 : index
    %c0_34 = arith.constant 0 : index
    %77 = vector.load %arg3[%c0_32, %c0_33, %c0_34] : memref<2x1x16xf32, #tpu.memory_space<vmem>>, vector<2x1x16xf32>
    %78 = vector.broadcast %76 : vector<1x16x16xf32> to vector<2x16x16xf32>
    %79 = vector.broadcast %77 : vector<2x1x16xf32> to vector<2x16x16xf32>
    %80 = arith.addf %78, %79 : vector<2x16x16xf32>
    %81 = vector.extract_strided_slice %61 {offsets = [0, 0, 0], sizes = [2, 16, 16], strides = [1, 1, 1]} : vector<2x16x64xf32> to vector<2x16x16xf32>
    %82 = arith.truncf %81 : vector<2x16x16xf32> to vector<2x16x16xbf16>
    %83 = vector.extract_strided_slice %68 {offsets = [0, 0, 0], sizes = [2, 16, 16], strides = [1, 1, 1]} : vector<2x16x64xf32> to vector<2x16x16xf32>
    %84 = arith.truncf %83 : vector<2x16x16xf32> to vector<2x16x16xbf16>
    %85 = vector.extract_strided_slice %69 {offsets = [0, 0, 0], sizes = [2, 16, 16], strides = [1, 1, 1]} : vector<2x16x64xf32> to vector<2x16x16xf32>
    %86 = arith.truncf %85 : vector<2x16x16xf32> to vector<2x16x16xbf16>
    "tpu.trace_start"() <{level = 10 : i32, message = "btd,bsd->bts"}> : () -> ()
    %cst_35 = arith.constant dense<0.000000e+00> : vector<2x16x16xf32>
    %87 = tpu.matmul %82, %84, %cst_35 {dimension_numbers = #tpu.dot_dimension_numbers<[2], [2], [1], [1], [0, 0, 0, 1, 1, 1], [0], [0]>} : vector<2x16x16xbf16>, vector<2x16x16xbf16>, vector<2x16x16xf32> -> vector<2x16x16xf32>
    "tpu.trace_stop"() : () -> ()
    %88 = arith.addf %87, %80 : vector<2x16x16xf32>
    %cst_36 = arith.constant dense<0xFF800000> : vector<2x16xf32>
    %89 = vector.multi_reduction <maximumf>, %88, %cst_36 [2] : vector<2x16x16xf32> to vector<2x16xf32>
    %90 = vector.shape_cast %89 : vector<2x16xf32> to vector<2x16x1xf32>
    %91 = vector.broadcast %90 : vector<2x16x1xf32> to vector<2x16x16xf32>
    %92 = arith.subf %88, %91 : vector<2x16x16xf32>
    %93 = math.exp %92 : vector<2x16x16xf32>
    %cst_37 = arith.constant dense<0.000000e+00> : vector<2x16xf32>
    %94 = vector.multi_reduction <add>, %93, %cst_37 [2] : vector<2x16x16xf32> to vector<2x16xf32>
    %95 = vector.shape_cast %94 : vector<2x16xf32> to vector<2x16x1xf32>
    %96 = tpu.reciprocal %95 {approx = true} : vector<2x16x1xf32> -> vector<2x16x1xf32>
    %97 = vector.broadcast %96 : vector<2x16x1xf32> to vector<2x16x16xf32>
    %98 = arith.mulf %93, %97 : vector<2x16x16xf32>
    %99 = arith.truncf %98 : vector<2x16x16xf32> to vector<2x16x16xbf16>
    "tpu.trace_start"() <{level = 10 : i32, message = "bts,bsd->btd"}> : () -> ()
    %cst_38 = arith.constant dense<0.000000e+00> : vector<2x16x16xf32>
    %100 = tpu.matmul %99, %86, %cst_38 {dimension_numbers = #tpu.dot_dimension_numbers<[2], [1], [1], [2], [0, 0, 0, 1, 1, 2], [0], [0]>} : vector<2x16x16xbf16>, vector<2x16x16xbf16>, vector<2x16x16xf32> -> vector<2x16x16xf32>
    "tpu.trace_stop"() : () -> ()
    %101 = vector.extract_strided_slice %61 {offsets = [0, 0, 16], sizes = [2, 16, 16], strides = [1, 1, 1]} : vector<2x16x64xf32> to vector<2x16x16xf32>
    %102 = arith.truncf %101 : vector<2x16x16xf32> to vector<2x16x16xbf16>
    %103 = vector.extract_strided_slice %68 {offsets = [0, 0, 16], sizes = [2, 16, 16], strides = [1, 1, 1]} : vector<2x16x64xf32> to vector<2x16x16xf32>
    %104 = arith.truncf %103 : vector<2x16x16xf32> to vector<2x16x16xbf16>
    %105 = vector.extract_strided_slice %69 {offsets = [0, 0, 16], sizes = [2, 16, 16], strides = [1, 1, 1]} : vector<2x16x64xf32> to vector<2x16x16xf32>
    %106 = arith.truncf %105 : vector<2x16x16xf32> to vector<2x16x16xbf16>
    "tpu.trace_start"() <{level = 10 : i32, message = "btd,bsd->bts"}> : () -> ()
    %cst_39 = arith.constant dense<0.000000e+00> : vector<2x16x16xf32>
    %107 = tpu.matmul %102, %104, %cst_39 {dimension_numbers = #tpu.dot_dimension_numbers<[2], [2], [1], [1], [0, 0, 0, 1, 1, 1], [0], [0]>} : vector<2x16x16xbf16>, vector<2x16x16xbf16>, vector<2x16x16xf32> -> vector<2x16x16xf32>
    "tpu.trace_stop"() : () -> ()
    %108 = arith.addf %107, %80 : vector<2x16x16xf32>
    %cst_40 = arith.constant dense<0xFF800000> : vector<2x16xf32>
    %109 = vector.multi_reduction <maximumf>, %108, %cst_40 [2] : vector<2x16x16xf32> to vector<2x16xf32>
    %110 = vector.shape_cast %109 : vector<2x16xf32> to vector<2x16x1xf32>
    %111 = vector.broadcast %110 : vector<2x16x1xf32> to vector<2x16x16xf32>
    %112 = arith.subf %108, %111 : vector<2x16x16xf32>
    %113 = math.exp %112 : vector<2x16x16xf32>
    %cst_41 = arith.constant dense<0.000000e+00> : vector<2x16xf32>
    %114 = vector.multi_reduction <add>, %113, %cst_41 [2] : vector<2x16x16xf32> to vector<2x16xf32>
    %115 = vector.shape_cast %114 : vector<2x16xf32> to vector<2x16x1xf32>
    %116 = tpu.reciprocal %115 {approx = true} : vector<2x16x1xf32> -> vector<2x16x1xf32>
    %117 = vector.broadcast %116 : vector<2x16x1xf32> to vector<2x16x16xf32>
    %118 = arith.mulf %113, %117 : vector<2x16x16xf32>
    %119 = arith.truncf %118 : vector<2x16x16xf32> to vector<2x16x16xbf16>
    "tpu.trace_start"() <{level = 10 : i32, message = "bts,bsd->btd"}> : () -> ()
    %cst_42 = arith.constant dense<0.000000e+00> : vector<2x16x16xf32>
    %120 = tpu.matmul %119, %106, %cst_42 {dimension_numbers = #tpu.dot_dimension_numbers<[2], [1], [1], [2], [0, 0, 0, 1, 1, 2], [0], [0]>} : vector<2x16x16xbf16>, vector<2x16x16xbf16>, vector<2x16x16xf32> -> vector<2x16x16xf32>
    "tpu.trace_stop"() : () -> ()
    %121 = vector.extract_strided_slice %61 {offsets = [0, 0, 32], sizes = [2, 16, 16], strides = [1, 1, 1]} : vector<2x16x64xf32> to vector<2x16x16xf32>
    %122 = arith.truncf %121 : vector<2x16x16xf32> to vector<2x16x16xbf16>
    %123 = vector.extract_strided_slice %68 {offsets = [0, 0, 32], sizes = [2, 16, 16], strides = [1, 1, 1]} : vector<2x16x64xf32> to vector<2x16x16xf32>
    %124 = arith.truncf %123 : vector<2x16x16xf32> to vector<2x16x16xbf16>
    %125 = vector.extract_strided_slice %69 {offsets = [0, 0, 32], sizes = [2, 16, 16], strides = [1, 1, 1]} : vector<2x16x64xf32> to vector<2x16x16xf32>
    %126 = arith.truncf %125 : vector<2x16x16xf32> to vector<2x16x16xbf16>
    "tpu.trace_start"() <{level = 10 : i32, message = "btd,bsd->bts"}> : () -> ()
    %cst_43 = arith.constant dense<0.000000e+00> : vector<2x16x16xf32>
    %127 = tpu.matmul %122, %124, %cst_43 {dimension_numbers = #tpu.dot_dimension_numbers<[2], [2], [1], [1], [0, 0, 0, 1, 1, 1], [0], [0]>} : vector<2x16x16xbf16>, vector<2x16x16xbf16>, vector<2x16x16xf32> -> vector<2x16x16xf32>
    "tpu.trace_stop"() : () -> ()
    %128 = arith.addf %127, %80 : vector<2x16x16xf32>
    %cst_44 = arith.constant dense<0xFF800000> : vector<2x16xf32>
    %129 = vector.multi_reduction <maximumf>, %128, %cst_44 [2] : vector<2x16x16xf32> to vector<2x16xf32>
    %130 = vector.shape_cast %129 : vector<2x16xf32> to vector<2x16x1xf32>
    %131 = vector.broadcast %130 : vector<2x16x1xf32> to vector<2x16x16xf32>
    %132 = arith.subf %128, %131 : vector<2x16x16xf32>
    %133 = math.exp %132 : vector<2x16x16xf32>
    %cst_45 = arith.constant dense<0.000000e+00> : vector<2x16xf32>
    %134 = vector.multi_reduction <add>, %133, %cst_45 [2] : vector<2x16x16xf32> to vector<2x16xf32>
    %135 = vector.shape_cast %134 : vector<2x16xf32> to vector<2x16x1xf32>
    %136 = tpu.reciprocal %135 {approx = true} : vector<2x16x1xf32> -> vector<2x16x1xf32>
    %137 = vector.broadcast %136 : vector<2x16x1xf32> to vector<2x16x16xf32>
    %138 = arith.mulf %133, %137 : vector<2x16x16xf32>
    %139 = arith.truncf %138 : vector<2x16x16xf32> to vector<2x16x16xbf16>
    "tpu.trace_start"() <{level = 10 : i32, message = "bts,bsd->btd"}> : () -> ()
    %cst_46 = arith.constant dense<0.000000e+00> : vector<2x16x16xf32>
    %140 = tpu.matmul %139, %126, %cst_46 {dimension_numbers = #tpu.dot_dimension_numbers<[2], [1], [1], [2], [0, 0, 0, 1, 1, 2], [0], [0]>} : vector<2x16x16xbf16>, vector<2x16x16xbf16>, vector<2x16x16xf32> -> vector<2x16x16xf32>
    "tpu.trace_stop"() : () -> ()
    %141 = vector.extract_strided_slice %61 {offsets = [0, 0, 48], sizes = [2, 16, 16], strides = [1, 1, 1]} : vector<2x16x64xf32> to vector<2x16x16xf32>
    %142 = arith.truncf %141 : vector<2x16x16xf32> to vector<2x16x16xbf16>
    %143 = vector.extract_strided_slice %68 {offsets = [0, 0, 48], sizes = [2, 16, 16], strides = [1, 1, 1]} : vector<2x16x64xf32> to vector<2x16x16xf32>
    %144 = arith.truncf %143 : vector<2x16x16xf32> to vector<2x16x16xbf16>
    %145 = vector.extract_strided_slice %69 {offsets = [0, 0, 48], sizes = [2, 16, 16], strides = [1, 1, 1]} : vector<2x16x64xf32> to vector<2x16x16xf32>
    %146 = arith.truncf %145 : vector<2x16x16xf32> to vector<2x16x16xbf16>
    "tpu.trace_start"() <{level = 10 : i32, message = "btd,bsd->bts"}> : () -> ()
    %cst_47 = arith.constant dense<0.000000e+00> : vector<2x16x16xf32>
    %147 = tpu.matmul %142, %144, %cst_47 {dimension_numbers = #tpu.dot_dimension_numbers<[2], [2], [1], [1], [0, 0, 0, 1, 1, 1], [0], [0]>} : vector<2x16x16xbf16>, vector<2x16x16xbf16>, vector<2x16x16xf32> -> vector<2x16x16xf32>
    "tpu.trace_stop"() : () -> ()
    %148 = arith.addf %147, %80 : vector<2x16x16xf32>
    %cst_48 = arith.constant dense<0xFF800000> : vector<2x16xf32>
    %149 = vector.multi_reduction <maximumf>, %148, %cst_48 [2] : vector<2x16x16xf32> to vector<2x16xf32>
    %150 = vector.shape_cast %149 : vector<2x16xf32> to vector<2x16x1xf32>
    %151 = vector.broadcast %150 : vector<2x16x1xf32> to vector<2x16x16xf32>
    %152 = arith.subf %148, %151 : vector<2x16x16xf32>
    %153 = math.exp %152 : vector<2x16x16xf32>
    %cst_49 = arith.constant dense<0.000000e+00> : vector<2x16xf32>
    %154 = vector.multi_reduction <add>, %153, %cst_49 [2] : vector<2x16x16xf32> to vector<2x16xf32>
    %155 = vector.shape_cast %154 : vector<2x16xf32> to vector<2x16x1xf32>
    %156 = tpu.reciprocal %155 {approx = true} : vector<2x16x1xf32> -> vector<2x16x1xf32>
    %157 = vector.broadcast %156 : vector<2x16x1xf32> to vector<2x16x16xf32>
    %158 = arith.mulf %153, %157 : vector<2x16x16xf32>
    %159 = arith.truncf %158 : vector<2x16x16xf32> to vector<2x16x16xbf16>
    "tpu.trace_start"() <{level = 10 : i32, message = "bts,bsd->btd"}> : () -> ()
    %cst_50 = arith.constant dense<0.000000e+00> : vector<2x16x16xf32>
    %160 = tpu.matmul %159, %146, %cst_50 {dimension_numbers = #tpu.dot_dimension_numbers<[2], [1], [1], [2], [0, 0, 0, 1, 1, 2], [0], [0]>} : vector<2x16x16xbf16>, vector<2x16x16xbf16>, vector<2x16x16xf32> -> vector<2x16x16xf32>
    "tpu.trace_stop"() : () -> ()
    %161 = tpu.concatenate %100, %120, %140, %160 in 2 : vector<2x16x16xf32>, vector<2x16x16xf32>, vector<2x16x16xf32>, vector<2x16x16xf32> -> vector<2x16x64xf32>
    %162 = vector.shape_cast %161 : vector<2x16x64xf32> to vector<32x64xf32>
    %163 = arith.truncf %162 : vector<32x64xf32> to vector<32x64xbf16>
    %c0_51 = arith.constant 0 : index
    %c0_52 = arith.constant 0 : index
    %c0_53 = arith.constant 0 : index
    %164 = vector.load %arg11[%c0_51, %c0_52, %c0_53] : memref<1x64x64xbf16, #tpu.memory_space<vmem>>, vector<1x64x64xbf16>
    %165 = vector.shape_cast %164 : vector<1x64x64xbf16> to vector<64x64xbf16>
    %cst_54 = arith.constant dense<0.000000e+00> : vector<32x64xf32>
    %166 = tpu.matmul %163, %165, %cst_54 {dimension_numbers = #tpu.dot_dimension_numbers<[1], [0], [0], [1], [0, 0, 1, 1], [], []>} : vector<32x64xbf16>, vector<64x64xbf16>, vector<32x64xf32> -> vector<32x64xf32>
    %c0_55 = arith.constant 0 : index
    %c0_56 = arith.constant 0 : index
    %c0_57 = arith.constant 0 : index
    %167 = vector.load %arg12[%c0_55, %c0_56, %c0_57] : memref<1x1x64xf32, #tpu.memory_space<vmem>>, vector<1x1x64xf32>
    %168 = vector.shape_cast %167 : vector<1x1x64xf32> to vector<1x64xf32>
    %169 = vector.broadcast %168 : vector<1x64xf32> to vector<32x64xf32>
    %170 = arith.addf %166, %169 : vector<32x64xf32>
    %171 = arith.addf %3, %170 : vector<32x64xf32>
    %c0_58 = arith.constant 0 : index
    %c0_59 = arith.constant 0 : index
    %c0_60 = arith.constant 0 : index
    %172 = vector.load %arg13[%c0_58, %c0_59, %c0_60] : memref<1x1x64xf32, #tpu.memory_space<vmem>>, vector<1x1x64xf32>
    %173 = vector.shape_cast %172 : vector<1x1x64xf32> to vector<1x64xf32>
    %c0_61 = arith.constant 0 : index
    %c0_62 = arith.constant 0 : index
    %c0_63 = arith.constant 0 : index
    %174 = vector.load %arg14[%c0_61, %c0_62, %c0_63] : memref<1x1x64xf32, #tpu.memory_space<vmem>>, vector<1x1x64xf32>
    %175 = vector.shape_cast %174 : vector<1x1x64xf32> to vector<1x64xf32>
    %cst_64 = arith.constant dense<0.000000e+00> : vector<32xf32>
    %176 = vector.multi_reduction <add>, %171, %cst_64 [1] : vector<32x64xf32> to vector<32xf32>
    %177 = vector.shape_cast %176 : vector<32xf32> to vector<32x1xf32>
    %cst_65 = arith.constant 6.400000e+01 : f32
    %178 = vector.broadcast %cst_65 : f32 to vector<32x1xf32>
    %179 = arith.divf %177, %178 : vector<32x1xf32>
    %180 = vector.broadcast %179 : vector<32x1xf32> to vector<32x64xf32>
    %181 = arith.subf %171, %180 : vector<32x64xf32>
    %182 = vector.broadcast %179 : vector<32x1xf32> to vector<32x64xf32>
    %183 = arith.subf %171, %182 : vector<32x64xf32>
    %184 = arith.mulf %181, %183 : vector<32x64xf32>
    %cst_66 = arith.constant dense<0.000000e+00> : vector<32xf32>
    %185 = vector.multi_reduction <add>, %184, %cst_66 [1] : vector<32x64xf32> to vector<32xf32>
    %186 = vector.shape_cast %185 : vector<32xf32> to vector<32x1xf32>
    %cst_67 = arith.constant 6.400000e+01 : f32
    %187 = vector.broadcast %cst_67 : f32 to vector<32x1xf32>
    %188 = arith.divf %186, %187 : vector<32x1xf32>
    %189 = vector.broadcast %179 : vector<32x1xf32> to vector<32x64xf32>
    %190 = arith.subf %171, %189 : vector<32x64xf32>
    %cst_68 = arith.constant 9.99999974E-6 : f32
    %191 = vector.broadcast %cst_68 : f32 to vector<32x1xf32>
    %192 = arith.addf %188, %191 : vector<32x1xf32>
    %193 = math.rsqrt %192 : vector<32x1xf32>
    %194 = vector.broadcast %193 : vector<32x1xf32> to vector<32x64xf32>
    %195 = arith.mulf %190, %194 : vector<32x64xf32>
    %196 = vector.broadcast %173 : vector<1x64xf32> to vector<32x64xf32>
    %197 = arith.mulf %195, %196 : vector<32x64xf32>
    %198 = vector.broadcast %175 : vector<1x64xf32> to vector<32x64xf32>
    %199 = arith.addf %197, %198 : vector<32x64xf32>
    %200 = arith.truncf %199 : vector<32x64xf32> to vector<32x64xbf16>
    %c0_69 = arith.constant 0 : index
    %c0_70 = arith.constant 0 : index
    %c0_71 = arith.constant 0 : index
    %201 = vector.load %arg15[%c0_69, %c0_70, %c0_71] : memref<1x64x256xbf16, #tpu.memory_space<vmem>>, vector<1x64x256xbf16>
    %202 = vector.shape_cast %201 : vector<1x64x256xbf16> to vector<64x256xbf16>
    %cst_72 = arith.constant dense<0.000000e+00> : vector<32x256xf32>
    %203 = tpu.matmul %200, %202, %cst_72 {dimension_numbers = #tpu.dot_dimension_numbers<[1], [0], [0], [1], [0, 0, 1, 1], [], []>} : vector<32x64xbf16>, vector<64x256xbf16>, vector<32x256xf32> -> vector<32x256xf32>
    %c0_73 = arith.constant 0 : index
    %c0_74 = arith.constant 0 : index
    %c0_75 = arith.constant 0 : index
    %204 = vector.load %arg16[%c0_73, %c0_74, %c0_75] : memref<1x1x256xf32, #tpu.memory_space<vmem>>, vector<1x1x256xf32>
    %205 = vector.shape_cast %204 : vector<1x1x256xf32> to vector<1x256xf32>
    %206 = vector.broadcast %205 : vector<1x256xf32> to vector<32x256xf32>
    %207 = arith.addf %203, %206 : vector<32x256xf32>
    %208 = vector.extract_strided_slice %207 {offsets = [0, 0], sizes = [32, 128], strides = [1, 1]} : vector<32x256xf32> to vector<32x128xf32>
    %209 = vector.extract_strided_slice %207 {offsets = [0, 128], sizes = [32, 128], strides = [1, 1]} : vector<32x256xf32> to vector<32x128xf32>
    %cst_76 = arith.constant 5.000000e-01 : f32
    %210 = vector.broadcast %cst_76 : f32 to vector<32x128xf32>
    %211 = arith.mulf %210, %209 : vector<32x128xf32>
    %cst_77 = arith.constant 0.707106769 : f32
    %212 = vector.broadcast %cst_77 : f32 to vector<32x128xf32>
    %213 = arith.mulf %209, %212 : vector<32x128xf32>
    %cst_78 = arith.constant 0.000000e+00 : f32
    %214 = vector.broadcast %cst_78 : f32 to vector<32x128xf32>
    %215 = arith.cmpf oge, %213, %214 : vector<32x128xf32>
    %cst_79 = arith.constant 1.000000e+00 : f32
    %cst_80 = arith.constant -1.000000e+00 : f32
    %216 = vector.broadcast %cst_79 : f32 to vector<32x128xf32>
    %217 = vector.broadcast %cst_80 : f32 to vector<32x128xf32>
    %218 = arith.select %215, %216, %217 : vector<32x128xi1>, vector<32x128xf32>
    %219 = math.absf %213 : vector<32x128xf32>
    %cst_81 = arith.constant 0.327591091 : f32
    %220 = vector.broadcast %cst_81 : f32 to vector<32x128xf32>
    %221 = arith.mulf %220, %219 : vector<32x128xf32>
    %cst_82 = arith.constant 1.000000e+00 : f32
    %222 = vector.broadcast %cst_82 : f32 to vector<32x128xf32>
    %223 = arith.addf %222, %221 : vector<32x128xf32>
    %cst_83 = arith.constant 1.000000e+00 : f32
    %224 = vector.broadcast %cst_83 : f32 to vector<32x128xf32>
    %225 = arith.divf %224, %223 : vector<32x128xf32>
    %cst_84 = arith.constant 1.06140542 : f32
    %226 = vector.broadcast %cst_84 : f32 to vector<32x128xf32>
    %227 = arith.mulf %226, %225 : vector<32x128xf32>
    %cst_85 = arith.constant -1.45315206 : f32
    %228 = vector.broadcast %cst_85 : f32 to vector<32x128xf32>
    %229 = arith.addf %227, %228 : vector<32x128xf32>
    %230 = arith.mulf %229, %225 : vector<32x128xf32>
    %cst_86 = arith.constant 1.42141378 : f32
    %231 = vector.broadcast %cst_86 : f32 to vector<32x128xf32>
    %232 = arith.addf %230, %231 : vector<32x128xf32>
    %233 = arith.mulf %232, %225 : vector<32x128xf32>
    %cst_87 = arith.constant -0.284496725 : f32
    %234 = vector.broadcast %cst_87 : f32 to vector<32x128xf32>
    %235 = arith.addf %233, %234 : vector<32x128xf32>
    %236 = arith.mulf %235, %225 : vector<32x128xf32>
    %cst_88 = arith.constant 0.254829586 : f32
    %237 = vector.broadcast %cst_88 : f32 to vector<32x128xf32>
    %238 = arith.addf %236, %237 : vector<32x128xf32>
    %239 = arith.mulf %238, %225 : vector<32x128xf32>
    %cst_89 = arith.constant 0.000000e+00 : f32
    %240 = vector.broadcast %cst_89 : f32 to vector<32x128xf32>
    %241 = arith.subf %240, %219 : vector<32x128xf32>
    %242 = arith.mulf %241, %219 : vector<32x128xf32>
    %243 = math.exp %242 : vector<32x128xf32>
    %244 = arith.mulf %239, %243 : vector<32x128xf32>
    %cst_90 = arith.constant 1.000000e+00 : f32
    %245 = vector.broadcast %cst_90 : f32 to vector<32x128xf32>
    %246 = arith.subf %245, %244 : vector<32x128xf32>
    %247 = arith.mulf %218, %246 : vector<32x128xf32>
    %cst_91 = arith.constant 1.000000e+00 : f32
    %248 = vector.broadcast %cst_91 : f32 to vector<32x128xf32>
    %249 = arith.addf %248, %247 : vector<32x128xf32>
    %250 = arith.mulf %211, %249 : vector<32x128xf32>
    %251 = arith.mulf %208, %250 : vector<32x128xf32>
    %252 = arith.truncf %251 : vector<32x128xf32> to vector<32x128xbf16>
    %c0_92 = arith.constant 0 : index
    %c0_93 = arith.constant 0 : index
    %c0_94 = arith.constant 0 : index
    %253 = vector.load %arg17[%c0_92, %c0_93, %c0_94] : memref<1x128x64xbf16, #tpu.memory_space<vmem>>, vector<1x128x64xbf16>
    %254 = vector.shape_cast %253 : vector<1x128x64xbf16> to vector<128x64xbf16>
    %cst_95 = arith.constant dense<0.000000e+00> : vector<32x64xf32>
    %255 = tpu.matmul %252, %254, %cst_95 {dimension_numbers = #tpu.dot_dimension_numbers<[1], [0], [0], [1], [0, 0, 1, 1], [], []>} : vector<32x128xbf16>, vector<128x64xbf16>, vector<32x64xf32> -> vector<32x64xf32>
    %c0_96 = arith.constant 0 : index
    %c0_97 = arith.constant 0 : index
    %c0_98 = arith.constant 0 : index
    %256 = vector.load %arg18[%c0_96, %c0_97, %c0_98] : memref<1x1x64xf32, #tpu.memory_space<vmem>>, vector<1x1x64xf32>
    %257 = vector.shape_cast %256 : vector<1x1x64xf32> to vector<1x64xf32>
    %258 = vector.broadcast %257 : vector<1x64xf32> to vector<32x64xf32>
    %259 = arith.addf %255, %258 : vector<32x64xf32>
    %260 = arith.addf %171, %259 : vector<32x64xf32>
    %c0_99 = arith.constant 0 : index
    %c0_100 = arith.constant 0 : index
    %261 = vector.load %arg24[%c0_99, %c0_100] : memref<32x64xf32, #tpu.memory_space<vmem>>, vector<32x64xf32>
    tpu.vector_store %arg24[%c0_99, %c0_100], %260 {strides = array<i32>} : memref<32x64xf32, #tpu.memory_space<vmem>>, vector<32x64xf32>,
    %c1_i32 = arith.constant 1 : i32
    %262 = arith.cmpi eq, %arg1, %c1_i32 : i32
    %263 = arith.extui %262 : i1 to i32
    %c0_i32_101 = arith.constant 0 : i32
    %264 = arith.cmpi ne, %263, %c0_i32_101 : i32
    scf.if %264 {
      %c0_102 = arith.constant 0 : index
      %c0_103 = arith.constant 0 : index
      %265 = vector.load %arg19[%c0_102, %c0_103] : memref<1x64xf32, #tpu.memory_space<vmem>>, vector<1x64xf32>
      %c0_104 = arith.constant 0 : index
      %c0_105 = arith.constant 0 : index
      %266 = vector.load %arg20[%c0_104, %c0_105] : memref<1x64xf32, #tpu.memory_space<vmem>>, vector<1x64xf32>
      %cst_106 = arith.constant dense<0.000000e+00> : vector<32xf32>
      %267 = vector.multi_reduction <add>, %260, %cst_106 [1] : vector<32x64xf32> to vector<32xf32>
      %268 = vector.shape_cast %267 : vector<32xf32> to vector<32x1xf32>
      %cst_107 = arith.constant 6.400000e+01 : f32
      %269 = vector.broadcast %cst_107 : f32 to vector<32x1xf32>
      %270 = arith.divf %268, %269 : vector<32x1xf32>
      %271 = vector.broadcast %270 : vector<32x1xf32> to vector<32x64xf32>
      %272 = arith.subf %260, %271 : vector<32x64xf32>
      %273 = vector.broadcast %270 : vector<32x1xf32> to vector<32x64xf32>
      %274 = arith.subf %260, %273 : vector<32x64xf32>
      %275 = arith.mulf %272, %274 : vector<32x64xf32>
      %cst_108 = arith.constant dense<0.000000e+00> : vector<32xf32>
      %276 = vector.multi_reduction <add>, %275, %cst_108 [1] : vector<32x64xf32> to vector<32xf32>
      %277 = vector.shape_cast %276 : vector<32xf32> to vector<32x1xf32>
      %cst_109 = arith.constant 6.400000e+01 : f32
      %278 = vector.broadcast %cst_109 : f32 to vector<32x1xf32>
      %279 = arith.divf %277, %278 : vector<32x1xf32>
      %280 = vector.broadcast %270 : vector<32x1xf32> to vector<32x64xf32>
      %281 = arith.subf %260, %280 : vector<32x64xf32>
      %cst_110 = arith.constant 9.99999974E-6 : f32
      %282 = vector.broadcast %cst_110 : f32 to vector<32x1xf32>
      %283 = arith.addf %279, %282 : vector<32x1xf32>
      %284 = math.rsqrt %283 : vector<32x1xf32>
      %285 = vector.broadcast %284 : vector<32x1xf32> to vector<32x64xf32>
      %286 = arith.mulf %281, %285 : vector<32x64xf32>
      %287 = vector.broadcast %265 : vector<1x64xf32> to vector<32x64xf32>
      %288 = arith.mulf %286, %287 : vector<32x64xf32>
      %289 = vector.broadcast %266 : vector<1x64xf32> to vector<32x64xf32>
      %290 = arith.addf %288, %289 : vector<32x64xf32>
      %291 = arith.truncf %290 : vector<32x64xf32> to vector<32x64xbf16>
      %c0_111 = arith.constant 0 : index
      %c0_112 = arith.constant 0 : index
      %292 = vector.load %arg21[%c0_111, %c0_112] : memref<64x256xbf16, #tpu.memory_space<vmem>>, vector<64x256xbf16>
      %cst_113 = arith.constant dense<0.000000e+00> : vector<32x256xf32>
      %293 = tpu.matmul %291, %292, %cst_113 {dimension_numbers = #tpu.dot_dimension_numbers<[1], [0], [0], [1], [0, 0, 1, 1], [], []>} : vector<32x64xbf16>, vector<64x256xbf16>, vector<32x256xf32> -> vector<32x256xf32>
      %c0_114 = arith.constant 0 : index
      %c0_115 = arith.constant 0 : index
      %294 = vector.load %arg22[%c0_114, %c0_115] : memref<1x256xf32, #tpu.memory_space<vmem>>, vector<1x256xf32>
      %295 = vector.broadcast %294 : vector<1x256xf32> to vector<32x256xf32>
      %296 = arith.addf %293, %295 : vector<32x256xf32>
      %c0_116 = arith.constant 0 : index
      %c0_117 = arith.constant 0 : index
      %297 = vector.load %arg23[%c0_116, %c0_117] : memref<32x256xf32, #tpu.memory_space<vmem>>, vector<32x256xf32>
      tpu.vector_store %arg23[%c0_116, %c0_117], %296 {strides = array<i32>} : memref<32x256xf32, #tpu.memory_space<vmem>>, vector<32x256xf32>,
    } else {
    }
    return
  }
  func.func @transform_0(%arg0: i32, %arg1: i32) -> (i32, i32) {
    %c0_i32 = arith.constant 0 : i32
    %c0_i32_0 = arith.constant 0 : i32
    return %arg0, %c0_i32 : i32, i32
  }
  func.func @transform_1(%arg0: i32, %arg1: i32) -> (i32, i32, i32) {
    %c0_i32 = arith.constant 0 : i32
    %c0_i32_0 = arith.constant 0 : i32
    %c0_i32_1 = arith.constant 0 : i32
    return %arg0, %c0_i32, %c0_i32_0 : i32, i32, i32
  }
  func.func @transform_2(%arg0: i32, %arg1: i32) -> (i32, i32) {
    %c0_i32 = arith.constant 0 : i32
    %c0_i32_0 = arith.constant 0 : i32
    %c0_i32_1 = arith.constant 0 : i32
    return %c0_i32, %c0_i32_0 : i32, i32
  }
  func.func @transform_3(%arg0: i32, %arg1: i32) -> (i32, i32) {
    %c0_i32 = arith.constant 0 : i32
    %c0_i32_0 = arith.constant 0 : i32
    %c0_i32_1 = arith.constant 0 : i32
    return %c0_i32, %c0_i32_0 : i32, i32
  }
  func.func @transform_4(%arg0: i32, %arg1: i32) -> (i32, i32) {
    %c0_i32 = arith.constant 0 : i32
    %c0_i32_0 = arith.constant 0 : i32
    %c0_i32_1 = arith.constant 0 : i32
    return %c0_i32, %c0_i32_0 : i32, i32
  }
  func.func @transform_5(%arg0: i32, %arg1: i32) -> (i32, i32, i32) {
    %c0_i32 = arith.constant 0 : i32
    %c0_i32_0 = arith.constant 0 : i32
    %c0_i32_1 = arith.constant 0 : i32
    return %arg1, %c0_i32, %c0_i32_0 : i32, i32, i32
  }
  func.func @transform_6(%arg0: i32, %arg1: i32) -> (i32, i32, i32) {
    %c0_i32 = arith.constant 0 : i32
    %c0_i32_0 = arith.constant 0 : i32
    %c0_i32_1 = arith.constant 0 : i32
    return %arg1, %c0_i32, %c0_i32_0 : i32, i32, i32
  }
  func.func @transform_7(%arg0: i32, %arg1: i32) -> (i32, i32, i32) {
    %c0_i32 = arith.constant 0 : i32
    %c0_i32_0 = arith.constant 0 : i32
    %c0_i32_1 = arith.constant 0 : i32
    return %arg1, %c0_i32, %c0_i32_0 : i32, i32, i32
  }
  func.func @transform_8(%arg0: i32, %arg1: i32) -> (i32, i32, i32) {
    %c0_i32 = arith.constant 0 : i32
    %c0_i32_0 = arith.constant 0 : i32
    %c0_i32_1 = arith.constant 0 : i32
    return %arg1, %c0_i32, %c0_i32_0 : i32, i32, i32
  }
  func.func @transform_9(%arg0: i32, %arg1: i32) -> (i32, i32, i32) {
    %c0_i32 = arith.constant 0 : i32
    %c0_i32_0 = arith.constant 0 : i32
    %c0_i32_1 = arith.constant 0 : i32
    return %arg1, %c0_i32, %c0_i32_0 : i32, i32, i32
  }
  func.func @transform_10(%arg0: i32, %arg1: i32) -> (i32, i32, i32) {
    %c0_i32 = arith.constant 0 : i32
    %c0_i32_0 = arith.constant 0 : i32
    %c0_i32_1 = arith.constant 0 : i32
    return %arg1, %c0_i32, %c0_i32_0 : i32, i32, i32
  }
  func.func @transform_11(%arg0: i32, %arg1: i32) -> (i32, i32, i32) {
    %c0_i32 = arith.constant 0 : i32
    %c0_i32_0 = arith.constant 0 : i32
    %c0_i32_1 = arith.constant 0 : i32
    return %arg1, %c0_i32, %c0_i32_0 : i32, i32, i32
  }
  func.func @transform_12(%arg0: i32, %arg1: i32) -> (i32, i32, i32) {
    %c0_i32 = arith.constant 0 : i32
    %c0_i32_0 = arith.constant 0 : i32
    %c0_i32_1 = arith.constant 0 : i32
    return %arg1, %c0_i32, %c0_i32_0 : i32, i32, i32
  }
  func.func @transform_13(%arg0: i32, %arg1: i32) -> (i32, i32, i32) {
    %c0_i32 = arith.constant 0 : i32
    %c0_i32_0 = arith.constant 0 : i32
    %c0_i32_1 = arith.constant 0 : i32
    return %arg1, %c0_i32, %c0_i32_0 : i32, i32, i32
  }
  func.func @transform_14(%arg0: i32, %arg1: i32) -> (i32, i32, i32) {
    %c0_i32 = arith.constant 0 : i32
    %c0_i32_0 = arith.constant 0 : i32
    %c0_i32_1 = arith.constant 0 : i32
    return %arg1, %c0_i32, %c0_i32_0 : i32, i32, i32
  }
  func.func @transform_15(%arg0: i32, %arg1: i32) -> (i32, i32, i32) {
    %c0_i32 = arith.constant 0 : i32
    %c0_i32_0 = arith.constant 0 : i32
    %c0_i32_1 = arith.constant 0 : i32
    return %arg1, %c0_i32, %c0_i32_0 : i32, i32, i32
  }
  func.func @transform_16(%arg0: i32, %arg1: i32) -> (i32, i32, i32) {
    %c0_i32 = arith.constant 0 : i32
    %c0_i32_0 = arith.constant 0 : i32
    %c0_i32_1 = arith.constant 0 : i32
    return %arg1, %c0_i32, %c0_i32_0 : i32, i32, i32
  }
  func.func @transform_17(%arg0: i32, %arg1: i32) -> (i32, i32) {
    %c0_i32 = arith.constant 0 : i32
    %c0_i32_0 = arith.constant 0 : i32
    %c0_i32_1 = arith.constant 0 : i32
    return %c0_i32, %c0_i32_0 : i32, i32
  }
  func.func @transform_18(%arg0: i32, %arg1: i32) -> (i32, i32) {
    %c0_i32 = arith.constant 0 : i32
    %c0_i32_0 = arith.constant 0 : i32
    %c0_i32_1 = arith.constant 0 : i32
    return %c0_i32, %c0_i32_0 : i32, i32
  }
  func.func @transform_19(%arg0: i32, %arg1: i32) -> (i32, i32) {
    %c0_i32 = arith.constant 0 : i32
    %c0_i32_0 = arith.constant 0 : i32
    %c0_i32_1 = arith.constant 0 : i32
    return %c0_i32, %c0_i32_0 : i32, i32
  }
  func.func @transform_20(%arg0: i32, %arg1: i32) -> (i32, i32) {
    %c0_i32 = arith.constant 0 : i32
    %c0_i32_0 = arith.constant 0 : i32
    %c0_i32_1 = arith.constant 0 : i32
    return %c0_i32, %c0_i32_0 : i32, i32
  }
  func.func @transform_21(%arg0: i32, %arg1: i32) -> (i32, i32) {
    %c0_i32 = arith.constant 0 : i32
    %c0_i32_0 = arith.constant 0 : i32
    return %arg0, %c0_i32 : i32, i32
  }
}

</mosaic_0001>

<bundles_post_ra>
// kernel: tpu_custom_call.1
= control target key start
LH: loop header
LB: loop body
LE: loop exit
PB: predicated region body
PF: predicated region fallthrough
CT: control target
= control target key end

     0   :  { %s5638_s0 = inlined_call_operand.vmem [shape: f32[64,64], index: 0, kind: input, shape index: {}]   ;;  %s5639_s1 = inlined_call_operand.vmem [shape: f32[4,1,16], index: 1, kind: input, shape index: {}]   ;;  %s5640_s2 = inlined_call_operand.hbm [shape: f32[16,64], index: 2, kind: input, shape index: {}]   ;;  %s5641_s3 = inlined_call_operand.hbm [shape: f32[16,64], index: 3, kind: input, shape index: {}]   ;;  %s5642_s4 = inlined_call_operand.hbm [shape: bf16[64,64], index: 4, kind: input, shape index: {}]   ;;  %s5643_s5 = inlined_call_operand.hbm [shape: f32[2,1,64], index: 5, kind: input, shape index: {}]   ;;  %s5644_s6 = inlined_call_operand.hbm [shape: f32[2,1,64], index: 6, kind: input, shape index: {}]   ;;  %s5645_s7 = inlined_call_operand.vmem [shape: bf16[2,64,192], index: 7, kind: input, shape index: {}]   ;;  %s5646_s8 = inlined_call_operand.vmem [shape: f32[2,1,192], index: 8, kind: input, shape index: {}]   ;;  %s5647_s9 = inlined_call_operand.hbm [shape: bf16[2,64,64], index: 9, kind: input, shape index: {}]   ;;  %s5648_s10 = inlined_call_operand.vmem [shape: f32[2,1,64], index: 10, kind: input, shape index: {}]   ;;  %s5649_s11 = inlined_call_operand.vmem [shape: f32[2,1,64], index: 11, kind: input, shape index: {}]   ;;  %s5650_s12 = inlined_call_operand.vmem [shape: f32[2,1,64], index: 12, kind: input, shape index: {}]   ;;  %s5651_s13 = inlined_call_operand.hbm [shape: bf16[2,64,256], index: 13, kind: input, shape index: {}]   ;;  %s5652_s14 = inlined_call_operand.vmem [shape: f32[2,1,256], index: 14, kind: input, shape index: {}]   ;;  %s5653_s15 = inlined_call_operand.vmem [shape: bf16[2,128,64], index: 15, kind: input, shape index: {}]   ;;  %s5654_s16 = inlined_call_operand.vmem [shape: f32[2,1,64], index: 16, kind: input, shape index: {}]   ;;  %s5655_s17 = inlined_call_operand.vmem [shape: f32[1,64], index: 17, kind: input, shape index: {}]   ;;  %s5656_s18 = inlined_call_operand.vmem [shape: f32[1,64], index: 18, kind: input, shape index: {}]   ;;  %s5657_s19 = inlined_call_operand.hbm [shape: bf16[64,256], index: 19, kind: input, shape index: {}]   ;;  %s5658_s20 = inlined_call_operand.vmem [shape: f32[1,256], index: 20, kind: input, shape index: {}]   ;;  %s5659_s21 = inlined_call_operand.hbm [shape: f32[64,256], index: 21, kind: output, shape index: {}]  }
   0x1   :  { %5685 = sst [smem:[#allocation41_spill]] %s5638_s0 }
   0x2   :  { %5686 = sst [smem:[#allocation42_spill]] %s5639_s1 }
   0x3   :  { %5687 = sst [smem:[#allocation43_spill]] %s5640_s2 }
   0x4   :  { %5688 = sst [smem:[#allocation44_spill]] %s5641_s3 }
   0x5   :  { %5689 = sst [smem:[#allocation45_spill]] %s5642_s4 }
   0x6   :  { %5690 = sst [smem:[#allocation46_spill]] %s5643_s5 }
   0x7   :  { %5691 = sst [smem:[#allocation47_spill]] %s5644_s6 }
   0x8   :  { %5692 = sst [smem:[#allocation48_spill]] %s5645_s7 }
   0x9   :  { %5693 = sst [smem:[#allocation49_spill]] %s5646_s8 }
   0xa   :  { %5694 = sst [smem:[#allocation50_spill]] %s5647_s9 }
   0xb   :  { %5695 = sst [smem:[#allocation51_spill]] %s5648_s10 }
   0xc   :  { %5696 = sst [smem:[#allocation52_spill]] %s5649_s11 }
   0xd   :  { %5697 = sst [smem:[#allocation53_spill]] %s5650_s12 }
   0xe   :  { %5698 = sst [smem:[#allocation54_spill]] %s5651_s13 }
   0xf   :  { %5699 = sst [smem:[#allocation55_spill]] %s5652_s14 }
  0x10   :  { %5700 = sst [smem:[#allocation56_spill]] %s5653_s15 }
  0x11   :  { %5701 = sst [smem:[#allocation57_spill]] %s5654_s16 }
  0x12   :  { %5702 = sst [smem:[#allocation58_spill]] %s5655_s17 }
  0x13   :  { %5703 = sst [smem:[#allocation59_spill]] %s5656_s18 }
  0x14   :  { %5704 = sst [smem:[#allocation60_spill]] %s5657_s19 }
  0x15   :  { %5705 = sst [smem:[#allocation61_spill]] %s5658_s20 }
  0x16   :  { %5706 = sst [smem:[#allocation62_spill]] %s5659_s21 }
  0x17   :  { %26 = vsyncpa [#allocation4], 0 }
  0x18   :  { %27 = vsyncpa [#allocation7], 0 }
  0x19   :  { %28 = vsyncpa [#allocation10], 0 }
  0x1a   :  { %30 = vsyncpa [#allocation10 + $0x1], 0 }
  0x1b   :  { %31 = vsyncpa [#allocation13], 0 }
  0x1c   :  { %33 = vsyncpa [#allocation13 + $0x1], 0 }
  0x1d   :  { %34 = vsyncpa [#allocation16], 0 }
  0x1e   :  { %35 = vsyncpa [#allocation5], 0 }
  0x1f   :  { %37 = vsyncpa [#allocation5 + $0x1], 0  ;;  %s4749_s2 = smov 0   ;;  %s4751_s25 = smov 0  }
  0x20   :  { %s4753_s26 = smov 0   ;;  %s4755_s27 = smov 0  }
  0x21   :  { %s4757_s3 = smov 0   ;;  %s4759_s28 = smov 0  }
  0x22   :  { %s4761_s29 = smov 0   ;;  %s4763_s0 = smov 0  }
  0x23   :  { %s4765_s4 = smov 0   ;;  %s4767_s30 = smov 0  }
  0x24   :  { %s4769_s5 = smov 0  }
  0x25 LB: > { %5707 = sst [smem:[#allocation24_spill]] %s4570_s2  ;;  %s4803_s22 = sadd.s32 4294967295, %s4610_s5   ;;  %s4610_s5 = sphi %s4769_s5, %s43_s5   ;;  %s4606_s30 = sphi %s4767_s30, %s5795_s30   ;;  %s4602_s4 = sphi %s4765_s4, %s5794_s4   ;;  %s4598_s0 = sphi %s4763_s0, %s5793_s0   ;;  %s4594_s29 = sphi %s4761_s29, %s5792_s29   ;;  %s4590_s28 = sphi %s4759_s28, %s5791_s28   ;;  %s4586_s3 = sphi %s4757_s3, %s5790_s3   ;;  %s4582_s27 = sphi %s4755_s27, %s5789_s27   ;;  %s4578_s26 = sphi %s4753_s26, %s5788_s26   ;;  %s4574_s25 = sphi %s4751_s25, %s5787_s25   ;;  %s4570_s2 = sphi %s4749_s2, %s5786_s2  }
  0x26   : > { %5708 = sst [smem:[#allocation25_spill]] %s4574_s25  ;;  %s3548_s23 = sadd.s32 4294967294, %s4610_s5  }
  0x27   : > { %5709 = sst [smem:[#allocation26_spill]] %s4578_s26  ;;  %p190_p0 = scmp.ne.s32.totalorder %s4586_s3, %s4582_s27 }
  0x28   : > { %5710 = sst [smem:[#allocation27_spill]] %s4586_s3  ;;  %p5674_p1 = scmp.eq.s32.totalorder %s4803_s22, 0 }
  0x29   : > { %5711 = sst [smem:[#allocation28_spill]] %s4590_s28  ;;  %p583_p2 = scmp.ne.s32.totalorder %s4578_s26, %s4574_s25 }
  0x2a   : > { %5712 = sst [smem:[#allocation29_spill]] %s4594_s29  ;;  %p4813_p3 = por %p5674_p1, %p190_p0 }
  0x2b   : > { %5713 = sst [smem:[#allocation30_spill]] %s4598_s0  ;;  %p584_p4 = scmp.eq.s32.totalorder %s4803_s22, 3 }
  0x2c   : > { %5714 = sst [smem:[#allocation31_spill]] %s4602_s4  ;;  %p589_p5 = scmp.ne.s32.totalorder %s4574_s25, %s4570_s2 }
  0x2d   : > { %5715 = sst [smem:[#allocation32_spill]] %s4606_s30  ;;  %p590_p6 = scmp.eq.s32.totalorder %s3548_s23, 3 }
  0x2e   : > { %5716 = sst [smem:[#allocation33_spill]] %s4610_s5  ;;  %p4820_p7 = por %p584_p4, %p583_p2 }
  0x2f   : > { %p3549_p8 = scmp.ge.s32.totalorder %s4610_s5, 1  ;;  %p4825_p9 = por %p590_p6, %p589_p5 }
  0x30   : > { %s5718_s21 = scalar_select %p4820_p7, 1, 0 }
  0x31   : > { %s5720_s20 = scalar_select %p4825_p9, 1, 0 }
  0x32   : > { %5719 = sst [smem:[#allocation34_spill]] %s5718_s21  ;;  %p597_p10 = scmp.lt.s32.totalorder %s4610_s5, 5 }
  0x33   : > { %5721 = sst [smem:[#allocation35_spill]] %s5720_s20  ;;  %s4612_s1 = smov [#allocation6]  }
  0x34   : > { %p4830_p11 = pnand %p3549_p8, %p597_p10  ;;  %s622_s2 = sshll.u32 %s4612_s1, 4  ;;  %s623_s2 = int_to_ptr.vmem [resolvable:$true] %s622_s2 }
  0x35   : > { %s4269_s20 = scalar_lea.vmem %s623_s2, 256  ;;  %p4277_p6 = scmp.lt.s32.totalorder %s623_s2, %s623_s2 }
  0x36   : > { %p3918_p12 = pneg %p4830_p11  ;;  %p4270_p2 = scmp.ne.s32.totalorder %s623_s2, %s4269_s20 }
  0x37   : > { %p4278_p8 = scmp.lt.s32.totalorder %s4269_s20, %s4269_s20 }
  0x38   : > { %p4838_p13 = pnand %p3918_p12, %p5674_p1 }
  0x39   : > { %p4279_p10 = por %p4278_p8, %p4277_p6 }
  0x3a   : > { %p4260_p0 = pneg %p4838_p13 }
  0x3c   : > { %p4272_p4 = pnand %p4270_p2, %p4260_p0 }
  0x3e   : > { %p4273_p5 = pneg %p4272_p4 }
  0x40   : > { %p4280_p9 = pnand %p4279_p10, %p4273_p5 }
  0x42   : > { %4283 = shalt.err (!%p4280_p9)
}
  0x43   : > { %s5665_s1 = smov 128   ;;  %s5667_s21 = smov 8  }
  0x44   : > { %s5724_s17 = sld [smem:[#allocation44_spill]]  ;;  %s52_s16 = sadd.s32 1, %s4602_s4 }
  0x45   : > { %p53_p9 = scmp.ge.s32.totalorder %s52_s16, 2  ;;  %s55_s15 = sadd.s32 1, %s4606_s30 }
  0x46   : > { %s177_s14 = sadd.s32 1, %s4590_s28  ;;  %p184_p12 = scmp.ne.s32.totalorder %s4590_s28, %s4586_s3 }
  0x47   : > { %s5797_s16 = smov (%p53_p9, %s52_s16), 0  ;;  %s5799_s15 = smov (!%p53_p9, %s55_s15), %s4606_s30 }
  0x48   : > { %5725 = sst [smem:[#allocation36_spill]] %s5797_s16  ;;  %s174_s12 = ssub.s32 %s4602_s4, %s5797_s16 }
  0x49   : > { %p185_p2 = scmp.eq.s32.totalorder %s4610_s5, 0  ;;  %p57_p4 = scmp.ge.s32.totalorder %s5799_s15, 2 }
  0x4a   : > { %3924 = dma.hbm_to_vmem [thread:$0]  (!%p4838_p13), %s5724_s17, 256, %s623_s2, [#allocation7], %s5665_s1, %s5665_s1, %s5667_s21  }
  0x4b   : > { %p175_p5 = scmp.eq.s32.totalorder %s174_s12, 0  ;;  %p4866_p6 = por %p185_p2, %p184_p12 }
  0x4c   : > { %p3952_p8 = scmp.lt.s32.totalorder %s4610_s5, 4  ;;  %s5801_s15 = smov (%p57_p4, %s5799_s15), 0 }
  0x4d   : > { %5727 = sst [smem:[#allocation37_spill]] %s5801_s15  ;;  %s570_s2 = ssub.s32 %s4606_s30, %s5801_s15 }
  0x4e   : > { %s4874_s18 = scalar_select %p175_p5, %s4590_s28, %s177_s14  }
  0x4f   : > { %p571_p10 = scmp.eq.s32.totalorder %s570_s2, 0  ;;  %s4880_s1 = sand.u32 1, %s4590_s28  }
  0x50   : > { %5728 = sst [smem:[#allocation38_spill]] %s4874_s18  ;;  %s3555_s21 = sshll.u32 %s4602_s4, 4 }
  0x51   : > { %s5729_s12 = sadd.s32 1, %s4578_s26  ;;  %s5731_s8 = sld [smem:[#allocation46_spill]] }
  0x52   : > { %s4886_s16 = scalar_select %p571_p10, %s4578_s26, %s5729_s12  }
  0x53   : > { %s691_s29 = scalar_lea.vmem [#allocation9], %s4880_s1  ;;  %p4894_p9 = pnand %p3952_p8, %p4866_p6 }
  0x54   : > { %5730 = sst [smem:[#allocation39_spill]] %s4886_s16  ;;  %s698_s0 = sshll.u32 %s691_s29, 4  ;;  %s699_s0 = int_to_ptr.vmem [resolvable:$true] %s698_s0 }
  0x55   : > { %s5733_s6 = sld [smem:[#allocation47_spill]]  ;;  %s5734_s12 = sand.u32 1, %s4610_s5  }
  0x56   : > { %s4905_s30 = scalar_lea.sflag [#allocation10], %s5734_s12  ;;  %p5675_p12 = pneg %p4894_p9 }
  0x57   : > { %s696_s7 = scalar_lea.hbm %s5731_s8, %s3555_s21  ;;  %s4297_s8 = scalar_lea.vmem %s699_s0, 16 }
  0x58   : > { %p4298_p2 = scmp.ne.s32.totalorder %s699_s0, %s4297_s8  ;;  %s4615_s10 = smov [#allocation9]  }
  0x59   : > { %s4302_s11 = sshll.u32 %s4615_s10, 4  ;;  %s4303_s11 = int_to_ptr.vmem [resolvable:$false] %s4302_s11 }
  0x5a   : > { %p4300_p4 = pnand %p4298_p2, %p5675_p12  ;;  %s4304_s29 = scalar_lea.vmem %s4303_s11, 32 }
  0x5b   : > { %s4901_s15 = scalar_lea.hbm %s5733_s6, %s3555_s21  ;;  %p4305_p6 = scmp.lt.s32.totalorder %s699_s0, %s4303_s11 }
  0x5c   : > { %p4301_p5 = pneg %p4300_p4  ;;  %p4306_p8 = scmp.lt.s32.totalorder %s4304_s29, %s4297_s8 }
  0x5e   : > { %p4307_p10 = por %p4306_p8, %p4305_p6 }
  0x60   : > { %p4308_p1 = pnand %p4307_p10, %p4301_p5 }
  0x62   : > { %4311 = shalt.err (!%p4308_p1)
}
  0x63   : > { %3934 = dma.hbm_to_vmem [thread:$0]  (!%p4894_p9), %s696_s7, 16, %s699_s0, %s4905_s30  }
  0x64   : > { %s3557_s17 = sshll.u32 %s4880_s1, 5  ;;  %s3666_s20 = sshll.u32 %s4602_s4, 9 }
  0x65   : > { %s5735_s9 = sld [smem:[#allocation50_spill]]  ;;  %s741_s8 = scalar_lea.vmem [#allocation12], %s3557_s17 }
  0x66   : > { %s748_s11 = sshll.u32 %s741_s8, 4  ;;  %s5736_s29 = sand.u32 1, %s4610_s5   ;;  %s749_s11 = int_to_ptr.vmem [resolvable:$true] %s748_s11 }
  0x67   : > { %s4923_s6 = scalar_lea.sflag [#allocation13], %s5736_s29  ;;  %s4325_s18 = scalar_lea.vmem %s749_s11, 512 }
  0x68   : > { %p4326_p1 = scmp.ne.s32.totalorder %s749_s11, %s4325_s18  ;;  %s4616_s7 = smov [#allocation12]  }
  0x69   : > { %s4330_s0 = sshll.u32 %s4616_s7, 4  ;;  %s4331_s0 = int_to_ptr.vmem [resolvable:$false] %s4330_s0 }
  0x6a   : > { %p4328_p2 = pnand %p4326_p1, %p5675_p12  ;;  %s4332_s21 = scalar_lea.vmem %s4331_s0, 1024 }
  0x6b   : > { %s747_s10 = scalar_lea.hbm %s5735_s9, %s3666_s20  ;;  %p4333_p5 = scmp.lt.s32.totalorder %s749_s11, %s4331_s0 }
  0x6c   : > { %p4329_p4 = pneg %p4328_p2  ;;  %p4334_p6 = scmp.lt.s32.totalorder %s4332_s21, %s4325_s18 }
  0x6e   : > { %p4335_p8 = por %p4334_p6, %p4333_p5 }
  0x70   : > { %p4336_p10 = pnand %p4335_p8, %p4329_p4 }
  0x72   : > { %4339 = shalt.err (!%p4336_p10)
}
  0x73   : > { %s4617_s17 = smov 64   ;;  %s4618_s20 = smov 4  }
  0x74   : > { %3940 = dma.hbm_to_vmem [thread:$0]  (!%p4894_p9), %s747_s10, 512, %s749_s11, %s4923_s6, %s4617_s17, %s4617_s17, %s4618_s20  }
  0x75   : > { %s4619_s2 = smov [#allocation3]   ;;  %s4620_s8 = smov [#allocation8]  }
  0x76   : > { %s609_s12 = sshll.u32 %s4619_s2, 4  ;;  %s635_s29 = sshll.u32 %s4620_s8, 4  ;;  %s610_s12 = int_to_ptr.vmem [resolvable:$true] %s609_s12  ;;  %s636_s29 = int_to_ptr.vmem [resolvable:$true] %s635_s29 }
  0x77   : > { %s4351_s7 = scalar_lea.vmem %s610_s12, 256  ;;  %p4359_p5 = scmp.lt.s32.totalorder %s610_s12, %s610_s12 }
  0x78   : > { %p4352_p1 = scmp.ne.s32.totalorder %s610_s12, %s4351_s7  ;;  %p4360_p6 = scmp.lt.s32.totalorder %s4351_s7, %s4351_s7 }
  0x7a   : > { %p4354_p2 = pnand %p4352_p1, %p4260_p0  ;;  %p4361_p8 = por %p4360_p6, %p4359_p5 }
  0x7c   : > { %p4355_p4 = pneg %p4354_p2 }
  0x7e   : > { %p4362_p10 = pnand %p4361_p8, %p4355_p4 }
  0x80   : > { %4365 = shalt.err (!%p4362_p10)
}
  0x81   : > { %s5737_s18 = smov 8   ;;  %s5738_s21 = smov 128  }
  0x82   : > { %s5739_s0 = sld [smem:[#allocation43_spill]]  ;;  %s4377_s2 = scalar_lea.vmem %s636_s29, 512 }
  0x83   : > { %p4378_p12 = scmp.ne.s32.totalorder %s636_s29, %s4377_s2  ;;  %p4385_p5 = scmp.lt.s32.totalorder %s636_s29, %s636_s29 }
  0x84   : > { %p4386_p4 = scmp.lt.s32.totalorder %s4377_s2, %s4377_s2 }
  0x85   : > { %p4380_p1 = pnand %p4378_p12, %p4260_p0 }
  0x86   : > { %p4387_p6 = por %p4386_p4, %p4385_p5 }
  0x87   : > { %p4381_p2 = pneg %p4380_p1 }
  0x88   : > { %3921 = dma.hbm_to_vmem [thread:$0]  (!%p4838_p13), %s5739_s0, 256, %s610_s12, [#allocation4], %s5738_s21, %s5738_s21, %s5737_s18  }
  0x89   : > { %p4388_p8 = pnand %p4387_p6, %p4381_p2 }
  0x8b   : > { %4391 = shalt.err (!%p4388_p8)
}
  0x8c   : > { %s5740_s12 = sld [smem:[#allocation45_spill]]  ;;  %s4621_s10 = smov [#allocation15]  }
  0x8d   : > { %s654_s11 = sshll.u32 %s4621_s10, 4  ;;  %s708_s0 = scalar_lea.vmem [#allocation11], %s4880_s1  ;;  %s655_s11 = int_to_ptr.vmem [resolvable:$true] %s654_s11 }
  0x8e   : > { %s715_s9 = sshll.u32 %s708_s0, 4  ;;  %s4403_s2 = scalar_lea.vmem %s655_s11, 1024  ;;  %s716_s9 = int_to_ptr.vmem [resolvable:$true] %s715_s9 }
  0x8f   : > { %p4404_p12 = scmp.ne.s32.totalorder %s655_s11, %s4403_s2  ;;  %p4411_p2 = scmp.lt.s32.totalorder %s655_s11, %s655_s11 }
  0x90   : > { %p4412_p5 = scmp.lt.s32.totalorder %s4403_s2, %s4403_s2 }
  0x91   : > { %p4406_p10 = pnand %p4404_p12, %p4260_p0 }
  0x92   : > { %3927 = dma.hbm_to_vmem [thread:$0]  (!%p4838_p13), %s5740_s12, 512, %s636_s29, [#allocation7], %s4617_s17, %s4617_s17, %s4618_s20  }
  0x93   : > { %p4407_p1 = pneg %p4406_p10  ;;  %p4413_p4 = por %p4412_p5, %p4411_p2 }
  0x95   : > { %p4414_p6 = pnand %p4413_p4, %p4407_p1 }
  0x97   : > { %4417 = shalt.err (!%p4414_p6)
}
  0x98   : > { %s5741_s19 = sld [smem:[#allocation60_spill]]  ;;  %s4431_s29 = scalar_lea.vmem %s716_s9, 16 }
  0x99   : > { %p4432_p8 = scmp.ne.s32.totalorder %s716_s9, %s4431_s29  ;;  %p5742_p0 = pneg %p4894_p9 }
  0x9a   : > { %s4622_s8 = smov [#allocation11]  }
  0x9b   : > { %p4434_p12 = pnand %p4432_p8, %p5742_p0  ;;  %s4436_s7 = sshll.u32 %s4622_s8, 4  ;;  %s4437_s7 = int_to_ptr.vmem [resolvable:$false] %s4436_s7 }
  0x9c   : > { %s4438_s12 = scalar_lea.vmem %s4437_s7, 32  ;;  %p4439_p1 = scmp.lt.s32.totalorder %s716_s9, %s4437_s7 }
  0x9d   : > { %p4435_p10 = pneg %p4434_p12  ;;  %p4440_p2 = scmp.lt.s32.totalorder %s4438_s12, %s4431_s29 }
  0x9e   : > { %3930 = dma.hbm_to_vmem [thread:$0]  (!%p4838_p13), %s5741_s19, 1024, %s655_s11, [#allocation16], %s5738_s21, %s5738_s21, %s5737_s18  }
  0x9f   : > { %p4441_p5 = por %p4440_p2, %p4439_p1 }
  0xa1   : > { %p4442_p4 = pnand %p4441_p5, %p4435_p10 }
  0xa3   : > { %4445 = shalt.err (!%p4442_p4)
}
  0xa4   : > { %3937 = dma.hbm_to_vmem [thread:$0]  (!%p4894_p9), %s4901_s15, 16, %s716_s9, %s4905_s30  }
  0xa5   : > { %s3667_s23 = sshll.u32 %s4602_s4, 10  ;;  %s5743_s10 = sshll.u32 %s4880_s1, 6 }
  0xa6   : > { %s780_s11 = scalar_lea.vmem [#allocation14], %s5743_s10  ;;  %s5744_s13 = sld [smem:[#allocation54_spill]] }
  0xa7   : > { %s787_s0 = sshll.u32 %s780_s11, 4  ;;  %p5745_p6 = pmov %p5742_p0  ;;  %s788_s0 = int_to_ptr.vmem [resolvable:$true] %s787_s0 }
  0xa8   : > { %s4459_s29 = scalar_lea.vmem %s788_s0, 1024  ;;  %s4623_s8 = smov [#allocation14]  }
  0xa9   : > { %p4460_p13 = scmp.ne.s32.totalorder %s788_s0, %s4459_s29  ;;  %s4464_s7 = sshll.u32 %s4623_s8, 4  ;;  %s4465_s7 = int_to_ptr.vmem [resolvable:$false] %s4464_s7 }
  0xaa   : > { %s4466_s12 = scalar_lea.vmem %s4465_s7, 2048  ;;  %p4467_p12 = scmp.lt.s32.totalorder %s788_s0, %s4465_s7 }
  0xab   : > { %p4462_p8 = pnand %p4460_p13, %p5745_p6  ;;  %p4468_p10 = scmp.lt.s32.totalorder %s4466_s12, %s4459_s29 }
  0xac   : > { %s786_s20 = scalar_lea.hbm %s5744_s13, %s3667_s23 }
  0xad   : > { %p4463_p0 = pneg %p4462_p8  ;;  %p4469_p1 = por %p4468_p10, %p4467_p12 }
  0xaf   : > { %p4470_p2 = pnand %p4469_p1, %p4463_p0 }
  0xb1   : > { %4473 = shalt.err (!%p4470_p2)
}
  0xb2   : > { %3943 = dma.hbm_to_vmem [thread:$0]  (!%p4894_p9), %s786_s20, 1024, %s788_s0, %s4923_s6, %s5738_s21, %s5738_s21, %s5737_s18  }
  0xb3   : > { %820 = sbr.rel (%p4830_p11) target bundleno = 5332 (0x14d4), region = 104 }
  0xb8   : > { %p5746_p5 = scmp.eq.s32.totalorder %s4803_s22, 0 }
  0xba   : > { %4545 = dma.done.wait (%p5746_p5), [#allocation4], 256   ;;  %p5747_p4 = pmov %p5746_p5 }
  0xbc   : > { %4547 = vsyncadd (%p5747_p4), [#allocation4], 4294967040  ;;  %p5748_p13 = pmov %p5747_p4 }
  0xbd   : > { %p5749_p6 = pmov %p5747_p4 }
  0xbe   : > { %4549 = dma.done.wait (%p5748_p13), [#allocation7], 768  }
  0xbf   : > { %4551 = vsyncadd (%p5749_p6), [#allocation7], 4294966528  ;;  %s834_s9 = sand.u32 1, %s4803_s22   ;;  %s5002_s6 = sand.u32 1, %s4586_s3  }
  0xc0   : > { %s835_s15 = scalar_lea.sflag [#allocation10], %s834_s9 }
  0xc1   : > { %4553 = dma.done.wait (%p4813_p3), %s835_s15, 32  }
  0xc2   : > { %4555 = vsyncadd (%p4813_p3), %s835_s15, 4294967264  ;;  %s3567_s27 = sshll.u32 %s5002_s6, 5  ;;  %s851_s14 = scalar_lea.sflag [#allocation13], %s834_s9 }
  0xc3   : > { %s5011_s18 = scalar_lea.vmem [#allocation12], %s3567_s27 }
  0xc4   : > { %4557 = dma.done.wait (%p4813_p3), %s851_s14, 1536  }
  0xc5   : > { %4559 = vsyncadd (%p4813_p3), %s851_s14, 4294965760  ;;  %s3568_s21 = sshll.u32 %s5002_s6, 6  ;;  %p5751_p11 = pmov %p5747_p4 }
  0xc6   : > { %s5018_s23 = scalar_lea.vmem [#allocation14], %s3568_s21 }
  0xc7   : > { %5750 = sst [smem:[#allocation40_spill]] %s5018_s23 }
  0xc8   : > { %4561 = dma.done.wait (%p5751_p11), [#allocation16], 1024   ;;  %p5752_p9 = pmov %p5747_p4 }
  0xc9   : > { %s5753_s10 = sld [smem:[#allocation30_spill]]  ;;  %s5676_s0 = sand.u32 1, %s4574_s25  }
  0xca   : > { %4563 = vsyncadd (%p5752_p9), [#allocation16], 4294966272  ;;  %s5754_s11 = sld [smem:[#allocation29_spill]]  ;;  %s3570_s24 = sshll.u32 %s5676_s0, 6 }
  0xcb   : > { %s5755_s22 = sld [smem:[#allocation41_spill]]  ;;  %s5079_s28 = scalar_lea.vmem [#allocation17], %s3570_s24 }
  0xcc   : > { %s5756_s27 = sld [smem:[#allocation42_spill]] }
  0xcd   : > { %s5757_s29 = sld [smem:[#allocation48_spill]] }
  0xce   : > { %s5758_s1 = sld [smem:[#allocation49_spill]] }
  0xcf   : > { %s3571_s2 = sshll.u32 %s5753_s10, 2  ;;  %s3573_s17 = sshll.u32 %s5753_s10, 1 }
  0xd0   : > { %p979_p3 = scmp.lt.s32.totalorder %s3571_s2, 7  ;;  %p985_p8 = scmp.lt.s32.totalorder %s3573_s17, 3 }
  0xd1   : > { %p989_p0 = scmp.lt.s32.totalorder %s5754_s11, 1  ;;  %s5761_s26 = sld [smem:[#allocation53_spill]] }
  0xd2   : > { %s5803_s2 = smov (!%p979_p3, %s3571_s2), 7  ;;  %s5805_s17 = smov (!%p985_p8, %s3573_s17), 3 }
  0xd3   : > { %s3572_s20 = sshll.u32 %s5803_s2, 3  ;;  %s5039_s14 = scalar_lea.vmem %s5756_s27, %s5805_s17 }
  0xd4   : > { %s982_s7 = scalar_lea.vmem %s5755_s22, %s3572_s20  ;;  %s5760_s17 = sld [smem:[#allocation52_spill]] }
  0xd5   : > { %s5034_s12 = scalar_select %p989_p0, %s5754_s11, 1 }
  0xd6   : > { %s5763_s22 = sld [smem:[#allocation56_spill]]  ;;  %p3580_p12 = scmp.ne.s32.totalorder %s5754_s11, 0 }
  0xd7   : > { %s3668_s21 = sshll.u32 %s5034_s12, 6  ;;  %s3576_s10 = sshll.u32 %s5034_s12, 1 }
  0xd8   : > { %s5046_s20 = scalar_lea.vmem %s5757_s29, %s3668_s21  ;;  %s5051_s30 = scalar_lea.vmem %s5758_s1, %s3576_s10 }
  0xd9   : > { %s1006_s5 = scalar_lea.vmem %s5761_s26, %s5034_s12  ;;  %s5762_s29 = sld [smem:[#allocation55_spill]] }
  0xda   : > { %s1003_s27 = scalar_lea.vmem %s5760_s17, %s5034_s12  ;;  %s5764_s15 = sld [smem:[#allocation57_spill]] }
  0xdc   : > { %s5073_s23 = scalar_lea.vmem %s5763_s22, %s3668_s21  ;;  %1024 = sbr.rel (%p3580_p12) target bundleno = 228 (0xe4), region = 140 }
  0xdf   : > { %s5068_s25 = scalar_lea.vmem %s5762_s29, %s3576_s10 }
  0xe0   : > { %s1018_s19 = scalar_lea.vmem %s5764_s15, %s5034_s12 }
  0xe1   : > { %v1025_v0 = vld [vmem:[%s982_s7] sm:$0xff]  ;;  %vm1029_vm0 = vcmask 523264   ;;  %v1026_v1 = vld [vmem:[%s982_s7 + $0x8] sm:$0xff]  ;;  %v1027_v2 = vld [vmem:[%s982_s7 + $0x10] sm:$0xff] }
  0xe2   : > { %1030 = vst.msk [vmem:[#allocation2] sm:$0xff] %vm1029_vm0, %v1025_v0  ;;  %1031 = vst.msk [vmem:[#allocation2 + $0x8] sm:$0xff] %vm1029_vm0, %v1026_v1  ;;  %v1028_v3 = vld [vmem:[%s982_s7 + $0x18] sm:$0xff] }
  0xe3   : > { %1032 = vst.msk [vmem:[#allocation2 + $0x10] sm:$0xff] %vm1029_vm0, %v1027_v2  ;;  %1033 = vst.msk [vmem:[#allocation2 + $0x18] sm:$0xff] %vm1029_vm0, %v1028_v3 }
  0xe4 PF: > { %vm1040_vm1 = vcmask 523264   ;;  %v4098_v32 = vld [vmem:[%s5046_s20 + $0x34] ss:$8 sps:$4 sm:$0xff]   ;;  %v4100_v33 = vld [vmem:[%s5046_s20 + $0x30] ss:$8 sps:$4 sm:$0xff]   ;;  %v4624_v36 = vmov 0  }
  0xe5   : > { %v4101_v34 = vld [vmem:[%s5046_s20 + $0x24] ss:$8 sps:$4 sm:$0xff]   ;;  %1190 = vmatprep.subr.bf16.mxu1 %v4098_v32  ;;  %v4103_v35 = vld [vmem:[%s5046_s20 + $0x20] ss:$8 sps:$4 sm:$0xff]   ;;  %1214 = vmatprep.mubr.bf16.mxu1 %v4624_v36  ;;  %v4104_v37 = vld [vmem:[%s5046_s20 + $0x14] ss:$8 sps:$4 sm:$0xff]  }
  0xe6   : > { %1191 = vmatpush1.bf16.msra.mxu1 %v4100_v33  ;;  %v4106_v38 = vld [vmem:[%s5046_s20 + $0x10] ss:$8 sps:$4 sm:$0xff]   ;;  %v4107_v39 = vld [vmem:[%s5046_s20 + $0x4] ss:$8 sps:$4 sm:$0xff]   ;;  %v4109_v40 = vld [vmem:[%s5046_s20] ss:$8 sps:$4 sm:$0xff]  }
  0xe7   : > { %1192 = vmatprep.subr.bf16.mxu1 %v4101_v34  ;;  %s5765_s16 = scalar_lea.vmem [#allocation9], %s5002_s6  ;;  %s5766_s26 = scalar_lea.vmem [#allocation11], %s5002_s6  ;;  %vm4627_vm2 = vmmov 0   ;;  %vm1477_vm3 = vcmask 130048   ;;  %vm2491_vm6 = vcmask 261120   ;;  %vm2496_vm7 = vcmask 392192  }
  0xe8   : > { %v3581_v55 = vld [vmem:[%s5765_s16] ss:$0 sm:$0xff]  ;;  %s4626_s3 = smov 64   ;;  %s4629_s4 = smov 48  }
  0xe9   : > { %v1034_v4 = vld [vmem:[#allocation2] sm:$0xff]  ;;  %v1035_v6 = vld [vmem:[#allocation2 + $0x8] sm:$0xff]  ;;  %s4630_s6 = smov 112   ;;  %s4632_s11 = smov 96  }
  0xea   : > { %v1036_v5 = vld [vmem:[#allocation2 + $0x10] sm:$0xff]  ;;  %v1041_v7 = vsel %vm1040_vm1, %v1034_v4, 0.0  ;;  %v1037_v9 = vld [vmem:[#allocation2 + $0x18] sm:$0xff]  ;;  %v1044_v10 = vsel %vm1040_vm1, %v1035_v6, 0.0  ;;  %1193 = vmatpush1.bf16.msra.mxu1 %v4103_v35  ;;  %v3582_v60 = vld [vmem:[%s5766_s26] ss:$0 sm:$0xff] }
  0xeb   : > { %v1047_v8 = vsel %vm1040_vm1, %v1036_v5, 0.0  ;;  %1042 = vadd.xlane.f32.xlu0 %v1041_v7  ;;  %v1050_v11 = vsel %vm1040_vm1, %v1037_v9, 0.0  ;;  %1194 = vmatprep.subr.bf16.mxu1 %v4104_v37  ;;  %s4633_s24 = smov 16   ;;  %s4634_s7 = smov 80  }
  0xec   : > { %1048 = vadd.xlane.f32.xlu1 %v1047_v8  ;;  %s5767_s21 = sld [smem:[#allocation51_spill]] }
  0xed   : > { %s5769_s20 = sld [smem:[#allocation40_spill]] }
  0xee   : > { %1195 = vmatpush1.bf16.msra.mxu1 %v4106_v38 }
  0xef   : > { %1045 = vadd.xlane.f32.xlu0 %v1044_v10  ;;  %1196 = vmatprep.subr.bf16.mxu1 %v4107_v39  ;;  %v4111_v10 = vld [vmem:[#allocation8 + $0x10] sm:$0xff]  }
  0xf0   : > { %1051 = vadd.xlane.f32.xlu1 %v1050_v11  ;;  %v4112_v11 = vld [vmem:[#allocation8 + $0x8] sm:$0xff]  }
  0xf2   : > { %1197 = vmatpush1.bf16.msra.mxu1 %v4109_v40  ;;  %s5768_s10 = scalar_lea.vmem %s5767_s21, %s5034_s12 }
 0x174   : > { %v1043_v12 = vpop.xlane.xlu0 %1042 }
 0x175   : > { %v1049_v13 = vpop.xlane.xlu1 %1048  ;;  %v1054_v14 = vmul.f32 0.015625, %v1043_v12  ;;  %v4113_v12 = vld [vmem:[#allocation8] sm:$0xff]  }
 0x176   : > { %v1056_v15 = vmul.f32 0.015625, %v1049_v13  ;;  %v1126_v13 = vlaneseq }
 0x177   : > { %v1058_v16 = vsub.f32 %v1034_v4, %v1054_v14 }
 0x178   : > { %v5086_v17 = vsub.f32 %v1036_v5, %v1056_v15  ;;  %v1046_v18 = vpop.xlane.xlu0 %1045  ;;  %v5112_v14 = vshrl.u32 %v1126_v13, 7 }
 0x179   : > { %v1052_v19 = vpop.xlane.xlu1 %1051  ;;  %v1055_v20 = vmul.f32 0.015625, %v1046_v18  ;;  %v1062_v22 = vmul.f32 %v1058_v16, %v1058_v16 }
 0x17a   : > { %v1057_v21 = vmul.f32 0.015625, %v1052_v19  ;;  %v1064_v23 = vmul.f32 %v5086_v17, %v5086_v17  ;;  %v5115_v15 = vsub.s32 0, %v5112_v14  ;;  %v5121_v18 = vsub.s32 1, %v5112_v14 }
 0x17b   : > { %v1059_v24 = vsub.f32 %v1035_v6, %v1055_v20  ;;  %v1066_v26 = vsel %vm1040_vm1, %v1062_v22, 0.0 }
 0x17c   : > { %v1061_v25 = vsub.f32 %v1037_v9, %v1057_v21  ;;  %1067 = vadd.xlane.f32.xlu0 %v1066_v26  ;;  %v1072_v27 = vsel %vm1040_vm1, %v1064_v23, 0.0  ;;  %v4110_v9 = vld [vmem:[#allocation8 + $0x18] sm:$0xff]  }
 0x17d   : > { %v1063_v28 = vmul.f32 %v1059_v24, %v1059_v24  ;;  %3732 = vmatprep.subr.bf16.mxu1 %v4110_v9  ;;  %3744 = vmatprep.subr.bf16.mxu0 %v4110_v9 }
 0x17e   : > { %v1065_v29 = vmul.f32 %v1061_v25, %v1061_v25  ;;  %3745 = vmatpush3.bf16.msra.mxu0 %v4110_v9 }
 0x17f   : > { %v1069_v30 = vsel %vm1040_vm1, %v1063_v28, 0.0  ;;  %3746 = vmatprep.subr.bf16.mxu0 %v4111_v10 }
 0x180   : > { %1073 = vadd.xlane.f32.xlu0 %v1072_v27  ;;  %1070 = vadd.xlane.f32.xlu1 %v1069_v30  ;;  %v1075_v31 = vsel %vm1040_vm1, %v1065_v29, 0.0 }
 0x182   : > { %3747 = vmatpush3.bf16.msra.mxu0 %v4111_v10 }
 0x183   : > { %3748 = vmatprep.subr.bf16.mxu0 %v4112_v11 }
 0x184   : > { %1076 = vadd.xlane.f32.xlu1 %v1075_v31 }
 0x186   : > { %3749 = vmatpush3.bf16.msra.mxu0 %v4112_v11 }
 0x187   : > { %3750 = vmatprep.subr.bf16.mxu0 %v4113_v12 }
 0x18a   : > { %3751 = vmatpush3.bf16.msra.mxu0 %v4113_v12 }
 0x205   : > { %v1068_v41 = vpop.xlane.xlu0 %1067 }
 0x206   : > { %v1078_v42 = vmul.f32 0.015625, %v1068_v41 }
 0x208   : > { %v1082_v43 = vadd.f32 1e-05, %v1078_v42  ;;  %v1385_v42 = vld [vmem:[#allocation3] sm:$0xff] }
 0x209   : > { %v1071_v44 = vpop.xlane.xlu1 %1070  ;;  %v1074_v45 = vpop.xlane.xlu0 %1073 }
 0x20a   : > { %4138 = vrsqrt.f32 %v1082_v43  ;;  %v1079_v46 = vmul.f32 0.015625, %v1071_v44  ;;  %v1080_v47 = vmul.f32 0.015625, %v1074_v45  ;;  %v1386_v43 = vld [vmem:[#allocation3 + $0x8] sm:$0xff] }
 0x20c   : > { %v1083_v48 = vadd.f32 1e-05, %v1079_v46  ;;  %v1084_v49 = vadd.f32 1e-05, %v1080_v47  ;;  %v1387_v46 = vld [vmem:[#allocation6] sm:$0xff] }
 0x20d   : > { %v1077_v50 = vpop.xlane.xlu1 %1076 }
 0x20e   : > { %4140 = vrsqrt.f32 %v1083_v48  ;;  %v1081_v51 = vmul.f32 0.015625, %v1077_v50  ;;  %v1388_v50 = vld [vmem:[#allocation6 + $0x8] sm:$0xff] }
 0x20f   : > { %4142 = vrsqrt.f32 %v1084_v49 }
 0x210   : > { %v1085_v52 = vadd.f32 1e-05, %v1081_v51 }
 0x212   : > { %4144 = vrsqrt.f32 %v1085_v52 }
 0x217   : > { %v4139_v53 = vpop.eup %4138 }
 0x218   : > { %v1090_v54 = vmul.f32 %v4139_v53, %v1058_v16  ;;  %v4625_v16 = vmov 0.0  }
 0x219   : > { %3768 = vmatprep.subr.bf16.mxu0 %v4625_v16 }
 0x21a   : > { %v1100_v58 = vmul.f32 %v3581_v55, %v1090_v54 }
 0x21b   : > { %v4141_v56 = vpop.eup %4140 }
 0x21c   : > { %v1091_v57 = vmul.f32 %v4141_v56, %v1059_v24  ;;  %v4143_v59 = vpop.eup %4142  ;;  %v1110_v63 = vadd.f32 %v3582_v60, %v1100_v58 }
 0x21d   : > { %v1092_v1 = vmul.f32 %v4143_v59, %v5086_v17  ;;  %v1124_v17 = vld [vmem:[%s5051_s30] sm:$0x3]  ;;  %s4631_s30 = smov 32  }
 0x21e   : > { %v1101_v61 = vmul.f32 %v3581_v55, %v1091_v57  ;;  %v1129_v20 = vrot.slane %v1124_v17, %v5115_v15  ;;  %v1133_v22 = vrot.slane %v1124_v17, %v5121_v18 }
 0x21f   : > { %v4145_v62 = vpop.eup %4144  ;;  %v1102_v5 = vmul.f32 %v3581_v55, %v1092_v1 }
 0x220   : > { %v1111_v0 = vadd.f32 %v3582_v60, %v1101_v61  ;;  %v1093_v2 = vmul.f32 %v4145_v62, %v1061_v25 }
 0x221   : > { %v1112_v7 = vadd.f32 %v3582_v60, %v1102_v5 }
 0x222   : > { %v1114_v3 = vpack.c.bf16 %v1111_v0, %v1110_v63  ;;  %v1103_v4 = vmul.f32 %v3581_v55, %v1093_v2 }
 0x224   : > { %3591 = vmatmul.mubr.msk.bf16.vlgmr.msra.gmra.mxu1 %vm1040_vm1, %v1114_v3  ;;  %v1113_v6 = vadd.f32 %v3582_v60, %v1103_v4 }
 0x225   : > { %1224 = vmatprep.mubr.bf16.mxu1 %v4624_v36  ;;  %3733 = vmatpush3.bf16.msra.mxu1 %v4110_v9 }
 0x226   : > { %v1115_v8 = vpack.c.bf16 %v1113_v6, %v1112_v7  ;;  %3734 = vmatprep.subr.bf16.mxu1 %v4111_v10 }
 0x229   : > { %3735 = vmatpush3.bf16.msra.mxu1 %v4111_v10 }
 0x22a   : > { %3736 = vmatprep.subr.bf16.mxu1 %v4112_v11 }
 0x22c   : > { %3592 = vmatmul.mubr.msk.bf16.gmra.mxu1 %vm1040_vm1, %v1115_v8 }
 0x22d   : > { %3737 = vmatpush3.bf16.msra.mxu1 %v4112_v11 }
 0x22e   : > { %3738 = vmatprep.subr.bf16.mxu1 %v4113_v12 }
 0x231   : > { %3739 = vmatpush3.bf16.msra.mxu1 %v4113_v12 }
 0x232   : > { %3756 = vmatprep.subr.bf16.mxu1 %v4625_v16 }
 0x2e4   : > { %v1216_v19 = vpop.f32.mrf.mxu1 }
 0x2e5   : > { %v5125_v24 = vadd.f32 %v1216_v19, %v1129_v20 }
 0x2e6   : > { %v1218_v21 = vpop.f32.mrf.mxu1 }
 0x2e7   : > { %v1219_v27 = vadd.f32 %v1218_v21, %v1133_v22  ;;  %v1389_v54 = vmul.f32 %v1385_v42, %v5125_v24 }
 0x2e8   : > { %v1220_v23 = vpop.f32.mrf.mxu1 }
 0x2e9   : > { %v5127_v25 = vadd.f32 %v1220_v23, %v1129_v20 }
 0x2ea   : > { %v1222_v26 = vpop.f32.mrf.mxu1 }
 0x2eb   : > { %v1223_v28 = vadd.f32 %v1222_v26, %v1133_v22  ;;  %v1235_v29 = vpack.c.bf16 %v5127_v25, %v5125_v24  ;;  %v1390_v59 = vmul.f32 %v1386_v43, %v5127_v25 }
 0x2ec   : > { %v1226_v30 = vpop.f32.mrf.mxu1 }
 0x2ed   : > { %v5131_v31 = vpack.c.bf16 %v1223_v28, %v1219_v27  ;;  %1326 = vrot.lane.b32.xlu0 %v1235_v29, %s4626_s3  ;;  %3740 = vmatprep.mubr.msk.bf16.mxu1 %vm1040_vm1, %v1235_v29  ;;  %v5135_v35 = vadd.f32 %v1226_v30, %v1129_v20 }
 0x2ee   : > { %v1228_v32 = vpop.f32.mrf.mxu1 }
 0x2ef   : > { %v1229_v33 = vadd.f32 %v1228_v32, %v1133_v22  ;;  %v1391_v51 = vmul.f32 %v1385_v42, %v5135_v35 }
 0x2f0   : > { %v1230_v34 = vpop.f32.mrf.mxu1 }
 0x2f1   : > { %v5137_v37 = vadd.f32 %v1230_v34, %v1129_v20 }
 0x2f2   : > { %v1232_v38 = vpop.f32.mrf.mxu1 }
 0x2f3   : > { %v1233_v39 = vadd.f32 %v1232_v38, %v1133_v22  ;;  %v1236_v40 = vpack.c.bf16 %v5137_v37, %v5135_v35  ;;  %v1392_v55 = vmul.f32 %v1386_v43, %v5137_v37 }
 0x2f5   : > { %v5141_v41 = vpack.c.bf16 %v1233_v39, %v1229_v33  ;;  %1328 = vrot.lane.b32.xlu1 %v1236_v40, %s4626_s3  ;;  %3741 = vmatmul.mubr.msk.bf16.vlgmr.msra.gmra.mxu1 %vm1040_vm1, %v1236_v40 }
 0x2f6   : > { %3758 = vmatprep.mubr.msk.bf16.mxu1 %vm4627_vm2, %v4625_v16 }
 0x2f9   : > { %1407 = vrot.lane.b32.xlu1 %v1385_v42, %s4626_s3  ;;  %v1445_v42 = vand.u32 127, %v1126_v13 }
 0x2fb   : > { %vm1446_vm4 = vcmp.le.s32.totalorder %v1445_v42, %v5112_v14 }
 0x2fd   : > { %1409 = vrot.lane.b32.xlu1 %v1386_v43, %s4626_s3  ;;  %v1443_v43 = vadd.s32 8, %v5112_v14 }
 0x2ff   : > { %vm1447_vm5 = vcmp.le.s32.totalorder %v1445_v42, %v1443_v43 }
 0x35f   : > { %v1327_v44 = vpop.permute.xlu0 %1326 }
 0x360   : > { %3752 = vmatprep.mubr.msk.bf16.mxu0 %vm1040_vm1, %v1327_v44  ;;  %v4628_v44 = vmov -1e+30  }
 0x367   : > { %v1329_v45 = vpop.permute.xlu1 %1328 }
 0x368   : > { %3753 = vmatmul.mubr.msk.bf16.vlgmr.msra.gmra.mxu0 %vm1040_vm1, %v1329_v45  ;;  %v1448_v45 = vsel %vm1446_vm4, 0.0, %v4628_v44 }
 0x369   : > { %3769 = vmatpush3.bf16.msra.mxu0 %v5131_v31  ;;  %3770 = vmatprep.mubr.msk.bf16.mxu0 %vm4627_vm2, %v4625_v16 }
 0x36a   : > { %3780 = vmatprep.subr.bf16.mxu0 %v4625_v16 }
 0x36b   : > { %v1408_v19 = vpop.permute.xlu1 %1407 }
 0x36c   : > { %v1413_v22 = vmul.f32 %v1408_v19, %v5125_v24  ;;  %v1415_v30 = vmul.f32 %v1408_v19, %v5135_v35 }
 0x36f   : > { %v1410_v20 = vpop.permute.xlu1 %1409 }
 0x370   : > { %v1414_v23 = vmul.f32 %v1410_v20, %v5127_v25  ;;  %v1416_v32 = vmul.f32 %v1410_v20, %v5137_v37 }
 0x3b5   : > { %v3742_v47 = vpop.f32.mrf.mxu1 }
 0x3b6   : > { %v1395_v48 = vmul.f32 %v3742_v47, %v1387_v46 }
 0x3b7   : > { %v1309_v49 = vpop.f32.mrf.mxu1 }
 0x3b8   : > { %v1393_v52 = vmul.f32 %v1387_v46, %v1309_v49  ;;  %v1399_v56 = vadd.f32 %v1395_v48, %v1391_v51  ;;  %v1449_v48 = vsel %vm1447_vm5, 0.0, %v4628_v44 }
 0x3b9   : > { %v3743_v53 = vpop.f32.mrf.mxu1 }
 0x3ba   : > { %v1396_v57 = vmul.f32 %v3743_v53, %v1388_v50  ;;  %v1397_v60 = vadd.f32 %v1393_v52, %v1389_v54  ;;  %v1403_v63 = vmul.f32 0.25, %v1399_v56  ;;  %v3602_v53 = vld [vmem:[%s5039_s14 + $0x1] ss:$0 sm:$0xff] }
 0x3bb   : > { %v1312_v58 = vpop.f32.mrf.mxu1 }
 0x3bc   : > { %v1400_v61 = vadd.f32 %v1396_v57, %v1392_v55  ;;  %v1394_v62 = vmul.f32 %v1388_v50, %v1312_v58  ;;  %v1401_v2 = vmul.f32 0.25, %v1397_v60  ;;  %v5205_v55 = vadd.f32 %v3602_v53, %v1448_v45 }
 0x3bd   : > { %v5209_v60 = vadd.f32 %v3602_v53, %v1449_v48 }
 0x3be   : > { %v1404_v0 = vmul.f32 0.25, %v1400_v61  ;;  %v1398_v1 = vadd.f32 %v1394_v62, %v1390_v59 }
 0x3c0   : > { %v5155_v3 = vpack.c.bf16 %v1404_v0, %v1403_v63  ;;  %v1402_v4 = vmul.f32 0.25, %v1398_v1 }
 0x3c2   : > { %v5157_v5 = vpack.c.bf16 %v1402_v4, %v1401_v2 }
 0x428   : > { %v3754_v6 = vpop.f32.mrf.mxu0 }
 0x429   : > { %v1419_v11 = vmul.f32 %v3754_v6, %v1387_v46 }
 0x42a   : > { %v1370_v7 = vpop.f32.mrf.mxu0 }
 0x42b   : > { %v1417_v8 = vmul.f32 %v1387_v46, %v1370_v7  ;;  %v3601_v46 = vld [vmem:[%s5039_s14] ss:$0 sm:$0xff] }
 0x42c   : > { %v3755_v9 = vpop.f32.mrf.mxu0  ;;  %v5197_v47 = vadd.f32 %v3601_v46, %v1448_v45  ;;  %v5200_v51 = vadd.f32 %v3601_v46, %v1449_v48 }
 0x42d   : > { %1425 = vrot.lane.b32.xlu0 %v1417_v8, %s4626_s3  ;;  %v1420_v17 = vmul.f32 %v3755_v9, %v1388_v50 }
 0x42e   : > { %v1373_v10 = vpop.f32.mrf.mxu0 }
 0x42f   : > { %v1418_v12 = vmul.f32 %v1388_v50, %v1373_v10 }
 0x431   : > { %1429 = vrot.lane.b32.xlu0 %v1419_v11, %s4626_s3  ;;  %1427 = vrot.lane.b32.xlu1 %v1418_v12, %s4626_s3 }
 0x435   : > { %1431 = vrot.lane.b32.xlu1 %v1420_v17, %s4626_s3 }
 0x49f   : > { %v1426_v21 = vpop.permute.xlu0 %1425 }
 0x4a0   : > { %v1437_v27 = vadd.f32 %v1426_v21, %v1413_v22 }
 0x4a3   : > { %v1428_v26 = vpop.permute.xlu1 %1427  ;;  %v1430_v29 = vpop.permute.xlu0 %1429 }
 0x4a4   : > { %v1438_v28 = vadd.f32 %v1428_v26, %v1414_v23  ;;  %v1439_v38 = vadd.f32 %v1430_v29, %v1415_v30 }
 0x4a6   : > { %v5171_v33 = vpack.c.bf16 %v1438_v28, %v1437_v27 }
 0x4a7   : > { %v1432_v34 = vpop.permute.xlu1 %1431 }
 0x4a8   : > { %v1440_v39 = vadd.f32 %v1432_v34, %v1416_v32  ;;  %1475 = vrot.lane.b32.xlu0 %v5171_v33, %s4626_s3 }
 0x4aa   : > { %v5175_v40 = vpack.c.bf16 %v1440_v39, %v1439_v38 }
 0x4ac   : > { %1526 = vrot.lane.b32.xlu1 %v5175_v40, %s4626_s3 }
 0x51a   : > { %v1476_v24 = vpop.permute.xlu0 %1475 }
 0x51b   : > { %v1482_v25 = vsel %vm1477_vm3, %v1476_v24, 0 }
 0x51c   : > { %3757 = vmatpush3.bf16.xpose.msra.mxu1 %v1482_v25 }
 0x51d   : > { %3762 = vmatprep.subr.bf16.mxu1 %v4625_v16 }
 0x51e   : > { %v1527_v35 = vpop.permute.xlu1 %1526 }
 0x51f   : > { %v1532_v37 = vsel %vm1477_vm3, %v1527_v35, 0 }
 0x523   : > { %3759 = vmatmul.mubr.msk.bf16.vlgmr.msra.gmra.mxu1 %vm1477_vm3, %v5157_v5 }
 0x524   : > { %3763 = vmatpush3.bf16.xpose.msra.mxu1 %v1532_v37  ;;  %3764 = vmatprep.mubr.msk.bf16.mxu1 %vm4627_vm2, %v4625_v16 }
 0x525   : > { %3774 = vmatprep.subr.bf16.mxu1 %v4625_v16 }
 0x52b   : > { %3765 = vmatmul.mubr.msk.bf16.vlgmr.msra.gmra.mxu1 %vm1477_vm3, %v5155_v3 }
 0x52c   : > { %3775 = vmatpush3.bf16.msra.mxu1 %v5141_v41  ;;  %3776 = vmatprep.mubr.msk.bf16.mxu1 %vm4627_vm2, %v4625_v16 }
 0x52d   : > { %3786 = vmatprep.subr.bf16.mxu1 %v4625_v16 }
 0x5e3   : > { %v1518_v49 = vpop.f32.mrf.mxu1 }
 0x5e4   : > { %v1519_v50 = vadd.f32 %v1518_v49, %v5197_v47 }
 0x5e5   : > { %v3760_v52 = vpop.f32.mrf.mxu1 }
 0x5e6   : > { %v1575_v13 = vsel %vm1477_vm3, %v1519_v50, -inf }
 0x5e7   : > { %1576 = vmax.xlane.f32.xlu0 %v1575_v13  ;;  %v1521_v54 = vpop.f32.mrf.mxu1 }
 0x5e8   : > { %v1522_v14 = vadd.f32 %v1521_v54, %v5200_v51 }
 0x5e9   : > { %v3761_v56 = vpop.f32.mrf.mxu1 }
 0x5ea   : > { %v1578_v57 = vsel %vm1477_vm3, %v1522_v14, -inf }
 0x5eb   : > { %1579 = vmax.xlane.f32.xlu1 %v1578_v57  ;;  %v1568_v58 = vpop.f32.mrf.mxu1 }
 0x5ec   : > { %v1569_v59 = vadd.f32 %v1568_v58, %v5205_v55 }
 0x5ed   : > { %v3766_v61 = vpop.f32.mrf.mxu1 }
 0x5ee   : > { %v1581_v62 = vsel %vm1477_vm3, %v1569_v59, -inf }
 0x5ef   : > { %1582 = vmax.xlane.f32.xlu0 %v1581_v62  ;;  %v1571_v63 = vpop.f32.mrf.mxu1 }
 0x5f0   : > { %v1572_v0 = vadd.f32 %v1571_v63, %v5209_v60 }
 0x5f1   : > { %v3767_v1 = vpop.f32.mrf.mxu1 }
 0x5f2   : > { %v1584_v2 = vsel %vm1477_vm3, %v1572_v0, -inf }
 0x5f3   : > { %1585 = vmax.xlane.f32.xlu0 %v1584_v2 }
 0x670   : > { %v1577_v4 = vpop.xlane.xlu0 %1576 }
 0x671   : > { %v1587_v6 = vsub.f32 %v1519_v50, %v1577_v4 }
 0x673   : > { %v1591_v7 = vmul.f32 1.442695, %v1587_v6 }
 0x674   : > { %v1580_v8 = vpop.xlane.xlu1 %1579 }
 0x675   : > { %4146 = vpow2.f32 %v1591_v7  ;;  %v1588_v9 = vsub.f32 %v1522_v14, %v1580_v8 }
 0x677   : > { %v1593_v10 = vmul.f32 1.442695, %v1588_v9 }
 0x678   : > { %v1583_v11 = vpop.xlane.xlu0 %1582 }
 0x679   : > { %4148 = vpow2.f32 %v1593_v10  ;;  %v1589_v12 = vsub.f32 %v1569_v59, %v1583_v11 }
 0x67b   : > { %v1595_v17 = vmul.f32 1.442695, %v1589_v12 }
 0x67c   : > { %v1586_v27 = vpop.xlane.xlu0 %1585 }
 0x67d   : > { %4150 = vpow2.f32 %v1595_v17  ;;  %v1590_v28 = vsub.f32 %v1572_v0, %v1586_v27 }
 0x67f   : > { %v1597_v29 = vmul.f32 1.442695, %v1590_v28 }
 0x681   : > { %4152 = vpow2.f32 %v1597_v29 }
 0x682   : > { %v4147_v19 = vpop.eup %4146 }
 0x683   : > { %v1599_v20 = vsel %vm1477_vm3, %v4147_v19, 0.0 }
 0x684   : > { %1600 = vadd.xlane.f32.xlu0 %v1599_v20 }
 0x686   : > { %v4149_v21 = vpop.eup %4148 }
 0x687   : > { %v1602_v22 = vsel %vm1477_vm3, %v4149_v21, 0.0 }
 0x688   : > { %1603 = vadd.xlane.f32.xlu1 %v1602_v22 }
 0x68a   : > { %v4151_v23 = vpop.eup %4150 }
 0x68b   : > { %v1605_v26 = vsel %vm1477_vm3, %v4151_v23, 0.0 }
 0x68c   : > { %1606 = vadd.xlane.f32.xlu0 %v1605_v26 }
 0x68e   : > { %v4153_v30 = vpop.eup %4152 }
 0x68f   : > { %v1608_v32 = vsel %vm1477_vm3, %v4153_v30, 0.0 }
 0x699   : > { %1764 = vrot.lane.b32.xlu1 %v5175_v40, %s4629_s4 }
 0x6a2   : > { %1712 = vrot.lane.b32.xlu0 %v5171_v33, %s4629_s4 }
 0x6bd   : > { %1609 = vadd.xlane.f32.xlu1 %v1608_v32 }
 0x6ce   : > { %1710 = vrot.lane.b32.xlu1 %v5157_v5, %s4630_s6 }
 0x6d2   : > { %1762 = vrot.lane.b32.xlu1 %v5155_v3, %s4630_s6 }
 0x70d   : > { %v1601_v34 = vpop.xlane.xlu0 %1600 }
 0x70e   : > { %4154 = vrcp.f32 %v1601_v34 }
 0x711   : > { %v1604_v38 = vpop.xlane.xlu1 %1603 }
 0x712   : > { %4156 = vrcp.f32 %v1604_v38 }
 0x715   : > { %v1607_v39 = vpop.xlane.xlu0 %1606  ;;  %v1765_v45 = vpop.permute.xlu1 %1764 }
 0x716   : > { %4158 = vrcp.f32 %v1607_v39  ;;  %v1770_v54 = vsel %vm1477_vm3, %v1765_v45, 0 }
 0x719   : > { %v1713_v42 = vpop.permute.xlu0 %1712 }
 0x71a   : > { %v1718_v44 = vsel %vm1477_vm3, %v1713_v42, 0 }
 0x71b   : > { %v4155_v24 = vpop.eup %4154 }
 0x71c   : > { %v1615_v35 = vmul.f32 %v4155_v24, %v4147_v19 }
 0x71f   : > { %v4157_v25 = vpop.eup %4156 }
 0x720   : > { %v1616_v37 = vmul.f32 %v4157_v25, %v4149_v21 }
 0x722   : > { %v1619_v43 = vpack.c.bf16 %v1616_v37, %v1615_v35 }
 0x723   : > { %v4159_v49 = vpop.eup %4158 }
 0x724   : > { %3771 = vmatmul.mubr.msk.bf16.vlgmr.msra.gmra.mxu0 %vm1477_vm3, %v1619_v43  ;;  %v1617_v52 = vmul.f32 %v4159_v49, %v4151_v23 }
 0x725   : > { %3781 = vmatpush3.bf16.xpose.msra.mxu0 %v1718_v44  ;;  %3782 = vmatprep.mubr.msk.bf16.mxu0 %vm4627_vm2, %v4625_v16 }
 0x726   : > { %3792 = vmatprep.subr.bf16.mxu0 %v4625_v16 }
 0x746   : > { %v1610_v46 = vpop.xlane.xlu1 %1609 }
 0x747   : > { %4160 = vrcp.f32 %v1610_v46 }
 0x74a   : > { %v1711_v48 = vpop.permute.xlu1 %1710 }
 0x74b   : > { %3783 = vmatmul.mubr.msk.bf16.vlgmr.msra.gmra.mxu0 %vm1477_vm3, %v1711_v48 }
 0x74c   : > { %3794 = vmatprep.mubr.msk.bf16.mxu0 %vm4627_vm2, %v4625_v16 }
 0x74e   : > { %v1763_v14 = vpop.permute.xlu1 %1762 }
 0x754   : > { %v4161_v50 = vpop.eup %4160 }
 0x755   : > { %v1618_v53 = vmul.f32 %v4161_v50, %v4153_v30 }
 0x757   : > { %v1620_v13 = vpack.c.bf16 %v1618_v53, %v1617_v52 }
 0x759   : > { %3777 = vmatmul.mubr.msk.bf16.vlgmr.msra.gmra.mxu1 %vm1477_vm3, %v1620_v13 }
 0x75a   : > { %3787 = vmatpush3.bf16.xpose.msra.mxu1 %v1770_v54  ;;  %3788 = vmatprep.mubr.msk.bf16.mxu1 %vm4627_vm2, %v4625_v16 }
 0x75b   : > { %3798 = vmatprep.subr.bf16.mxu1 %v4625_v16 }
 0x761   : > { %3789 = vmatmul.mubr.msk.bf16.vlgmr.msra.gmra.mxu1 %vm1477_vm3, %v1763_v14 }
 0x762   : > { %3800 = vmatprep.mubr.msk.bf16.mxu1 %vm4627_vm2, %v4625_v16 }
 0x7e4   : > { %v5242_v56 = vpop.f32.mrf.mxu0 }
 0x7e6   : > { %v3772_v57 = vpop.f32.mrf.mxu0 }
 0x7e8   : > { %v5244_v58 = vpop.f32.mrf.mxu0 }
 0x7ea   : > { %v3773_v59 = vpop.f32.mrf.mxu0 }
 0x80b   : > { %v1754_v61 = vpop.f32.mrf.mxu0 }
 0x80c   : > { %v1755_v62 = vadd.f32 %v1754_v61, %v5197_v47 }
 0x80d   : > { %v3784_v63 = vpop.f32.mrf.mxu0 }
 0x80e   : > { %v1813_v0 = vsel %vm1477_vm3, %v1755_v62, -inf }
 0x80f   : > { %1814 = vmax.xlane.f32.xlu0 %v1813_v0  ;;  %v1757_v1 = vpop.f32.mrf.mxu0 }
 0x810   : > { %v1758_v2 = vadd.f32 %v1757_v1, %v5200_v51 }
 0x811   : > { %v3785_v4 = vpop.f32.mrf.mxu0 }
 0x812   : > { %v1816_v6 = vsel %vm1477_vm3, %v1758_v2, -inf }
 0x813   : > { %1817 = vmax.xlane.f32.xlu1 %v1816_v6 }
 0x819   : > { %v5250_v7 = vpop.f32.mrf.mxu1 }
 0x81b   : > { %v3778_v8 = vpop.f32.mrf.mxu1 }
 0x81d   : > { %v5252_v9 = vpop.f32.mrf.mxu1 }
 0x81f   : > { %v3779_v10 = vpop.f32.mrf.mxu1 }
 0x821   : > { %v1806_v11 = vpop.f32.mrf.mxu1 }
 0x822   : > { %v1807_v12 = vadd.f32 %v1806_v11, %v5205_v55 }
 0x823   : > { %v3790_v17 = vpop.f32.mrf.mxu1 }
 0x824   : > { %v1819_v19 = vsel %vm1477_vm3, %v1807_v12, -inf }
 0x825   : > { %1820 = vmax.xlane.f32.xlu0 %v1819_v19  ;;  %v1809_v20 = vpop.f32.mrf.mxu1 }
 0x826   : > { %v1810_v21 = vadd.f32 %v1809_v20, %v5209_v60 }
 0x827   : > { %v3791_v22 = vpop.f32.mrf.mxu1 }
 0x828   : > { %v1822_v23 = vsel %vm1477_vm3, %v1810_v21, -inf }
 0x829   : > { %1823 = vmax.xlane.f32.xlu0 %v1822_v23 }
 0x898   : > { %v1815_v26 = vpop.xlane.xlu0 %1814 }
 0x899   : > { %v1825_v27 = vsub.f32 %v1755_v62, %v1815_v26 }
 0x89b   : > { %v1829_v28 = vmul.f32 1.442695, %v1825_v27 }
 0x89c   : > { %v1818_v29 = vpop.xlane.xlu1 %1817 }
 0x89d   : > { %4162 = vpow2.f32 %v1829_v28  ;;  %v1826_v30 = vsub.f32 %v1758_v2, %v1818_v29 }
 0x89f   : > { %v1831_v32 = vmul.f32 1.442695, %v1826_v30 }
 0x8a1   : > { %4164 = vpow2.f32 %v1831_v32 }
 0x8aa   : > { %v4163_v34 = vpop.eup %4162 }
 0x8ab   : > { %v1837_v38 = vsel %vm1477_vm3, %v4163_v34, 0.0 }
 0x8ac   : > { %1838 = vadd.xlane.f32.xlu0 %v1837_v38 }
 0x8ae   : > { %v4165_v39 = vpop.eup %4164  ;;  %v1821_v24 = vpop.xlane.xlu0 %1820 }
 0x8af   : > { %v1827_v25 = vsub.f32 %v1807_v12, %v1821_v24  ;;  %v1840_v35 = vsel %vm1477_vm3, %v4165_v39, 0.0 }
 0x8b0   : > { %1841 = vadd.xlane.f32.xlu1 %v1840_v35 }
 0x8b1   : > { %v1833_v37 = vmul.f32 1.442695, %v1827_v25 }
 0x8b2   : > { %v1824_v44 = vpop.xlane.xlu0 %1823 }
 0x8b3   : > { %4166 = vpow2.f32 %v1833_v37  ;;  %v1828_v45 = vsub.f32 %v1810_v21, %v1824_v44 }
 0x8b5   : > { %v1835_v46 = vmul.f32 1.442695, %v1828_v45 }
 0x8b7   : > { %4168 = vpow2.f32 %v1835_v46 }
 0x8c0   : > { %v4167_v42 = vpop.eup %4166 }
 0x8c1   : > { %1908 = vrot.lane.b32.xlu1 %v5141_v41, %s4630_s6  ;;  %v1843_v43 = vsel %vm1477_vm3, %v4167_v42, 0.0 }
 0x8c2   : > { %1844 = vadd.xlane.f32.xlu0 %v1843_v43 }
 0x8c4   : > { %v4169_v48 = vpop.eup %4168 }
 0x8c5   : > { %1957 = vrot.lane.b32.xlu1 %v5171_v33, %s4631_s30  ;;  %v1846_v49 = vsel %vm1477_vm3, %v4169_v48, 0.0 }
 0x8d8   : > { %1860 = vrot.lane.b32.xlu0 %v5131_v31, %s4630_s6 }
 0x8dc   : > { %1955 = vrot.lane.b32.xlu0 %v5157_v5, %s4632_s11 }
 0x8e9   : > { %1847 = vadd.xlane.f32.xlu1 %v1846_v49 }
 0x8fa   : > { %2008 = vrot.lane.b32.xlu1 %v5175_v40, %s4631_s30 }
 0x8fe   : > { %2006 = vrot.lane.b32.xlu1 %v5155_v3, %s4632_s11 }
 0x935   : > { %v1839_v52 = vpop.xlane.xlu0 %1838 }
 0x939   : > { %v1842_v50 = vpop.xlane.xlu1 %1841 }
 0x93a   : > { %4170 = vrcp.f32 %v1842_v50 }
 0x93b   : > { %4172 = vrcp.f32 %v1839_v52 }
 0x93d   : > { %v1909_v53 = vpop.permute.xlu1 %1908 }
 0x93e   : > { %3799 = vmatpush3.bf16.msra.mxu1 %v1909_v53 }
 0x93f   : > { %3810 = vmatprep.subr.bf16.mxu1 %v4625_v16 }
 0x941   : > { %v1958_v62 = vpop.permute.xlu1 %1957 }
 0x942   : > { %v1963_v0 = vsel %vm1477_vm3, %v1958_v62, 0 }
 0x947   : > { %v4171_v13 = vpop.eup %4170 }
 0x948   : > { %v4173_v14 = vpop.eup %4172  ;;  %v1854_v57 = vmul.f32 %v4171_v13, %v4165_v39 }
 0x949   : > { %v1853_v61 = vmul.f32 %v4173_v14, %v4163_v34 }
 0x94b   : > { %v1845_v54 = vpop.xlane.xlu0 %1844  ;;  %v1857_v63 = vpack.c.bf16 %v1854_v57, %v1853_v61 }
 0x94c   : > { %4174 = vrcp.f32 %v1845_v54 }
 0x94f   : > { %v1861_v59 = vpop.permute.xlu0 %1860 }
 0x950   : > { %3793 = vmatpush3.bf16.msra.mxu0 %v1861_v59 }
 0x951   : > { %3804 = vmatprep.subr.bf16.mxu0 %v4625_v16 }
 0x953   : > { %3795 = vmatmul.mubr.msk.bf16.vlgmr.msra.gmra.mxu0 %vm1477_vm3, %v1857_v63  ;;  %v1956_v1 = vpop.permute.xlu0 %1955 }
 0x954   : > { %3805 = vmatpush3.bf16.xpose.msra.mxu0 %v1963_v0  ;;  %3806 = vmatprep.mubr.msk.bf16.mxu0 %vm4627_vm2, %v4625_v16 }
 0x955   : > { %3816 = vmatprep.subr.bf16.mxu0 %v4625_v16 }
 0x959   : > { %v4175_v4 = vpop.eup %4174 }
 0x95a   : > { %v1855_v8 = vmul.f32 %v4175_v4, %v4167_v42 }
 0x95b   : > { %3807 = vmatmul.mubr.msk.bf16.vlgmr.msra.gmra.mxu0 %vm1477_vm3, %v1956_v1 }
 0x95c   : > { %3818 = vmatprep.mubr.msk.bf16.mxu0 %vm4627_vm2, %v4625_v16 }
 0x972   : > { %v1848_v2 = vpop.xlane.xlu1 %1847 }
 0x973   : > { %4176 = vrcp.f32 %v1848_v2 }
 0x976   : > { %v2009_v11 = vpop.permute.xlu1 %2008 }
 0x977   : > { %v2014_v17 = vsel %vm1477_vm3, %v2009_v11, 0 }
 0x97a   : > { %v2007_v19 = vpop.permute.xlu1 %2006 }
 0x980   : > { %v4177_v6 = vpop.eup %4176 }
 0x981   : > { %v1856_v10 = vmul.f32 %v4177_v6, %v4169_v48 }
 0x983   : > { %v1858_v12 = vpack.c.bf16 %v1856_v10, %v1855_v8 }
 0x985   : > { %3801 = vmatmul.mubr.msk.bf16.vlgmr.msra.gmra.mxu1 %vm1477_vm3, %v1858_v12 }
 0x986   : > { %3811 = vmatpush3.bf16.xpose.msra.mxu1 %v2014_v17  ;;  %3812 = vmatprep.mubr.msk.bf16.mxu1 %vm4627_vm2, %v4625_v16 }
 0x987   : > { %3822 = vmatprep.subr.bf16.mxu1 %v4625_v16 }
 0x98d   : > { %3813 = vmatmul.mubr.msk.bf16.vlgmr.msra.gmra.mxu1 %vm1477_vm3, %v2007_v19 }
 0x98e   : > { %3824 = vmatprep.mubr.msk.bf16.mxu1 %vm4627_vm2, %v4625_v16 }
 0xa13   : > { %v5292_v20 = vpop.f32.mrf.mxu0 }
 0xa15   : > { %v3796_v21 = vpop.f32.mrf.mxu0 }
 0xa17   : > { %v5294_v22 = vpop.f32.mrf.mxu0 }
 0xa18   : > { %v4068_v23 = vpack.i.bf16 %v5294_v22, %v5292_v20 }
 0xa19   : > { %v3797_v26 = vpop.f32.mrf.mxu0 }
 0xa1b   : > { %v1999_v27 = vpop.f32.mrf.mxu0 }
 0xa1c   : > { %v2000_v28 = vadd.f32 %v1999_v27, %v5197_v47 }
 0xa1d   : > { %v3808_v29 = vpop.f32.mrf.mxu0 }
 0xa1e   : > { %v2057_v30 = vsel %vm1477_vm3, %v2000_v28, -inf }
 0xa1f   : > { %2058 = vmax.xlane.f32.xlu0 %v2057_v30  ;;  %v2002_v32 = vpop.f32.mrf.mxu0 }
 0xa20   : > { %v2003_v34 = vadd.f32 %v2002_v32, %v5200_v51 }
 0xa21   : > { %v3809_v38 = vpop.f32.mrf.mxu0 }
 0xa22   : > { %v2060_v39 = vsel %vm1477_vm3, %v2003_v34, -inf }
 0xa23   : > { %2061 = vmax.xlane.f32.xlu1 %v2060_v39 }
 0xa45   : > { %v5302_v24 = vpop.f32.mrf.mxu1 }
 0xa47   : > { %v3802_v25 = vpop.f32.mrf.mxu1 }
 0xa49   : > { %v5304_v35 = vpop.f32.mrf.mxu1 }
 0xa4a   : > { %v4073_v37 = vpack.i.bf16 %v5304_v35, %v5302_v24 }
 0xa4b   : > { %v3803_v42 = vpop.f32.mrf.mxu1 }
 0xa4d   : > { %v2050_v43 = vpop.f32.mrf.mxu1 }
 0xa4e   : > { %v2051_v44 = vadd.f32 %v2050_v43, %v5205_v55 }
 0xa4f   : > { %v3814_v45 = vpop.f32.mrf.mxu1 }
 0xa50   : > { %v2063_v46 = vsel %vm1477_vm3, %v2051_v44, -inf }
 0xa51   : > { %2064 = vmax.xlane.f32.xlu0 %v2063_v46  ;;  %v2053_v48 = vpop.f32.mrf.mxu1 }
 0xa52   : > { %v2054_v49 = vadd.f32 %v2053_v48, %v5209_v60 }
 0xa53   : > { %v3815_v50 = vpop.f32.mrf.mxu1 }
 0xa54   : > { %v2066_v52 = vsel %vm1477_vm3, %v2054_v49, -inf }
 0xa55   : > { %2067 = vmax.xlane.f32.xlu0 %v2066_v52 }
 0xaa8   : > { %v2059_v53 = vpop.xlane.xlu0 %2058 }
 0xaa9   : > { %v2069_v13 = vsub.f32 %v2000_v28, %v2059_v53 }
 0xaab   : > { %v2073_v54 = vmul.f32 1.442695, %v2069_v13 }
 0xaac   : > { %v2062_v14 = vpop.xlane.xlu1 %2061 }
 0xaad   : > { %4178 = vpow2.f32 %v2073_v54  ;;  %v2070_v57 = vsub.f32 %v2003_v34, %v2062_v14 }
 0xaaf   : > { %v2075_v59 = vmul.f32 1.442695, %v2070_v57 }
 0xab1   : > { %4180 = vpow2.f32 %v2075_v59 }
 0xaba   : > { %v4179_v61 = vpop.eup %4178 }
 0xabb   : > { %v2081_v62 = vsel %vm1477_vm3, %v4179_v61, 0.0 }
 0xabc   : > { %2082 = vadd.xlane.f32.xlu0 %v2081_v62 }
 0xabe   : > { %v4181_v63 = vpop.eup %4180 }
 0xabf   : > { %v2084_v0 = vsel %vm1477_vm3, %v4181_v63, 0.0 }
 0xac0   : > { %2085 = vadd.xlane.f32.xlu1 %v2084_v0 }
 0xad1   : > { %2150 = vrot.lane.b32.xlu1 %v5141_v41, %s4632_s11 }
 0xad5   : > { %2199 = vrot.lane.b32.xlu1 %v5171_v33, %s4633_s24 }
 0xada   : > { %v2065_v1 = vpop.xlane.xlu0 %2064 }
 0xadb   : > { %v2071_v2 = vsub.f32 %v2051_v44, %v2065_v1 }
 0xadd   : > { %v2077_v4 = vmul.f32 1.442695, %v2071_v2 }
 0xade   : > { %v2068_v6 = vpop.xlane.xlu0 %2067 }
 0xadf   : > { %4182 = vpow2.f32 %v2077_v4  ;;  %v2072_v8 = vsub.f32 %v2054_v49, %v2068_v6 }
 0xae1   : > { %v2079_v10 = vmul.f32 1.442695, %v2072_v8 }
 0xae3   : > { %4184 = vpow2.f32 %v2079_v10 }
 0xaec   : > { %v4183_v11 = vpop.eup %4182 }
 0xaed   : > { %v2087_v12 = vsel %vm1477_vm3, %v4183_v11, 0.0 }
 0xaee   : > { %2088 = vadd.xlane.f32.xlu0 %v2087_v12 }
 0xaf0   : > { %v4185_v17 = vpop.eup %4184 }
 0xaf1   : > { %v2090_v19 = vsel %vm1477_vm3, %v4185_v17, 0.0 }
 0xaf9   : > { %2091 = vadd.xlane.f32.xlu1 %v2090_v19 }
 0xb04   : > { %2103 = vrot.lane.b32.xlu0 %v5131_v31, %s4632_s11 }
 0xb08   : > { %2197 = vrot.lane.b32.xlu0 %v5157_v5, %s4634_s7 }
 0xb0a   : > { %2250 = vrot.lane.b32.xlu1 %v5175_v40, %s4633_s24 }
 0xb0e   : > { %2248 = vrot.lane.b32.xlu1 %v5155_v3, %s4634_s7 }
 0xb45   : > { %v2083_v26 = vpop.xlane.xlu0 %2082 }
 0xb49   : > { %v2086_v33 = vpop.xlane.xlu1 %2085 }
 0xb4a   : > { %4186 = vrcp.f32 %v2086_v33 }
 0xb4b   : > { %4188 = vrcp.f32 %v2083_v26 }
 0xb4d   : > { %v2151_v21 = vpop.permute.xlu1 %2150 }
 0xb4e   : > { %3823 = vmatpush3.bf16.msra.mxu1 %v2151_v21 }
 0xb4f   : > { %3834 = vmatprep.subr.bf16.mxu1 %v4625_v16 }
 0xb51   : > { %v2200_v34 = vpop.permute.xlu1 %2199 }
 0xb52   : > { %v2205_v3 = vsel %vm1477_vm3, %v2200_v34, 0 }
 0xb57   : > { %v4187_v27 = vpop.eup %4186 }
 0xb58   : > { %v4189_v29 = vpop.eup %4188  ;;  %v2098_v30 = vmul.f32 %v4187_v27, %v4181_v63 }
 0xb59   : > { %v2097_v5 = vmul.f32 %v4189_v29, %v4179_v61 }
 0xb5b   : > { %v2101_v40 = vpack.c.bf16 %v2098_v30, %v2097_v5 }
 0xb77   : > { %v2089_v28 = vpop.xlane.xlu0 %2088 }
 0xb78   : > { %4190 = vrcp.f32 %v2089_v28 }
 0xb7b   : > { %v2104_v32 = vpop.permute.xlu0 %2103 }
 0xb7c   : > { %3817 = vmatpush3.bf16.msra.mxu0 %v2104_v32 }
 0xb7d   : > { %3828 = vmatprep.subr.bf16.mxu0 %v4625_v16 }
 0xb7f   : > { %3819 = vmatmul.mubr.msk.bf16.vlgmr.msra.gmra.mxu0 %vm1477_vm3, %v2101_v40  ;;  %v2198_v39 = vpop.permute.xlu0 %2197 }
 0xb80   : > { %3829 = vmatpush3.bf16.xpose.msra.mxu0 %v2205_v3  ;;  %3830 = vmatprep.mubr.msk.bf16.mxu0 %vm4627_vm2, %v4625_v16 }
 0xb81   : > { %3840 = vmatprep.subr.bf16.mxu0 %v4625_v16 }
 0xb82   : > { %v2092_v38 = vpop.xlane.xlu1 %2091 }
 0xb83   : > { %4192 = vrcp.f32 %v2092_v38 }
 0xb85   : > { %v4191_v25 = vpop.eup %4190 }
 0xb86   : > { %v2099_v43 = vmul.f32 %v4191_v25, %v4183_v11  ;;  %v2251_v45 = vpop.permute.xlu1 %2250 }
 0xb87   : > { %3831 = vmatmul.mubr.msk.bf16.vlgmr.msra.gmra.mxu0 %vm1477_vm3, %v2198_v39  ;;  %v2256_v48 = vsel %vm1477_vm3, %v2251_v45, 0 }
 0xb88   : > { %3842 = vmatprep.mubr.msk.bf16.mxu0 %vm4627_vm2, %v4625_v16 }
 0xb8a   : > { %v2249_v49 = vpop.permute.xlu1 %2248 }
 0xb90   : > { %v4193_v42 = vpop.eup %4192 }
 0xb91   : > { %v2100_v44 = vmul.f32 %v4193_v42, %v4185_v17 }
 0xb93   : > { %v2102_v46 = vpack.c.bf16 %v2100_v44, %v2099_v43 }
 0xb95   : > { %3825 = vmatmul.mubr.msk.bf16.vlgmr.msra.gmra.mxu1 %vm1477_vm3, %v2102_v46 }
 0xb96   : > { %3835 = vmatpush3.bf16.xpose.msra.mxu1 %v2256_v48  ;;  %3836 = vmatprep.mubr.msk.bf16.mxu1 %vm4627_vm2, %v4625_v16 }
 0xb97   : > { %3846 = vmatprep.subr.bf16.mxu1 %v4625_v16 }
 0xb9d   : > { %3837 = vmatmul.mubr.msk.bf16.vlgmr.msra.gmra.mxu1 %vm1477_vm3, %v2249_v49 }
 0xb9e   : > { %3848 = vmatprep.mubr.msk.bf16.mxu1 %vm4627_vm2, %v4625_v16 }
 0xc3f   : > { %v2143_v50 = vpop.f32.mrf.mxu0 }
 0xc41   : > { %v3820_v52 = vpop.f32.mrf.mxu0 }
 0xc43   : > { %v2146_v53 = vpop.f32.mrf.mxu0 }
 0xc44   : > { %v4078_v13 = vpack.i.bf16 %v2146_v53, %v2143_v50 }
 0xc45   : > { %v3821_v54 = vpop.f32.mrf.mxu0 }
 0xc47   : > { %v2241_v14 = vpop.f32.mrf.mxu0 }
 0xc48   : > { %v2242_v57 = vadd.f32 %v2241_v14, %v5197_v47  ;;  %v4114_v14 = vld [vmem:[%s5011_s18 + $0x18] sm:$0xff]  }
 0xc49   : > { %v3832_v59 = vpop.f32.mrf.mxu0 }
 0xc4a   : > { %v2299_v61 = vsel %vm1477_vm3, %v2242_v57, -inf }
 0xc4b   : > { %2300 = vmax.xlane.f32.xlu0 %v2299_v61  ;;  %v2244_v62 = vpop.f32.mrf.mxu0  ;;  %v4116_v61 = vld [vmem:[%s5011_s18 + $0x8] sm:$0xff]  }
 0xc4c   : > { %v2245_v63 = vadd.f32 %v2244_v62, %v5200_v51 }
 0xc4d   : > { %v3833_v0 = vpop.f32.mrf.mxu0 }
 0xc4e   : > { %v2302_v1 = vsel %vm1477_vm3, %v2245_v63, -inf }
 0xc4f   : > { %2303 = vmax.xlane.f32.xlu1 %v2302_v1 }
 0xc55   : > { %v2190_v16 = vpop.f32.mrf.mxu1 }
 0xc57   : > { %v3826_v2 = vpop.f32.mrf.mxu1 }
 0xc59   : > { %v2193_v4 = vpop.f32.mrf.mxu1 }
 0xc5a   : > { %v4083_v6 = vpack.i.bf16 %v2193_v4, %v2190_v16  ;;  %v4117_v16 = vld [vmem:[%s5011_s18] sm:$0xff]  }
 0xc5b   : > { %v3827_v8 = vpop.f32.mrf.mxu1 }
 0xc5d   : > { %v2292_v10 = vpop.f32.mrf.mxu1 }
 0xc5e   : > { %v2293_v11 = vadd.f32 %v2292_v10, %v5205_v55 }
 0xc5f   : > { %v3838_v47 = vpop.f32.mrf.mxu1 }
 0xc60   : > { %v2305_v12 = vsel %vm1477_vm3, %v2293_v11, -inf }
 0xc61   : > { %2306 = vmax.xlane.f32.xlu0 %v2305_v12  ;;  %v2295_v17 = vpop.f32.mrf.mxu1 }
 0xc62   : > { %v2296_v19 = vadd.f32 %v2295_v17, %v5209_v60 }
 0xc63   : > { %v3839_v51 = vpop.f32.mrf.mxu1 }
 0xc64   : > { %v2308_v33 = vsel %vm1477_vm3, %v2296_v19, -inf }
 0xc65   : > { %2309 = vmax.xlane.f32.xlu0 %v2308_v33 }
 0xcd4   : > { %v2301_v21 = vpop.xlane.xlu0 %2300 }
 0xcd5   : > { %v2311_v26 = vsub.f32 %v2242_v57, %v2301_v21  ;;  %v4115_v57 = vld [vmem:[%s5011_s18 + $0x10] sm:$0xff]  }
 0xcd7   : > { %v2315_v27 = vmul.f32 1.442695, %v2311_v26 }
 0xcd8   : > { %v2304_v28 = vpop.xlane.xlu1 %2303 }
 0xcd9   : > { %4194 = vpow2.f32 %v2315_v27  ;;  %v2312_v29 = vsub.f32 %v2245_v63, %v2304_v28 }
 0xcdb   : > { %v2317_v30 = vmul.f32 1.442695, %v2312_v29 }
 0xcdd   : > { %4196 = vpow2.f32 %v2317_v30 }
 0xce6   : > { %v4195_v55 = vpop.eup %4194 }
 0xce7   : > { %v2323_v32 = vsel %vm1477_vm3, %v4195_v55, 0.0 }
 0xce8   : > { %2324 = vadd.xlane.f32.xlu0 %v2323_v32 }
 0xcea   : > { %v4197_v5 = vpop.eup %4196  ;;  %v2307_v34 = vpop.xlane.xlu0 %2306 }
 0xceb   : > { %v2313_v40 = vsub.f32 %v2293_v11, %v2307_v34  ;;  %v2326_v60 = vsel %vm1477_vm3, %v4197_v5, 0.0 }
 0xcec   : > { %2327 = vadd.xlane.f32.xlu1 %v2326_v60 }
 0xced   : > { %v2319_v3 = vmul.f32 1.442695, %v2313_v40 }
 0xcee   : > { %v2310_v38 = vpop.xlane.xlu0 %2309 }
 0xcef   : > { %4198 = vpow2.f32 %v2319_v3  ;;  %v2314_v39 = vsub.f32 %v2296_v19, %v2310_v38 }
 0xcf1   : > { %v2321_v25 = vmul.f32 1.442695, %v2314_v39 }
 0xcf3   : > { %4200 = vpow2.f32 %v2321_v25 }
 0xcfc   : > { %v4199_v42 = vpop.eup %4198 }
 0xcfd   : > { %v2329_v43 = vsel %vm1477_vm3, %v4199_v42, 0.0 }
 0xcfe   : > { %2330 = vadd.xlane.f32.xlu0 %v2329_v43 }
 0xd00   : > { %v4201_v44 = vpop.eup %4200 }
 0xd01   : > { %v2332_v45 = vsel %vm1477_vm3, %v4201_v44, 0.0 }
 0xd02   : > { %2333 = vadd.xlane.f32.xlu1 %v2332_v45 }
 0xd13   : > { %2392 = vrot.lane.b32.xlu1 %v5141_v41, %s4634_s7 }
 0xd14   : > { %2345 = vrot.lane.b32.xlu0 %v5131_v31, %s4634_s7 }
 0xd17   : > { %4069 = vrot.lane.b32.xlu1 %v4068_v23, %s4633_s24 }
 0xd18   : > { %4079 = vrot.lane.b32.xlu0 %v4078_v13, %s4631_s30 }
 0xd1b   : > { %4074 = vrot.lane.b32.xlu1 %v4073_v37, %s4633_s24 }
 0xd1f   : > { %4084 = vrot.lane.b32.xlu1 %v4083_v6, %s4631_s30 }
 0xd71   : > { %v2325_v48 = vpop.xlane.xlu0 %2324 }
 0xd75   : > { %v2328_v46 = vpop.xlane.xlu1 %2327 }
 0xd76   : > { %4202 = vrcp.f32 %v2328_v46 }
 0xd77   : > { %4204 = vrcp.f32 %v2325_v48 }
 0xd83   : > { %v4203_v41 = vpop.eup %4202 }
 0xd84   : > { %v4205_v49 = vpop.eup %4204  ;;  %v2340_v50 = vmul.f32 %v4203_v41, %v4197_v5 }
 0xd85   : > { %v2339_v23 = vmul.f32 %v4205_v49, %v4195_v55 }
 0xd87   : > { %v2331_v31 = vpop.xlane.xlu0 %2330  ;;  %v2343_v24 = vpack.c.bf16 %v2340_v50, %v2339_v23 }
 0xd88   : > { %4206 = vrcp.f32 %v2331_v31 }
 0xd8b   : > { %v2346_v20 = vpop.permute.xlu0 %2345  ;;  %v2334_v22 = vpop.xlane.xlu1 %2333 }
 0xd8c   : > { %4208 = vrcp.f32 %v2334_v22  ;;  %3841 = vmatpush3.bf16.msra.mxu0 %v2346_v20  ;;  %v4234_v22 = vld [vmem:[#allocation2] sm:$0xff] }
 0xd8d   : > { %3852 = vmatprep.subr.bf16.mxu0 %v4114_v14 }
 0xd8f   : > { %3843 = vmatmul.mubr.msk.bf16.vlgmr.msra.gmra.mxu0 %vm1477_vm3, %v2343_v24  ;;  %v2393_v35 = vpop.permute.xlu1 %2392  ;;  %v4080_v17 = vpop.permute.xlu0 %4079 }
 0xd90   : > { %3847 = vmatpush3.bf16.msra.mxu1 %v2393_v35  ;;  %3853 = vmatpush3.bf16.msra.mxu0 %v4114_v14  ;;  %v4082_v33 = vunpack.i.h.bf16 %v4080_v17  ;;  %v4081_v21 = vunpack.i.l.bf16 %v4080_v17  ;;  %v4235_v35 = vld [vmem:[#allocation2 + $0x10] sm:$0xff] }
 0xd91   : > { %3854 = vmatprep.subr.bf16.mxu0 %v4115_v57 }
 0xd93   : > { %v4070_v11 = vpop.permute.xlu1 %4069 }
 0xd94   : > { %3855 = vmatpush3.bf16.msra.mxu0 %v4115_v57  ;;  %v4072_v47 = vunpack.i.h.bf16 %v4070_v11  ;;  %v4071_v12 = vunpack.i.l.bf16 %v4070_v11  ;;  %v4237_v57 = vld [vmem:[#allocation2 + $0x18] sm:$0xff] }
 0xd95   : > { %v4207_v37 = vpop.eup %4206  ;;  %3856 = vmatprep.subr.bf16.mxu0 %v4116_v61 }
 0xd96   : > { %v2341_v53 = vmul.f32 %v4207_v37, %v4199_v42  ;;  %v2488_v19 = vsel %vm1477_vm3, %v5244_v58, %v4072_v47  ;;  %v2487_v51 = vsel %vm1477_vm3, %v5242_v56, %v4071_v12 }
 0xd97   : > { %v2492_v29 = vsel %vm2491_vm6, %v2487_v51, %v4081_v21  ;;  %v2493_v30 = vsel %vm2491_vm6, %v2488_v19, %v4082_v33  ;;  %v4075_v5 = vpop.permute.xlu1 %4074 }
 0xd98   : > { %3857 = vmatpush3.bf16.msra.mxu0 %v4116_v61  ;;  %v4077_v34 = vunpack.i.h.bf16 %v4075_v5  ;;  %v4076_v40 = vunpack.i.l.bf16 %v4075_v5  ;;  %v4121_v5 = vld [vmem:[%s5769_s20 + $0x20] ss:$8 sps:$4 sm:$0xff]  }
 0xd99   : > { %v4209_v52 = vpop.eup %4208  ;;  %3858 = vmatprep.subr.bf16.mxu0 %v4117_v16 }
 0xd9a   : > { %v2342_v13 = vmul.f32 %v4209_v52, %v4201_v44  ;;  %v2490_v39 = vsel %vm1477_vm3, %v5252_v9, %v4077_v34  ;;  %v2489_v25 = vsel %vm1477_vm3, %v5250_v7, %v4076_v40  ;;  %v3619_v9 = vld [vmem:[%s5768_s10] ss:$0 sm:$0xff]  ;;  %v4129_v34 = vld [vmem:[%s5769_s20 + $0x4] ss:$8 sps:$4 sm:$0xff]  }
 0xd9b   : > { %v4085_v56 = vpop.permute.xlu1 %4084  ;;  %v4127_v40 = vld [vmem:[%s5769_s20] ss:$8 sps:$4 sm:$0xff]  }
 0xd9c   : > { %v2344_v54 = vpack.c.bf16 %v2342_v13, %v2341_v53  ;;  %3859 = vmatpush3.bf16.msra.mxu0 %v4117_v16  ;;  %v4087_v60 = vunpack.i.h.bf16 %v4085_v56  ;;  %v4086_v3 = vunpack.i.l.bf16 %v4085_v56  ;;  %v4124_v56 = vld [vmem:[%s5769_s20 + $0x10] ss:$8 sps:$4 sm:$0xff]  }
 0xd9e   : > { %3849 = vmatmul.mubr.msk.bf16.vlgmr.msra.gmra.mxu1 %vm1477_vm3, %v2344_v54  ;;  %v2494_v44 = vsel %vm2491_vm6, %v2489_v25, %v4086_v3  ;;  %v2495_v45 = vsel %vm2491_vm6, %v2490_v39, %v4087_v60  ;;  %v4236_v54 = vld [vmem:[#allocation2 + $0x8] sm:$0xff] }
 0xd9f   : > { %2775 = vmatprep.mubr.bf16.mxu1 %v4624_v36 }
 0xe4f   : > { %v2385_v59 = vpop.f32.mrf.mxu0 }
 0xe51   : > { %v3844_v62 = vpop.f32.mrf.mxu0 }
 0xe53   : > { %v2388_v63 = vpop.f32.mrf.mxu0 }
 0xe54   : > { %v4088_v0 = vpack.i.bf16 %v2388_v63, %v2385_v59 }
 0xe55   : > { %v3845_v1 = vpop.f32.mrf.mxu0 }
 0xe56   : > { %4089 = vrot.lane.b32.xlu0 %v4088_v0, %s4629_s4 }
 0xe5e   : > { %v2432_v2 = vpop.f32.mrf.mxu1 }
 0xe60   : > { %v3850_v4 = vpop.f32.mrf.mxu1 }
 0xe62   : > { %v2435_v6 = vpop.f32.mrf.mxu1 }
 0xe63   : > { %v4093_v8 = vpack.i.bf16 %v2435_v6, %v2432_v2 }
 0xe64   : > { %v3851_v10 = vpop.f32.mrf.mxu1 }
 0xe65   : > { %4094 = vrot.lane.b32.xlu1 %v4093_v8, %s4629_s4 }
 0xec8   : > { %v4090_v26 = vpop.permute.xlu0 %4089 }
 0xec9   : > { %v4092_v27 = vunpack.i.h.bf16 %v4090_v26  ;;  %v4091_v28 = vunpack.i.l.bf16 %v4090_v26 }
 0xecb   : > { %v2497_v55 = vsel %vm2496_vm7, %v2492_v29, %v4091_v28  ;;  %v2498_v32 = vsel %vm2496_vm7, %v2493_v30, %v4092_v27  ;;  %v4120_v30 = vld [vmem:[%s5769_s20 + $0x34] ss:$8 sps:$4 sm:$0xff]  }
 0xecc   : > { %v2501_v58 = vpack.c.bf16 %v2498_v32, %v2497_v55  ;;  %v4118_v55 = vld [vmem:[%s5769_s20 + $0x30] ss:$8 sps:$4 sm:$0xff]   ;;  %2751 = vmatprep.subr.bf16.mxu1 %v4120_v30  ;;  %v4123_v32 = vld [vmem:[%s5769_s20 + $0x24] ss:$8 sps:$4 sm:$0xff]  }
 0xecd   : > { %2752 = vmatpush1.bf16.msra.mxu1 %v4118_v55 }
 0xece   : > { %3860 = vmatprep.mubr.msk.bf16.mxu0 %vm1040_vm1, %v2501_v58  ;;  %2753 = vmatprep.subr.bf16.mxu1 %v4123_v32  ;;  %v4126_v58 = vld [vmem:[%s5769_s20 + $0x14] ss:$8 sps:$4 sm:$0xff]  }
 0xed1   : > { %2754 = vmatpush1.bf16.msra.mxu1 %v4121_v5 }
 0xed2   : > { %2755 = vmatprep.subr.bf16.mxu1 %v4126_v58 }
 0xed5   : > { %2756 = vmatpush1.bf16.msra.mxu1 %v4124_v56 }
 0xed6   : > { %2757 = vmatprep.subr.bf16.mxu1 %v4129_v34 }
 0xed7   : > { %v4095_v38 = vpop.permute.xlu1 %4094 }
 0xed8   : > { %v4097_v42 = vunpack.i.h.bf16 %v4095_v38  ;;  %v4096_v43 = vunpack.i.l.bf16 %v4095_v38 }
 0xed9   : > { %2758 = vmatpush1.bf16.msra.mxu1 %v4127_v40 }
 0xeda   : > { %v2499_v46 = vsel %vm2496_vm7, %v2494_v44, %v4096_v43  ;;  %v2500_v48 = vsel %vm2496_vm7, %v2495_v45, %v4097_v42 }
 0xedb   : > { %v2502_v41 = vpack.c.bf16 %v2500_v48, %v2499_v46 }
 0xedd   : > { %3861 = vmatmul.mubr.msk.bf16.vlgmr.msra.gmra.mxu0 %vm1040_vm1, %v2502_v41 }
 0xf9d   : > { %v3862_v31 = vpop.f32.mrf.mxu0 }
 0xf9e   : > { %v2591_v49 = vadd.f32 %v3862_v31, %v3619_v9 }
 0xf9f   : > { %v2582_v7 = vpop.f32.mrf.mxu0 }
 0xfa0   : > { %v2583_v50 = vadd.f32 %v3619_v9, %v2582_v7  ;;  %v5406_v37 = vadd.f32 %v4235_v35, %v2591_v49  ;;  %v3626_v7 = vld [vmem:[%s1003_s27] ss:$0 sm:$0xff] }
 0xfa1   : > { %v3863_v20 = vpop.f32.mrf.mxu0 }
 0xfa2   : > { %v5404_v23 = vadd.f32 %v4234_v22, %v2583_v50  ;;  %v2594_v52 = vadd.f32 %v3863_v20, %v3619_v9  ;;  %v2609_v62 = vsel %vm1040_vm1, %v5406_v37, 0.0 }
 0xfa3   : > { %v2585_v24 = vpop.f32.mrf.mxu0 }
 0xfa4   : > { %v2586_v53 = vadd.f32 %v3619_v9, %v2585_v24  ;;  %v2603_v13 = vsel %vm1040_vm1, %v5404_v23, 0.0  ;;  %v5412_v59 = vadd.f32 %v4237_v57, %v2594_v52  ;;  %v3627_v24 = vld [vmem:[%s1006_s5] ss:$0 sm:$0xff] }
 0xfa5   : > { %2604 = vadd.xlane.f32.xlu0 %v2603_v13 }
 0xfa6   : > { %v5410_v14 = vadd.f32 %v4236_v54, %v2586_v53  ;;  %v2612_v63 = vsel %vm1040_vm1, %v5412_v59, 0.0 }
 0xfa8   : > { %v2606_v61 = vsel %vm1040_vm1, %v5410_v14, 0.0 }
 0xfa9   : > { %2607 = vadd.xlane.f32.xlu1 %v2606_v61  ;;  %2610 = vadd.xlane.f32.xlu0 %v2609_v62 }
 0xfad   : > { %2613 = vadd.xlane.f32.xlu0 %v2612_v63 }
0x102e   : > { %v2605_v0 = vpop.xlane.xlu0 %2604 }
0x102f   : > { %v2615_v1 = vmul.f32 0.015625, %v2605_v0 }
0x1031   : > { %v2619_v16 = vsub.f32 %v5404_v23, %v2615_v1 }
0x1032   : > { %v2608_v2 = vpop.xlane.xlu1 %2607  ;;  %v2611_v4 = vpop.xlane.xlu0 %2610 }
0x1033   : > { %v2616_v6 = vmul.f32 0.015625, %v2608_v2  ;;  %v2617_v8 = vmul.f32 0.015625, %v2611_v4  ;;  %v2623_v10 = vmul.f32 %v2619_v16, %v2619_v16  ;;  %v4130_v2 = vld [vmem:[%s5073_s23 + $0x38] sm:$0xff]   ;;  %v4131_v4 = vld [vmem:[%s5073_s23 + $0x30] sm:$0xff]  }
0x1034   : > { %3864 = vmatprep.subr.bf16.mxu0 %v4130_v2 }
0x1035   : > { %v2620_v11 = vsub.f32 %v5410_v14, %v2616_v6  ;;  %v2621_v47 = vsub.f32 %v5406_v37, %v2617_v8  ;;  %v2627_v12 = vsel %vm1040_vm1, %v2623_v10, 0.0  ;;  %3865 = vmatpush3.bf16.msra.mxu0 %v4130_v2  ;;  %v4132_v6 = vld [vmem:[%s5073_s23 + $0x28] sm:$0xff]   ;;  %v4134_v8 = vld [vmem:[%s5073_s23 + $0x18] sm:$0xff]   ;;  %v4135_v10 = vld [vmem:[%s5073_s23 + $0x10] sm:$0xff]  }
0x1036   : > { %2628 = vadd.xlane.f32.xlu0 %v2627_v12  ;;  %v2614_v17 = vpop.xlane.xlu0 %2613  ;;  %3866 = vmatprep.subr.bf16.mxu0 %v4131_v4  ;;  %v5458_v12 = vld [vmem:[%s5068_s25] sm:$0x3] }
0x1037   : > { %v2618_v19 = vmul.f32 0.015625, %v2614_v17  ;;  %v2624_v51 = vmul.f32 %v2620_v11, %v2620_v11  ;;  %v2625_v33 = vmul.f32 %v2621_v47, %v2621_v47  ;;  %v2694_v17 = vrot.slane %v5458_v12, %v5121_v18 }
0x1039   : > { %v2622_v21 = vsub.f32 %v5412_v59, %v2618_v19  ;;  %v2630_v26 = vsel %vm1040_vm1, %v2624_v51, 0.0  ;;  %v2633_v27 = vsel %vm1040_vm1, %v2625_v33, 0.0  ;;  %3867 = vmatpush3.bf16.msra.mxu0 %v4131_v4 }
0x103a   : > { %2631 = vadd.xlane.f32.xlu1 %v2630_v26  ;;  %2634 = vadd.xlane.f32.xlu0 %v2633_v27 }
0x103b   : > { %v2626_v28 = vmul.f32 %v2622_v21, %v2622_v21  ;;  %3868 = vmatprep.subr.bf16.mxu0 %v4132_v6 }
0x103d   : > { %v2636_v29 = vsel %vm1040_vm1, %v2626_v28, 0.0  ;;  %3869 = vmatpush3.bf16.msra.mxu0 %v4132_v6 }
0x103e   : > { %2637 = vadd.xlane.f32.xlu1 %v2636_v29 }
0x10bf   : > { %v2629_v60 = vpop.xlane.xlu0 %2628 }
0x10c0   : > { %v2639_v3 = vmul.f32 0.015625, %v2629_v60 }
0x10c2   : > { %v2643_v38 = vadd.f32 1e-05, %v2639_v3 }
0x10c3   : > { %v2632_v39 = vpop.xlane.xlu1 %2631  ;;  %v2635_v25 = vpop.xlane.xlu0 %2634 }
0x10c4   : > { %4210 = vrsqrt.f32 %v2643_v38  ;;  %v2640_v42 = vmul.f32 0.015625, %v2632_v39  ;;  %v2641_v43 = vmul.f32 0.015625, %v2635_v25 }
0x10c6   : > { %v2644_v44 = vadd.f32 1e-05, %v2640_v42  ;;  %v2645_v45 = vadd.f32 1e-05, %v2641_v43 }
0x10c7   : > { %v2638_v46 = vpop.xlane.xlu1 %2637 }
0x10c8   : > { %4212 = vrsqrt.f32 %v2644_v44  ;;  %v2642_v48 = vmul.f32 0.015625, %v2638_v46 }
0x10c9   : > { %4214 = vrsqrt.f32 %v2645_v45 }
0x10ca   : > { %v2646_v41 = vadd.f32 1e-05, %v2642_v48 }
0x10cc   : > { %4216 = vrsqrt.f32 %v2646_v41 }
0x10d1   : > { %v4211_v31 = vpop.eup %4210 }
0x10d2   : > { %v2651_v9 = vmul.f32 %v4211_v31, %v2619_v16 }
0x10d4   : > { %v2661_v20 = vmul.f32 %v3626_v7, %v2651_v9 }
0x10d5   : > { %v4213_v49 = vpop.eup %4212 }
0x10d6   : > { %v2652_v50 = vmul.f32 %v4213_v49, %v2620_v11  ;;  %v4215_v22 = vpop.eup %4214  ;;  %v2671_v53 = vadd.f32 %v3627_v24, %v2661_v20  ;;  %v4136_v11 = vld [vmem:[%s5073_s23 + $0x8] sm:$0xff]  }
0x10d7   : > { %v2653_v54 = vmul.f32 %v4215_v22, %v2621_v47  ;;  %v4137_v47 = vld [vmem:[%s5073_s23] sm:$0xff]  }
0x10d8   : > { %v2662_v35 = vmul.f32 %v3626_v7, %v2652_v50 }
0x10d9   : > { %v4217_v52 = vpop.eup %4216  ;;  %v2663_v63 = vmul.f32 %v3626_v7, %v2653_v54 }
0x10da   : > { %v2672_v13 = vadd.f32 %v3627_v24, %v2662_v35  ;;  %v2654_v57 = vmul.f32 %v4217_v52, %v2622_v21 }
0x10db   : > { %v2673_v1 = vadd.f32 %v3627_v24, %v2663_v63 }
0x10dc   : > { %v2675_v61 = vpack.c.bf16 %v2672_v13, %v2671_v53  ;;  %v2664_v62 = vmul.f32 %v3626_v7, %v2654_v57 }
0x10de   : > { %3636 = vmatmul.mubr.msk.bf16.vlgmr.msra.gmra.mxu1 %vm1040_vm1, %v2675_v61  ;;  %v2674_v0 = vadd.f32 %v3627_v24, %v2664_v62 }
0x10df   : > { %2785 = vmatprep.mubr.bf16.mxu1 %v4624_v36  ;;  %v4133_v36 = vld [vmem:[%s5073_s23 + $0x20] sm:$0xff]  }
0x10e0   : > { %v2676_v16 = vpack.c.bf16 %v2674_v0, %v2673_v1  ;;  %3870 = vmatprep.subr.bf16.mxu0 %v4133_v36 }
0x10e1   : > { %3871 = vmatpush3.bf16.msra.mxu0 %v4133_v36 }
0x10e2   : > { %3872 = vmatprep.subr.bf16.mxu0 %v4134_v8 }
0x10e5   : > { %3873 = vmatpush3.bf16.msra.mxu0 %v4134_v8 }
0x10e6   : > { %3637 = vmatmul.mubr.msk.bf16.gmra.mxu1 %vm1040_vm1, %v2676_v16  ;;  %3874 = vmatprep.subr.bf16.mxu0 %v4135_v10 }
0x10e9   : > { %3875 = vmatpush3.bf16.msra.mxu0 %v4135_v10 }
0x10ea   : > { %3876 = vmatprep.subr.bf16.mxu0 %v4136_v11 }
0x10ed   : > { %3877 = vmatpush3.bf16.msra.mxu0 %v4136_v11 }
0x10ee   : > { %3878 = vmatprep.subr.bf16.mxu0 %v4137_v47 }
0x10f1   : > { %3879 = vmatpush3.bf16.msra.mxu0 %v4137_v47 }
0x119e   : > { %v5462_v19 = vpop.f32.mrf.mxu1 }
0x11a0   : > { %v2779_v51 = vpop.f32.mrf.mxu1 }
0x11a1   : > { %v5464_v33 = vadd.f32 %v2779_v51, %v2694_v17 }
0x11a2   : > { %v5466_v21 = vpop.f32.mrf.mxu1 }
0x11a3   : > { %v5469_v26 = vmul.f32 0.70710677, %v5464_v33 }
0x11a4   : > { %v2783_v27 = vpop.f32.mrf.mxu1 }
0x11a5   : > { %v2812_v28 = vand.u32 2147483647, %v5469_v26  ;;  %v5472_v29 = vadd.f32 %v2783_v27, %v2694_v17  ;;  %vm2804_vm8 = vcmp.ge.f32.partialorder %v5469_v26, 0.0 }
0x11a6   : > { %v5474_v30 = vpop.f32.mrf.mxu1 }
0x11a7   : > { %v2816_v55 = vmul.f32 0.3275911, %v2812_v28  ;;  %v5477_v32 = vmul.f32 0.70710677, %v5472_v29  ;;  %v2868_v45 = vsub.f32 0.0, %v2812_v28 }
0x11a8   : > { %v2789_v5 = vpop.f32.mrf.mxu1 }
0x11a9   : > { %v2820_v58 = vadd.f32 1.0, %v2816_v55  ;;  %v2813_v56 = vand.u32 2147483647, %v5477_v32  ;;  %v5480_v34 = vadd.f32 %v2789_v5, %v2694_v17  ;;  %v2872_v31 = vmul.f32 %v2868_v45, %v2812_v28 }
0x11aa   : > { %v5482_v40 = vpop.f32.mrf.mxu1  ;;  %vm2805_vm9 = vcmp.ge.f32.partialorder %v5477_v32, 0.0 }
0x11ab   : > { %4218 = vrcp.f32 %v2820_v58  ;;  %v2817_v60 = vmul.f32 0.3275911, %v2813_v56  ;;  %v5485_v3 = vmul.f32 0.70710677, %v5480_v34  ;;  %v2869_v9 = vsub.f32 0.0, %v2813_v56 }
0x11ac   : > { %v2793_v38 = vpop.f32.mrf.mxu1  ;;  %v2876_v20 = vmul.f32 1.442695, %v2872_v31 }
0x11ad   : > { %v2821_v39 = vadd.f32 1.0, %v2817_v60  ;;  %v5487_v25 = vadd.f32 %v2793_v38, %v2694_v17  ;;  %v2814_v42 = vand.u32 2147483647, %v5485_v3  ;;  %v2873_v22 = vmul.f32 %v2869_v9, %v2813_v56 }
0x11ae   : > { %vm2806_vm10 = vcmp.ge.f32.partialorder %v5485_v3, 0.0 }
0x11af   : > { %4220 = vrcp.f32 %v2821_v39  ;;  %v2818_v43 = vmul.f32 0.3275911, %v2814_v42  ;;  %v5491_v44 = vmul.f32 0.70710677, %v5487_v25  ;;  %v2870_v24 = vsub.f32 0.0, %v2814_v42 }
0x11b0   : > { %v2878_v54 = vmul.f32 1.442695, %v2873_v22 }
0x11b1   : > { %v2822_v46 = vadd.f32 1.0, %v2818_v43  ;;  %v2815_v48 = vand.u32 2147483647, %v5491_v44  ;;  %v2874_v57 = vmul.f32 %v2870_v24, %v2814_v42  ;;  %vm2807_vm11 = vcmp.ge.f32.partialorder %v5491_v44, 0.0 }
0x11b3   : > { %4222 = vrcp.f32 %v2822_v46  ;;  %v2819_v41 = vmul.f32 0.3275911, %v2815_v48  ;;  %v2871_v61 = vsub.f32 0.0, %v2815_v48  ;;  %v2880_v4 = vmul.f32 1.442695, %v2874_v57 }
0x11b5   : > { %v2823_v7 = vadd.f32 1.0, %v2819_v41  ;;  %v2875_v6 = vmul.f32 %v2871_v61, %v2815_v48 }
0x11b7   : > { %4224 = vrcp.f32 %v2823_v7  ;;  %v2882_v28 = vmul.f32 1.442695, %v2875_v6  ;;  %v2797_v6 = vmul.f32 0.5, %v5472_v29 }
0x11b8   : > { %v4219_v49 = vpop.eup %4218  ;;  %4226 = vpow2.f32 %v2876_v20 }
0x11b9   : > { %v2832_v50 = vmul.f32 1.0614054, %v4219_v49  ;;  %4228 = vpow2.f32 %v2878_v54 }
0x11ba   : > { %4230 = vpow2.f32 %v2880_v4 }
0x11bb   : > { %v2836_v35 = vadd.f32 -1.4531521, %v2832_v50  ;;  %4232 = vpow2.f32 %v2882_v28  ;;  %v4635_v50 = vmov -1.0  }
0x11bc   : > { %v4221_v52 = vpop.eup %4220  ;;  %v2808_v20 = vsel %vm2804_vm8, 1.0, %v4635_v50  ;;  %v2809_v26 = vsel %vm2805_vm9, 1.0, %v4635_v50  ;;  %v2811_v29 = vsel %vm2807_vm11, 1.0, %v4635_v50 }
0x11bd   : > { %v2840_v53 = vmul.f32 %v4219_v49, %v2836_v35  ;;  %v2833_v13 = vmul.f32 1.0614054, %v4221_v52 }
0x11bf   : > { %v2844_v62 = vadd.f32 1.4214138, %v2840_v53  ;;  %v2837_v63 = vadd.f32 -1.4531521, %v2833_v13 }
0x11c0   : > { %v4223_v0 = vpop.eup %4222 }
0x11c1   : > { %v2848_v1 = vmul.f32 %v4219_v49, %v2844_v62  ;;  %v2841_v16 = vmul.f32 %v4221_v52, %v2837_v63  ;;  %v2834_v2 = vmul.f32 1.0614054, %v4223_v0 }
0x11c3   : > { %v2852_v36 = vadd.f32 -0.28449672, %v2848_v1  ;;  %v2845_v8 = vadd.f32 1.4214138, %v2841_v16  ;;  %v2838_v10 = vadd.f32 -1.4531521, %v2834_v2 }
0x11c4   : > { %v4225_v11 = vpop.eup %4224  ;;  %v2796_v1 = vmul.f32 0.5, %v5464_v33 }
0x11c5   : > { %v2856_v47 = vmul.f32 %v4219_v49, %v2852_v36  ;;  %v2849_v17 = vmul.f32 %v4221_v52, %v2845_v8  ;;  %v2842_v51 = vmul.f32 %v4223_v0, %v2838_v10  ;;  %v2835_v27 = vmul.f32 1.0614054, %v4225_v11  ;;  %v4227_v39 = vpop.eup %4226 }
0x11c6   : > { %v4229_v7 = vpop.eup %4228 }
0x11c7   : > { %v2860_v55 = vadd.f32 0.2548296, %v2856_v47  ;;  %v2853_v5 = vadd.f32 -0.28449672, %v2849_v17  ;;  %v2846_v58 = vadd.f32 1.4214138, %v2842_v51  ;;  %v4231_v63 = vpop.eup %4230 }
0x11c8   : > { %v2839_v56 = vadd.f32 -1.4531521, %v2835_v27  ;;  %v4233_v47 = vpop.eup %4232 }
0x11c9   : > { %v2864_v60 = vmul.f32 %v4219_v49, %v2860_v55  ;;  %v2857_v38 = vmul.f32 %v4221_v52, %v2853_v5  ;;  %v2850_v42 = vmul.f32 %v4223_v0, %v2846_v58 }
0x11ca   : > { %v2843_v43 = vmul.f32 %v4225_v11, %v2839_v56 }
0x11cb   : > { %v2884_v45 = vmul.f32 %v4227_v39, %v2864_v60  ;;  %v2861_v46 = vadd.f32 0.2548296, %v2857_v38  ;;  %v2854_v48 = vadd.f32 -0.28449672, %v2850_v42 }
0x11cc   : > { %v2847_v41 = vadd.f32 1.4214138, %v2843_v43 }
0x11cd   : > { %v2888_v31 = vsub.f32 1.0, %v2884_v45  ;;  %v2865_v9 = vmul.f32 %v4221_v52, %v2861_v46  ;;  %v2858_v22 = vmul.f32 %v4223_v0, %v2854_v48  ;;  %v2690_v52 = vrot.slane %v5458_v12, %v5115_v15 }
0x11ce   : > { %v2851_v24 = vmul.f32 %v4225_v11, %v2847_v41  ;;  %v2810_v12 = vsel %vm2806_vm10, 1.0, %v4635_v50 }
0x11cf   : > { %v2892_v35 = vmul.f32 %v2888_v31, %v2808_v20  ;;  %v2885_v49 = vmul.f32 %v4229_v7, %v2865_v9  ;;  %v2862_v53 = vadd.f32 0.2548296, %v2858_v22  ;;  %v2782_v17 = vadd.f32 %v5466_v21, %v2690_v52 }
0x11d0   : > { %v2855_v13 = vadd.f32 -0.28449672, %v2851_v24  ;;  %v2799_v21 = vmul.f32 0.5, %v5487_v25  ;;  %v2788_v38 = vadd.f32 %v5474_v30, %v2690_v52  ;;  %v2792_v44 = vadd.f32 %v5482_v40, %v2690_v52 }
0x11d1   : > { %v2896_v54 = vadd.f32 1.0, %v2892_v35  ;;  %v2889_v57 = vsub.f32 1.0, %v2885_v49  ;;  %v2866_v61 = vmul.f32 %v4223_v0, %v2862_v53  ;;  %v2778_v0 = vadd.f32 %v5462_v19, %v2690_v52 }
0x11d2   : > { %v2859_v62 = vmul.f32 %v4225_v11, %v2855_v13 }
0x11d3   : > { %v2893_v16 = vmul.f32 %v2889_v57, %v2809_v26  ;;  %v2886_v2 = vmul.f32 %v4231_v63, %v2866_v61  ;;  %v2900_v32 = vmul.f32 %v2896_v54, %v2796_v1 }
0x11d4   : > { %v2863_v4 = vadd.f32 0.2548296, %v2859_v62 }
0x11d5   : > { %v2897_v36 = vadd.f32 1.0, %v2893_v16  ;;  %v2890_v8 = vsub.f32 1.0, %v2886_v2  ;;  %v2904_v3 = vmul.f32 %v2900_v32, %v2778_v0 }
0x11d6   : > { %v2867_v10 = vmul.f32 %v4225_v11, %v2863_v4  ;;  %v2798_v11 = vmul.f32 0.5, %v5480_v34  ;;  %v3638_v34 = vld [vmem:[%s1018_s19] ss:$0 sm:$0xff]  ;;  %s5773_s19 = sld [smem:[#allocation29_spill]] }
0x11d7   : > { %v2901_v51 = vmul.f32 %v2897_v36, %v2797_v6  ;;  %v2894_v27 = vmul.f32 %v2890_v8, %v2810_v12 }
0x11d8   : > { %v2887_v33 = vmul.f32 %v4233_v47, %v2867_v10 }
0x11d9   : > { %v2905_v28 = vmul.f32 %v2901_v51, %v2782_v17  ;;  %v2898_v55 = vadd.f32 1.0, %v2894_v27 }
0x11da   : > { %v2891_v5 = vsub.f32 1.0, %v2887_v33 }
0x11db   : > { %v2908_v58 = vpack.c.bf16 %v2905_v28, %v2904_v3  ;;  %v2902_v19 = vmul.f32 %v2898_v55, %v2798_v11 }
0x11dc   : > { %v2895_v56 = vmul.f32 %v2891_v5, %v2811_v29  ;;  %p3647_p10 = scmp.ne.s32.totalorder %s5773_s19, 1 }
0x11dd   : > { %3880 = vmatprep.mubr.bf16.mxu0 %v2908_v58  ;;  %v2906_v42 = vmul.f32 %v2902_v19, %v2788_v38  ;;  %s5774_s22 = sld [smem:[#allocation58_spill]] (!%p3647_p10) }
0x11de   : > { %v2899_v60 = vadd.f32 1.0, %v2895_v56  ;;  %s5775_s15 = sld [smem:[#allocation59_spill]] (!%p3647_p10) }
0x11df   : > { %s5776_s3 = sld [smem:[#allocation61_spill]] (!%p3647_p10) }
0x11e0   : > { %v2903_v39 = vmul.f32 %v2899_v60, %v2799_v21 }
0x11e2   : > { %v2907_v43 = vmul.f32 %v2903_v39, %v2792_v44 }
0x11e4   : > { %v2909_v45 = vpack.c.bf16 %v2907_v43, %v2906_v42 }
0x11e6   : > { %3881 = vmatmul.mubr.bf16.vlgmr.msra.gmra.mxu0 %v2909_v45 }
0x12a6   : > { %v3882_v46 = vpop.f32.mrf.mxu0 }
0x12a7   : > { %v3024_v48 = vadd.f32 %v3882_v46, %v3638_v34 }
0x12a8   : > { %v3015_v41 = vpop.f32.mrf.mxu0 }
0x12a9   : > { %v3032_v25 = vadd.f32 %v3024_v48, %v5406_v37  ;;  %v3016_v31 = vadd.f32 %v3638_v34, %v3015_v41 }
0x12aa   : > { %v3883_v9 = vpop.f32.mrf.mxu0 }
0x12ab   : > { %3036 = vst.msk [vmem:[#allocation2 + $0x10] sm:$0xff] %vm1040_vm1, %v3032_v25  ;;  %v3030_v30 = vadd.f32 %v3016_v31, %v5404_v23  ;;  %v3027_v40 = vadd.f32 %v3883_v9, %v3638_v34 }
0x12ac   : > { %v3018_v7 = vpop.f32.mrf.mxu0 }
0x12ad   : > { %3034 = vst.msk [vmem:[#allocation2] sm:$0xff] %vm1040_vm1, %v3030_v30  ;;  %v3033_v50 = vadd.f32 %v3027_v40, %v5412_v59  ;;  %v3019_v20 = vadd.f32 %v3638_v34, %v3018_v7  ;;  %3041 = sbr.rel (%p3647_p10) target bundleno = 5306 (0x14ba), region = 144 }
0x12af   : > { %3037 = vst.msk [vmem:[#allocation2 + $0x18] sm:$0xff] %vm1040_vm1, %v3033_v50  ;;  %v3031_v22 = vadd.f32 %v3019_v20, %v5410_v14 }
0x12b1   : > { %3035 = vst.msk [vmem:[#allocation2 + $0x8] sm:$0xff] %vm1040_vm1, %v3031_v22 }
0x12b2   : > { %v3044_v37 = vsel %vm1040_vm1, %v3030_v30, 0.0  ;;  %v3050_v23 = vsel %vm1040_vm1, %v3032_v25, 0.0  ;;  %v3047_v24 = vsel %vm1040_vm1, %v3031_v22, 0.0  ;;  %v3053_v59 = vsel %vm1040_vm1, %v3033_v50, 0.0  ;;  %v4238_v10 = vld [vmem:[#allocation15 + $0x34] ss:$8 sps:$4 sm:$0xff]  }
0x12b3   : > { %3045 = vadd.xlane.f32.xlu0 %v3044_v37  ;;  %3051 = vadd.xlane.f32.xlu1 %v3050_v23  ;;  %v4240_v47 = vld [vmem:[#allocation15 + $0x30] ss:$8 sps:$4 sm:$0xff]   ;;  %v4241_v0 = vld [vmem:[#allocation15 + $0x24] ss:$8 sps:$4 sm:$0xff]   ;;  %v4243_v17 = vld [vmem:[#allocation15 + $0x20] ss:$8 sps:$4 sm:$0xff]  }
0x12b4   : > { %3192 = vmatprep.subr.bf16.mxu0 %v4238_v10  ;;  %3884 = vmatprep.subr.bf16.mxu1 %v4238_v10  ;;  %v4244_v51 = vld [vmem:[#allocation15 + $0x14] ss:$8 sps:$4 sm:$0xff]   ;;  %v4636_v12 = vmov 0   ;;  %v4246_v27 = vld [vmem:[#allocation15 + $0x10] ss:$8 sps:$4 sm:$0xff]  }
0x12b5   : > { %3193 = vmatpush1.bf16.msra.mxu0 %v4240_v47  ;;  %3888 = vmatpush1.bf16.msra.mxu1 %v4240_v47  ;;  %v4247_v33 = vld [vmem:[#allocation15 + $0x4] ss:$8 sps:$4 sm:$0xff]   ;;  %v4249_v3 = vld [vmem:[#allocation15] ss:$8 sps:$4 sm:$0xff]   ;;  %v3648_v43 = vld [vmem:[%s5774_s22] ss:$0 sm:$0xff] }
0x12b6   : > { %3194 = vmatprep.subr.bf16.mxu0 %v4241_v0  ;;  %3885 = vmatprep.subr.bf16.mxu1 %v4241_v0  ;;  %v3649_v41 = vld [vmem:[%s5775_s15] ss:$0 sm:$0xff] }
0x12b7   : > { %3048 = vadd.xlane.f32.xlu0 %v3047_v24  ;;  %3054 = vadd.xlane.f32.xlu1 %v3053_v59  ;;  %v3126_v59 = vld [vmem:[%s5776_s3] sm:$0x3] }
0x12b8   : > { %3216 = vmatprep.mubr.bf16.mxu0 %v4636_v12  ;;  %3226 = vmatprep.mubr.bf16.mxu1 %v4636_v12 }
0x12b9   : > { %3195 = vmatpush1.bf16.msra.mxu0 %v4243_v17  ;;  %3889 = vmatpush1.bf16.msra.mxu1 %v4243_v17 }
0x12ba   : > { %3196 = vmatprep.subr.bf16.mxu0 %v4244_v51  ;;  %3886 = vmatprep.subr.bf16.mxu1 %v4244_v51 }
0x12bd   : > { %3197 = vmatpush1.bf16.msra.mxu0 %v4246_v27  ;;  %3890 = vmatpush1.bf16.msra.mxu1 %v4246_v27 }
0x12be   : > { %3198 = vmatprep.subr.bf16.mxu0 %v4247_v33  ;;  %3887 = vmatprep.subr.bf16.mxu1 %v4247_v33 }
0x12c1   : > { %3199 = vmatpush1.bf16.msra.mxu0 %v4249_v3  ;;  %3891 = vmatpush1.bf16.msra.mxu1 %v4249_v3 }
0x133c   : > { %v3046_v35 = vpop.xlane.xlu0 %3045  ;;  %v3052_v49 = vpop.xlane.xlu1 %3051 }
0x133d   : > { %v3056_v14 = vmul.f32 0.015625, %v3046_v35  ;;  %v3058_v53 = vmul.f32 0.015625, %v3052_v49  ;;  %v3131_v35 = vrot.slane %v3126_v59, %v5115_v15  ;;  %v3135_v49 = vrot.slane %v3126_v59, %v5121_v18 }
0x133f   : > { %v5526_v13 = vsub.f32 %v3030_v30, %v3056_v14  ;;  %v5528_v54 = vsub.f32 %v3032_v25, %v3058_v53 }
0x1340   : > { %v3049_v57 = vpop.xlane.xlu0 %3048  ;;  %v3055_v26 = vpop.xlane.xlu1 %3054 }
0x1341   : > { %v3057_v61 = vmul.f32 0.015625, %v3049_v57  ;;  %v3059_v62 = vmul.f32 0.015625, %v3055_v26  ;;  %v3064_v63 = vmul.f32 %v5526_v13, %v5526_v13  ;;  %v3066_v52 = vmul.f32 %v5528_v54, %v5528_v54 }
0x1343   : > { %v3061_v1 = vsub.f32 %v3031_v22, %v3057_v61  ;;  %v5534_v16 = vsub.f32 %v3033_v50, %v3059_v62  ;;  %v3068_v2 = vsel %vm1040_vm1, %v3064_v63, 0.0  ;;  %v3074_v4 = vsel %vm1040_vm1, %v3066_v52, 0.0 }
0x1344   : > { %3069 = vadd.xlane.f32.xlu0 %v3068_v2 }
0x1345   : > { %v3065_v32 = vmul.f32 %v3061_v1, %v3061_v1  ;;  %v3067_v6 = vmul.f32 %v5534_v16, %v5534_v16 }
0x1347   : > { %v3071_v36 = vsel %vm1040_vm1, %v3065_v32, 0.0  ;;  %v3077_v8 = vsel %vm1040_vm1, %v3067_v6, 0.0 }
0x1348   : > { %3075 = vadd.xlane.f32.xlu0 %v3074_v4  ;;  %3072 = vadd.xlane.f32.xlu1 %v3071_v36 }
0x134c   : > { %3078 = vadd.xlane.f32.xlu1 %v3077_v8 }
0x13cd   : > { %v3070_v28 = vpop.xlane.xlu0 %3069 }
0x13ce   : > { %v3080_v55 = vmul.f32 0.015625, %v3070_v28 }
0x13d0   : > { %v3084_v5 = vadd.f32 1e-05, %v3080_v55 }
0x13d1   : > { %v3073_v29 = vpop.xlane.xlu1 %3072  ;;  %v3076_v58 = vpop.xlane.xlu0 %3075 }
0x13d2   : > { %4250 = vrsqrt.f32 %v3084_v5  ;;  %v3081_v11 = vmul.f32 0.015625, %v3073_v29  ;;  %v3082_v56 = vmul.f32 0.015625, %v3076_v58 }
0x13d4   : > { %v3085_v19 = vadd.f32 1e-05, %v3081_v11  ;;  %v3086_v21 = vadd.f32 1e-05, %v3082_v56 }
0x13d5   : > { %v3079_v60 = vpop.xlane.xlu1 %3078 }
0x13d6   : > { %4252 = vrsqrt.f32 %v3085_v19  ;;  %v3083_v38 = vmul.f32 0.015625, %v3079_v60 }
0x13d7   : > { %4254 = vrsqrt.f32 %v3086_v21 }
0x13d8   : > { %v3087_v44 = vadd.f32 1e-05, %v3083_v38 }
0x13da   : > { %4256 = vrsqrt.f32 %v3087_v44 }
0x13df   : > { %v4251_v39 = vpop.eup %4250 }
0x13e0   : > { %v3092_v42 = vmul.f32 %v4251_v39, %v5526_v13 }
0x13e2   : > { %v3102_v48 = vmul.f32 %v3648_v43, %v3092_v42 }
0x13e3   : > { %v4253_v45 = vpop.eup %4252 }
0x13e4   : > { %v4255_v34 = vpop.eup %4254  ;;  %v3093_v46 = vmul.f32 %v4253_v45, %v3061_v1  ;;  %v3112_v30 = vadd.f32 %v3649_v41, %v3102_v48 }
0x13e5   : > { %v3094_v25 = vmul.f32 %v4255_v34, %v5528_v54 }
0x13e6   : > { %v3103_v31 = vmul.f32 %v3648_v43, %v3093_v46 }
0x13e7   : > { %v4257_v9 = vpop.eup %4256  ;;  %v3104_v50 = vmul.f32 %v3648_v43, %v3094_v25 }
0x13e8   : > { %v3113_v40 = vadd.f32 %v3649_v41, %v3103_v31  ;;  %v3095_v7 = vmul.f32 %v4257_v9, %v5534_v16 }
0x13e9   : > { %v3114_v37 = vadd.f32 %v3649_v41, %v3104_v50 }
0x13ea   : > { %v3116_v20 = vpack.c.bf16 %v3113_v40, %v3112_v30  ;;  %v3105_v22 = vmul.f32 %v3648_v43, %v3095_v7 }
0x13ec   : > { %3658 = vmatmul.mubr.msk.bf16.vlgmr.msra.gmra.mxu0 %vm1040_vm1, %v3116_v20  ;;  %v3115_v23 = vadd.f32 %v3649_v41, %v3105_v22 }
0x13ee   : > { %v3117_v24 = vpack.c.bf16 %v3115_v23, %v3114_v37 }
0x13f0   : > { %3659 = vmatmul.mubr.msk.bf16.vlgmr.msra.gmra.mxu1 %vm1040_vm1, %v3117_v24 }
0x14ac   : > { %v3218_v14 = vpop.f32.mrf.mxu0 }
0x14ad   : > { %v3219_v53 = vadd.f32 %v3218_v14, %v3131_v35 }
0x14ae   : > { %v3220_v13 = vpop.f32.mrf.mxu0 }
0x14af   : > { %3237 = vst [vmem:[%s5079_s28] sm:$0xff] %v3219_v53  ;;  %v3221_v54 = vadd.f32 %v3220_v13, %v3135_v49 }
0x14b0   : > { %v3222_v57 = vpop.f32.mrf.mxu0  ;;  %v3228_v26 = vpop.f32.mrf.mxu1 }
0x14b1   : > { %3238 = vst [vmem:[%s5079_s28 + $0x8] sm:$0xff] %v3221_v54  ;;  %v3223_v61 = vadd.f32 %v3222_v57, %v3131_v35  ;;  %v3229_v62 = vadd.f32 %v3228_v26, %v3131_v35 }
0x14b2   : > { %v3224_v63 = vpop.f32.mrf.mxu0  ;;  %v3230_v52 = vpop.f32.mrf.mxu1 }
0x14b3   : > { %3239 = vst [vmem:[%s5079_s28 + $0x10] sm:$0xff] %v3223_v61  ;;  %3241 = vst [vmem:[%s5079_s28 + $0x20] sm:$0xff] %v3229_v62  ;;  %v3225_v15 = vadd.f32 %v3224_v63, %v3135_v49  ;;  %v3231_v18 = vadd.f32 %v3230_v52, %v3135_v49 }
0x14b4   : > { %v3232_v1 = vpop.f32.mrf.mxu1 }
0x14b5   : > { %3240 = vst [vmem:[%s5079_s28 + $0x18] sm:$0xff] %v3225_v15  ;;  %3242 = vst [vmem:[%s5079_s28 + $0x28] sm:$0xff] %v3231_v18  ;;  %v3233_v16 = vadd.f32 %v3232_v1, %v3131_v35 }
0x14b6   : > { %v3234_v2 = vpop.f32.mrf.mxu1 }
0x14b7   : > { %3243 = vst [vmem:[%s5079_s28 + $0x30] sm:$0xff] %v3233_v16  ;;  %v3235_v4 = vadd.f32 %v3234_v2, %v3135_v49 }
0x14b9   : > { %3244 = vst [vmem:[%s5079_s28 + $0x38] sm:$0xff] %v3235_v4 }
0x14ba PF: > { %s5777_s4 = sld [smem:[#allocation30_spill]]  ;;  %s3260_s10 = sshll.u32 %s5079_s28, 4  ;;  %s5573_s10 = int_to_ptr.vmem [resolvable:$true] %s3260_s10 }
0x14bb   : > { %s5778_s6 = sld [smem:[#allocation25_spill]]  ;;  %s4474_s0 = scalar_lea.vmem %s5573_s10, 1024 }
0x14bc   : > { %s5780_s14 = sld [smem:[#allocation62_spill]]  ;;  %p4475_p1 = scmp.ne.s32.totalorder %s5573_s10, %s4474_s0 }
0x14bd   : > { %s4637_s2 = smov [#allocation17]  }
0x14be   : > { %p4476_p2 = pnand %p4475_p1, %p4820_p7  ;;  %s4478_s29 = sshll.u32 %s4637_s2, 4  ;;  %s4479_s29 = int_to_ptr.vmem [resolvable:$false] %s4478_s29 }
0x14bf   : > { %s4480_s8 = scalar_lea.vmem %s4479_s29, 2048  ;;  %p4481_p4 = scmp.lt.s32.totalorder %s5573_s10, %s4479_s29 }
0x14c0   : > { %s3671_s11 = sshll.u32 %s5777_s4, 10  ;;  %p4477_p5 = pneg %p4476_p2 }
0x14c1   : > { %s5781_s20 = sand.u32 1, %s5778_s6   ;;  %p4482_p13 = scmp.lt.s32.totalorder %s4480_s8, %s4474_s0 }
0x14c2   : > { %s5570_s21 = scalar_lea.hbm %s5780_s14, %s3671_s11  ;;  %s5577_s17 = scalar_lea.sflag [#allocation5], %s5781_s20 }
0x14c3   : > { %p4483_p6 = por %p4482_p13, %p4481_p4 }
0x14c5   : > { %p4484_p11 = pnand %p4483_p6, %p4477_p5 }
0x14c7   : > { %4487 = shalt.err (!%p4484_p11)
}
0x14c8   : > { %s4488_s28 = scalar_lea.hbm %s5570_s21, 1024  ;;  %s4492_s5 = scalar_lea.hbm %s5780_s14, 2048 }
0x14c9   : > { %p4489_p9 = scmp.ne.s32.totalorder %s5570_s21, %s4488_s28  ;;  %p4493_p0 = scmp.lt.s32.totalorder %s5570_s21, %s5780_s14 }
0x14ca   : > { %p4494_p12 = scmp.lt.s32.totalorder %s4492_s5, %s4488_s28 }
0x14cb   : > { %p4490_p3 = pnand %p4489_p9, %p4820_p7 }
0x14cc   : > { %p4495_p10 = por %p4494_p12, %p4493_p0 }
0x14cd   : > { %p4491_p8 = pneg %p4490_p3 }
0x14cf   : > { %p4496_p1 = pnand %p4495_p10, %p4491_p8 }
0x14d1   : > { %4499 = shalt.err (!%p4496_p1)
}
0x14d2   : > { %s4638_s12 = smov 256  }
0x14d3   : > { %3916 = dma.vmem_to_hbm [thread:$0]  (%p4820_p7), %s5573_s10, 1024, %s5570_s21, %s5577_s17, %s4638_s12, %s4638_s12, %s4633_s24  }
0x14d4 PF: > { %s5782_s27 = sld [smem:[#allocation33_spill]] }
0x14d5   : > { %s5783_s22 = sld [smem:[#allocation24_spill]] }
0x14d6   : > { %s5784_s9 = sld [smem:[#allocation35_spill]] }
0x14da   : > { %p3957_p2 = scmp.ge.s32.totalorder %s5782_s27, 2 }
0x14db   : > { %s3275_s13 = sand.u32 1, %s5783_s22  }
0x14dc   : > { %p5785_p5 = scmp.ne.s32.totalorder %s5784_s9, 0  ;;  %s3276_s15 = scalar_lea.sflag [#allocation5], %s3275_s13 }
0x14de   : > { %p3945_p4 = pnand %p3957_p2, %p5785_p5 }
0x14e0   : > { %p3946_p13 = pneg %p3945_p4 }
0x14e2   : > { %4565 = dma.done.wait (%p3946_p13), %s3276_s15, 1024  }
0x14e3   : > { %4567 = vsyncadd (%p3946_p13), %s3276_s15, 4294966272  ;;  %s43_s5 = sadd.s32 1, %s5782_s27   ;;  %s5786_s2 = sld [smem:[#allocation25_spill]] }
0x14e4   : > { %p40_p6 = scmp.ge.s32.totalorder %s43_s5, 6   ;;  %s5787_s25 = sld [smem:[#allocation26_spill]] }
0x14e5   : > { %s5788_s26 = sld [smem:[#allocation39_spill]] }
0x14e6   : > { %s5789_s27 = sld [smem:[#allocation27_spill]] }
0x14e7   : > { %s5790_s3 = sld [smem:[#allocation28_spill]] }
0x14e8   : > { %s5791_s28 = sld [smem:[#allocation38_spill]]  ;;  %42 = sbr.rel (!%p40_p6) target bundleno = 37 (0x25), region = 239 }
0x14e9   : > { %s5792_s29 = sld [smem:[#allocation31_spill]] }
0x14ea   : > { %s5793_s0 = sld [smem:[#allocation32_spill]] }
0x14eb   : > { %s5794_s4 = sld [smem:[#allocation36_spill]] }
0x14ec   : > { %s5795_s30 = sld [smem:[#allocation37_spill]] }
0x14ed   :  { %3281 = vsyncpa [#allocation4], 1 }
0x14ee   :  { %3283 = vsyncpa [#allocation4 + $0x1], 1 }
0x14ef   :  { %3284 = vsyncpa [#allocation7], 1 }
0x14f0   :  { %3285 = vsyncpa [#allocation10], 1 }
0x14f1   :  { %3287 = vsyncpa [#allocation10 + $0x1], 1 }
0x14f2   :  { %3288 = vsyncpa [#allocation13], 1 }
0x14f3   :  { %3290 = vsyncpa [#allocation13 + $0x1], 1 }
0x14f4   :  { %3291 = vsyncpa [#allocation16], 1 }
0x14f5   :  { %3292 = vsyncpa [#allocation5], 1 }
0x14f6   :  { %3294 = vsyncpa [#allocation5 + $0x1], 1 }

</bundles_post_ra>
